<compile_context>
chip_gen: v7x
topology: tpu7x:2x2x1
jax: 0.10.0
libtpu: 0.0.40
codegen_flags: <defaults>
</compile_context>

<pallas_src>
import jax
import jax.numpy as jnp
from jax.experimental import pallas as pl
from jax.experimental.pallas import tpu as pltpu

# ---------------- problem sizes (small, deterministic) ----------------
B, H, E = 2, 32, 32           # batch, hidden, embedding dim
S, SL, T = 8, 4, 9            # src len, session len, tgt len (decoder runs T-1)
TM1 = T - 1
V, VU = 64, 16                # token vocab, user vocab
G3 = 3 * H                    # GRU gate width

# row offsets inside the packed activation array [64, E] (all multiples of 8)
_R_SESS, _R_SRC, _R_TGT, _R_USER, _R_STM, _R_MASK = 0, 8, 24, 40, 48, 56

# row offsets inside the packed bf16 GRU-weight array [6*32, 3H] (multiples of 16)
_O_IH_S = 0
_O_HH_S = _O_IH_S + E
_O_IH_E = _O_HH_S + H
_O_HH_E = _O_IH_E + E
_O_IH_D = _O_HH_E + H
_O_HH_D = _O_IH_D + E
_WG_ROWS = _O_HH_D + H


def nmt_kernel(act_ref, gate_ref, wg_ref, wsq_ref, b_ref,
               click_ref, dec_out_ref, attn_ref, dec_state_ref):
    f32, bf16 = jnp.float32, jnp.bfloat16

    # ---- packed bf16 weights (pre-cast on host; static tile-aligned row slices) ----
    w_ih_s = wg_ref[_O_IH_S:_O_IH_S + E, :]
    w_hh_s = wg_ref[_O_HH_S:_O_HH_S + H, :]
    w_ih_e = wg_ref[_O_IH_E:_O_IH_E + E, :]
    w_hh_e = wg_ref[_O_HH_E:_O_HH_E + H, :]
    w_ih_d = wg_ref[_O_IH_D:_O_IH_D + E, :]
    w_hh_d = wg_ref[_O_HH_D:_O_HH_D + H, :]
    w_stm = wsq_ref[0 * H:1 * H, :]
    w_attnT = wsq_ref[1 * H:2 * H, :]        # stored pre-transposed (w_attn.T)
    w_out_c = wsq_ref[2 * H:3 * H, :]
    w_out_h = wsq_ref[3 * H:4 * H, :]

    # ---- packed f32 biases + click weight; hoisted broadcasts ----
    b_all = b_ref[...]                                         # [8, 3H]
    b_ih_s = b_all[0:1, :]
    b_ih_e = b_all[2:3, :]
    b_ih_d = b_all[4:5, :]
    b_hh_s = jnp.broadcast_to(b_all[1:2, :], (B, G3))
    b_hh_e = jnp.broadcast_to(b_all[3:4, :], (B, G3))
    b_hh_d = jnp.broadcast_to(b_all[5:6, :], (B, G3))
    b_out = jnp.broadcast_to(b_all[6:7, 0:H], (B, H))
    w_click = b_all[7:8, 0:H]                                  # [1, H]

    # ---- packed activations ----
    sess_x = act_ref[_R_SESS:_R_SESS + SL * B, :].astype(bf16)   # [SL*B, E]
    src_x = act_ref[_R_SRC:_R_SRC + S * B, :].astype(bf16)       # [S*B, E]
    tgt_x = act_ref[_R_TGT:_R_TGT + TM1 * B, :].astype(bf16)     # [TM1*B, E]
    user_e = act_ref[_R_USER:_R_USER + B, :]                     # [B, H] f32
    stm_x = act_ref[_R_STM:_R_STM + B, :].astype(bf16)           # [B, H]
    mask_bias = act_ref[_R_MASK:_R_MASK + B, 0:S]                # [B, S], 0 / -1e9
    gates = gate_ref[...]                                        # [SL+S+1, B, 1]
    b_click = gates[SL + S]                                      # [B, 1]

    # ---- input projections hoisted out of the serial RNN chains ----
    # one [L*B, E] @ [E, 3H] matmul per sequence; reshaped once to [L, B, 3H] so the
    # per-step access is a free leading-dim index.
    gi_s = (jnp.dot(sess_x, w_ih_s, preferred_element_type=f32) + b_ih_s
            ).reshape(SL, B, G3)
    gi_e = (jnp.dot(src_x, w_ih_e, preferred_element_type=f32) + b_ih_e
            ).reshape(S, B, G3)
    gi_d = (jnp.dot(tgt_x, w_ih_d, preferred_element_type=f32) + b_ih_d
            ).reshape(TM1, B, G3)

    def gru_step(gi_t, h, w_hh, b_hh):
        """nn.GRU cell (gate order r, z, n); input projection gi_t precomputed."""
        gh = jnp.dot(h.astype(bf16), w_hh, preferred_element_type=f32) + b_hh
        r = jax.nn.sigmoid(gi_t[:, 0:H] + gh[:, 0:H])
        z = jax.nn.sigmoid(gi_t[:, H:2 * H] + gh[:, H:2 * H])
        n = jnp.tanh(gi_t[:, 2 * H:] + r * gh[:, 2 * H:])
        return (1.0 - z) * n + z * h

    # ----------------- session encoder (GRU) -----------------
    h = jnp.tanh(user_e + jnp.dot(stm_x, w_stm, preferred_element_type=f32))
    for t in range(SL):                                   # fully unrolled
        h_new = gru_step(gi_s[t], h, w_hh_s, b_hh_s)
        h = h + gates[t] * (h_new - h)                    # freeze past session length
    h_sess = h                                            # session_final [B, H]

    # click score: [B,H]x[H,1] kept off the MXU (VPU mul + XLU lane reduce)
    click_logit = jnp.sum(h_sess * w_click, axis=-1, keepdims=True) + b_click
    click_ref[...] = jax.nn.sigmoid(click_logit)

    # ----------------- source encoder (GRU) -----------------
    h = jnp.zeros((B, H), f32)
    mem_steps = []
    for t in range(S):                                    # fully unrolled
        h_new = gru_step(gi_e[t], h, w_hh_e, b_hh_e)
        h = h + gates[SL + t] * (h_new - h)
        mem_steps.append(h)                               # register-carried memory bank
    h_enc = h
    mem16 = jnp.stack(mem_steps, axis=1).astype(bf16)     # [B, S, H]

    # ---- decoder-invariant precomputes (off the serial per-step chain) ----
    # Ws[b,s,k]    = sum_h mem[b,s,h] * w_attn[k,h]   (so scores = h . Ws)
    # memWc[b,s,k] = sum_h mem[b,s,h] * w_out_c[h,k]  (so ctx@Wc = align . memWc)
    Ws = jnp.einsum('bsh,bhk->bsk', mem16, jnp.broadcast_to(w_attnT, (B, H, H)),
                    preferred_element_type=f32).astype(bf16)      # [B, S, H]
    memWc = jnp.einsum('bsh,bhk->bsk', mem16, jnp.broadcast_to(w_out_c, (B, H, H)),
                       preferred_element_type=f32).astype(bf16)   # [B, S, H]

    # -------- decoder (GRU + Luong "general" attention), fully unrolled --------
    h = h_enc + h_sess                                    # enc_final + session_final
    dec_outs, aligns = [], []
    for t in range(TM1):
        h = gru_step(gi_d[t], h, w_hh_d, b_hh_d)
        h16 = h.astype(bf16)
        hWh = jnp.dot(h16, w_out_h, preferred_element_type=f32)   # overlaps softmax path
        scores = jnp.einsum('bqk,bsk->bqs', h16[:, None, :], Ws,
                            preferred_element_type=f32)[:, 0, :] + mask_bias  # [B, S]
        m = jnp.max(scores, axis=-1, keepdims=True)
        p = jnp.exp(scores - m)
        align = p * pl.reciprocal(jnp.sum(p, axis=-1, keepdims=True), approx=False)
        ctxWc = jnp.einsum('bqs,bsk->bqk', align[:, None, :].astype(bf16), memWc,
                           preferred_element_type=f32)[:, 0, :]    # [B, H]
        attn_h = jnp.tanh(ctxWc + hWh + b_out)
        dec_outs.append(attn_h)
        aligns.append(align)

    # batched, register-accumulated output stores (single write per output)
    dec_out_ref[...] = jnp.stack(dec_outs, axis=0)        # [TM1, B, H]
    attn_ref[...] = jnp.stack(aligns, axis=0)             # [TM1, B, S]
    dec_state_ref[...] = h[None, :, :]                    # [1, B, H]


def init_params(key):
    names_shapes = [
        ("emb_sess", (V, E)), ("emb_user", (VU, H)), ("emb_src", (V, E)),
        ("emb_tgt", (V, E)),
        ("w_stm", (H, H)),
        ("w_ih_sess", (E, 3 * H)), ("w_hh_sess", (H, 3 * H)),
        ("b_ih_sess", (1, 3 * H)), ("b_hh_sess", (1, 3 * H)),
        ("w_click", (H, 1)), ("b_click", (1, 1)),
        ("w_ih_enc", (E, 3 * H)), ("w_hh_enc", (H, 3 * H)),
        ("b_ih_enc", (1, 3 * H)), ("b_hh_enc", (1, 3 * H)),
        ("w_ih_dec", (E, 3 * H)), ("w_hh_dec", (H, 3 * H)),
        ("b_ih_dec", (1, 3 * H)), ("b_hh_dec", (1, 3 * H)),
        ("w_attn", (H, H)), ("w_out_c", (H, H)), ("w_out_h", (H, H)),
        ("b_out", (1, H)),
    ]
    keys = jax.random.split(key, len(names_shapes))
    return {n: jax.random.normal(k, s, jnp.float32) * 0.1
            for (n, s), k in zip(names_shapes, keys)}


def pack_params(p):
    """Pack the ~20 small tensors into 3 kernel inputs; MXU operands pre-cast to bf16."""
    bf16 = jnp.bfloat16
    w_gru = jnp.concatenate(
        [p["w_ih_sess"], p["w_hh_sess"], p["w_ih_enc"], p["w_hh_enc"],
         p["w_ih_dec"], p["w_hh_dec"]], axis=0).astype(bf16)               # [6*32, 3H]
    w_sq = jnp.concatenate(
        [p["w_stm"], p["w_attn"].T, p["w_out_c"], p["w_out_h"]],
        axis=0).astype(bf16)                                               # [4H, H]
    zeros_2h = jnp.zeros((1, 2 * H), jnp.float32)
    b_pack = jnp.concatenate(
        [p["b_ih_sess"], p["b_hh_sess"], p["b_ih_enc"], p["b_hh_enc"],
         p["b_ih_dec"], p["b_hh_dec"],
         jnp.concatenate([p["b_out"], zeros_2h], axis=1),
         jnp.concatenate([p["w_click"].T, zeros_2h], axis=1)], axis=0)     # [8, 3H]
    return {"w_gru": w_gru, "w_sq": w_sq, "b_pack": b_pack,
            "b_click": p["b_click"],
            "emb_sess": p["emb_sess"], "emb_user": p["emb_user"],
            "emb_src": p["emb_src"], "emb_tgt": p["emb_tgt"]}


@jax.jit
def nmt_forward(pk, session, user, stm, src, tgt, session_lengths, lengths):
    """Mirrors NMTModel.forward; returns (click_score, decoder_outputs, attns, dec_state)."""
    f32 = jnp.float32
    tgt = tgt[:-1]                                                  # exclude last target token

    # Embedding gathers (fused by XLA under jit into the single packed activation input).
    sess_emb = jnp.take(pk["emb_sess"], session.reshape(-1), axis=0)   # [SL*B, E]
    src_emb = jnp.take(pk["emb_src"], src.reshape(-1), axis=0)         # [S*B, E]
    tgt_emb = jnp.take(pk["emb_tgt"], tgt.reshape(-1), axis=0)         # [TM1*B, E]
    user_emb = jnp.take(pk["emb_user"], user, axis=0)                  # [B, H]

    mask = (jnp.arange(S)[None, :] < lengths[:, None]).astype(f32)     # [B, S]
    mask_bias = (mask - 1.0) * 1e9                                     # 0 where valid
    pad_rows = lambda x, r: jnp.pad(x, ((0, r - x.shape[0]), (0, 0)))
    act_pack = jnp.concatenate([
        sess_emb,                                          # rows  0:8
        src_emb,                                           # rows  8:24
        tgt_emb,                                           # rows 24:40
        pad_rows(user_emb, 8),                             # rows 40:48 (user in 40:42)
        pad_rows(stm, 8),                                  # rows 48:56 (stm  in 48:50)
        pad_rows(jnp.pad(mask_bias, ((0, 0), (0, E - S))), 8),  # rows 56:64 (mask 56:58)
    ], axis=0)                                             # [64, E] f32

    # per-step 0/1 gates (freeze hidden state past sequence length) + click bias row
    gate_sess = (jnp.arange(SL)[:, None] < session_lengths[None, :]).astype(f32)  # [SL,B]
    gate_src = (jnp.arange(S)[:, None] < lengths[None, :]).astype(f32)            # [S,B]
    gate_pack = jnp.concatenate(
        [gate_sess, gate_src, jnp.broadcast_to(pk["b_click"], (1, B))],
        axis=0)[:, :, None]                                # [SL+S+1, B, 1]

    out_shapes = (
        jax.ShapeDtypeStruct((B, 1), f32),                 # click_score
        jax.ShapeDtypeStruct((TM1, B, H), f32),            # decoder outputs
        jax.ShapeDtypeStruct((TM1, B, S), f32),            # attention (PyTorch layout)
        jax.ShapeDtypeStruct((1, B, H), f32),              # final decoder state
    )
    vmem = pl.BlockSpec(memory_space=pltpu.MemorySpace.VMEM)
    click, dec_out, attn, dec_state = pl.pallas_call(
        nmt_kernel,
        out_shape=out_shapes,
        in_specs=[vmem] * 5,
        out_specs=(vmem, vmem, vmem, vmem),
    )(act_pack, gate_pack, pk["w_gru"], pk["w_sq"], pk["b_pack"])
    return click, dec_out, {"std": attn}, dec_state


if __name__ == "__main__":
    key = jax.random.PRNGKey(0)
    kp, k1, k2, k3, k4, k5 = jax.random.split(key, 6)
    params = init_params(kp)
    packed = pack_params(params)                           # weights packed/cast once

    session = jax.random.randint(k1, (SL, B), 0, V)        # [session_len, batch]
    user = jax.random.randint(k2, (B,), 0, VU)             # [batch]
    stm = jax.random.normal(k3, (B, H), jnp.float32)       # [batch, hidden]
    src = jax.random.randint(k4, (S, B), 0, V)             # [src_len, batch]
    tgt = jax.random.randint(k5, (T, B), 0, V)             # [tgt_len, batch]
    session_lengths = jnp.array([SL, SL - 1], jnp.int32)
    lengths = jnp.array([S, S - 2], jnp.int32)

    click, dec_out, attns, dec_state = nmt_forward(
        packed, session, user, stm, src, tgt, session_lengths, lengths)
    jax.block_until_ready((click, dec_out, attns["std"], dec_state))

    assert click.shape == (B, 1)
    assert dec_out.shape == (TM1, B, H)
    assert attns["std"].shape == (TM1, B, S)
    assert dec_state.shape == (1, B, H)
    assert bool(jnp.all(jnp.isfinite(dec_out)))
    assert bool(jnp.all(jnp.isfinite(attns["std"])))
    print("KERNEL_OK")
</pallas_src>

<mosaic_0001>
module attributes {stable_mosaic.version = 11 : i64} {
  func.func @nmt_kernel(%arg0: memref<64x32xf32, #tpu.memory_space<vmem>>, %arg1: memref<13x2x1xf32, #tpu.memory_space<vmem>>, %arg2: memref<192x96xbf16, #tpu.memory_space<vmem>>, %arg3: memref<128x32xbf16, #tpu.memory_space<vmem>>, %arg4: memref<8x96xf32, #tpu.memory_space<vmem>>, %arg5: memref<2x1xf32, #tpu.memory_space<vmem>>, %arg6: memref<8x2x32xf32, #tpu.memory_space<vmem>>, %arg7: memref<8x2x8xf32, #tpu.memory_space<vmem>>, %arg8: memref<1x2x32xf32, #tpu.memory_space<vmem>>) attributes {dimension_semantics = [], scalar_prefetch = 0 : i64, scratch_operands = 0 : i64, tpu.core_type = #tpu.core_type<tc>} {
    %c0 = arith.constant 0 : index
    %c0_0 = arith.constant 0 : index
    %0 = vector.load %arg2[%c0, %c0_0] : memref<192x96xbf16, #tpu.memory_space<vmem>>, vector<32x96xbf16>
    %c32 = arith.constant 32 : index
    %c0_1 = arith.constant 0 : index
    %1 = vector.load %arg2[%c32, %c0_1] : memref<192x96xbf16, #tpu.memory_space<vmem>>, vector<32x96xbf16>
    %c64 = arith.constant 64 : index
    %c0_2 = arith.constant 0 : index
    %2 = vector.load %arg2[%c64, %c0_2] : memref<192x96xbf16, #tpu.memory_space<vmem>>, vector<32x96xbf16>
    %c96 = arith.constant 96 : index
    %c0_3 = arith.constant 0 : index
    %3 = vector.load %arg2[%c96, %c0_3] : memref<192x96xbf16, #tpu.memory_space<vmem>>, vector<32x96xbf16>
    %c128 = arith.constant 128 : index
    %c0_4 = arith.constant 0 : index
    %4 = vector.load %arg2[%c128, %c0_4] : memref<192x96xbf16, #tpu.memory_space<vmem>>, vector<32x96xbf16>
    %c160 = arith.constant 160 : index
    %c0_5 = arith.constant 0 : index
    %5 = vector.load %arg2[%c160, %c0_5] : memref<192x96xbf16, #tpu.memory_space<vmem>>, vector<32x96xbf16>
    %c0_6 = arith.constant 0 : index
    %c0_7 = arith.constant 0 : index
    %6 = vector.load %arg3[%c0_6, %c0_7] : memref<128x32xbf16, #tpu.memory_space<vmem>>, vector<32x32xbf16>
    %c32_8 = arith.constant 32 : index
    %c0_9 = arith.constant 0 : index
    %7 = vector.load %arg3[%c32_8, %c0_9] : memref<128x32xbf16, #tpu.memory_space<vmem>>, vector<32x32xbf16>
    %c64_10 = arith.constant 64 : index
    %c0_11 = arith.constant 0 : index
    %8 = vector.load %arg3[%c64_10, %c0_11] : memref<128x32xbf16, #tpu.memory_space<vmem>>, vector<32x32xbf16>
    %c96_12 = arith.constant 96 : index
    %c0_13 = arith.constant 0 : index
    %9 = vector.load %arg3[%c96_12, %c0_13] : memref<128x32xbf16, #tpu.memory_space<vmem>>, vector<32x32xbf16>
    %c0_14 = arith.constant 0 : index
    %c0_15 = arith.constant 0 : index
    %10 = vector.load %arg4[%c0_14, %c0_15] : memref<8x96xf32, #tpu.memory_space<vmem>>, vector<8x96xf32>
    %11 = vector.extract_strided_slice %10 {offsets = [0, 0], sizes = [1, 96], strides = [1, 1]} : vector<8x96xf32> to vector<1x96xf32>
    %12 = vector.extract_strided_slice %10 {offsets = [2, 0], sizes = [1, 96], strides = [1, 1]} : vector<8x96xf32> to vector<1x96xf32>
    %13 = vector.extract_strided_slice %10 {offsets = [4, 0], sizes = [1, 96], strides = [1, 1]} : vector<8x96xf32> to vector<1x96xf32>
    %14 = vector.extract_strided_slice %10 {offsets = [1, 0], sizes = [1, 96], strides = [1, 1]} : vector<8x96xf32> to vector<1x96xf32>
    %15 = vector.shape_cast %14 : vector<1x96xf32> to vector<1x96xf32>
    %16 = vector.broadcast %15 : vector<1x96xf32> to vector<2x96xf32>
    %17 = vector.extract_strided_slice %10 {offsets = [3, 0], sizes = [1, 96], strides = [1, 1]} : vector<8x96xf32> to vector<1x96xf32>
    %18 = vector.shape_cast %17 : vector<1x96xf32> to vector<1x96xf32>
    %19 = vector.broadcast %18 : vector<1x96xf32> to vector<2x96xf32>
    %20 = vector.extract_strided_slice %10 {offsets = [5, 0], sizes = [1, 96], strides = [1, 1]} : vector<8x96xf32> to vector<1x96xf32>
    %21 = vector.shape_cast %20 : vector<1x96xf32> to vector<1x96xf32>
    %22 = vector.broadcast %21 : vector<1x96xf32> to vector<2x96xf32>
    %23 = vector.extract_strided_slice %10 {offsets = [6, 0], sizes = [1, 32], strides = [1, 1]} : vector<8x96xf32> to vector<1x32xf32>
    %24 = vector.shape_cast %23 : vector<1x32xf32> to vector<1x32xf32>
    %25 = vector.broadcast %24 : vector<1x32xf32> to vector<2x32xf32>
    %26 = vector.extract_strided_slice %10 {offsets = [7, 0], sizes = [1, 32], strides = [1, 1]} : vector<8x96xf32> to vector<1x32xf32>
    %c0_16 = arith.constant 0 : index
    %c0_17 = arith.constant 0 : index
    %27 = vector.load %arg0[%c0_16, %c0_17] : memref<64x32xf32, #tpu.memory_space<vmem>>, vector<8x32xf32>
    %28 = arith.truncf %27 : vector<8x32xf32> to vector<8x32xbf16>
    %c8 = arith.constant 8 : index
    %c0_18 = arith.constant 0 : index
    %29 = vector.load %arg0[%c8, %c0_18] : memref<64x32xf32, #tpu.memory_space<vmem>>, vector<16x32xf32>
    %30 = arith.truncf %29 : vector<16x32xf32> to vector<16x32xbf16>
    %c24 = arith.constant 24 : index
    %c0_19 = arith.constant 0 : index
    %31 = vector.load %arg0[%c24, %c0_19] : memref<64x32xf32, #tpu.memory_space<vmem>>, vector<16x32xf32>
    %32 = arith.truncf %31 : vector<16x32xf32> to vector<16x32xbf16>
    %c40 = arith.constant 40 : index
    %c0_20 = arith.constant 0 : index
    %33 = vector.load %arg0[%c40, %c0_20] : memref<64x32xf32, #tpu.memory_space<vmem>>, vector<2x32xf32>
    %c48 = arith.constant 48 : index
    %c0_21 = arith.constant 0 : index
    %34 = vector.load %arg0[%c48, %c0_21] : memref<64x32xf32, #tpu.memory_space<vmem>>, vector<2x32xf32>
    %35 = arith.truncf %34 : vector<2x32xf32> to vector<2x32xbf16>
    %c56 = arith.constant 56 : index
    %c0_22 = arith.constant 0 : index
    %36 = vector.load %arg0[%c56, %c0_22] : memref<64x32xf32, #tpu.memory_space<vmem>>, vector<2x8xf32>
    %c0_23 = arith.constant 0 : index
    %c0_24 = arith.constant 0 : index
    %c0_25 = arith.constant 0 : index
    %37 = vector.load %arg1[%c0_23, %c0_24, %c0_25] : memref<13x2x1xf32, #tpu.memory_space<vmem>>, vector<13x2x1xf32>
    %38 = vector.extract_strided_slice %37 {offsets = [12, 0, 0], sizes = [1, 2, 1], strides = [1, 1, 1]} : vector<13x2x1xf32> to vector<1x2x1xf32>
    %39 = vector.shape_cast %38 : vector<1x2x1xf32> to vector<2x1xf32>
    %cst = arith.constant dense<0.000000e+00> : vector<8x96xf32>
    %40 = tpu.matmul %28, %0, %cst {dimension_numbers = #tpu.dot_dimension_numbers<[1], [0], [0], [1], [0, 0, 1, 1], [], []>} : vector<8x32xbf16>, vector<32x96xbf16>, vector<8x96xf32> -> vector<8x96xf32>
    %41 = vector.broadcast %11 : vector<1x96xf32> to vector<8x96xf32>
    %42 = arith.addf %40, %41 : vector<8x96xf32>
    %43 = vector.shape_cast %42 : vector<8x96xf32> to vector<4x2x96xf32>
    %cst_26 = arith.constant dense<0.000000e+00> : vector<16x96xf32>
    %44 = tpu.matmul %30, %2, %cst_26 {dimension_numbers = #tpu.dot_dimension_numbers<[1], [0], [0], [1], [0, 0, 1, 1], [], []>} : vector<16x32xbf16>, vector<32x96xbf16>, vector<16x96xf32> -> vector<16x96xf32>
    %45 = vector.broadcast %12 : vector<1x96xf32> to vector<16x96xf32>
    %46 = arith.addf %44, %45 : vector<16x96xf32>
    %47 = vector.shape_cast %46 : vector<16x96xf32> to vector<8x2x96xf32>
    %cst_27 = arith.constant dense<0.000000e+00> : vector<16x96xf32>
    %48 = tpu.matmul %32, %4, %cst_27 {dimension_numbers = #tpu.dot_dimension_numbers<[1], [0], [0], [1], [0, 0, 1, 1], [], []>} : vector<16x32xbf16>, vector<32x96xbf16>, vector<16x96xf32> -> vector<16x96xf32>
    %49 = vector.broadcast %13 : vector<1x96xf32> to vector<16x96xf32>
    %50 = arith.addf %48, %49 : vector<16x96xf32>
    %51 = vector.shape_cast %50 : vector<16x96xf32> to vector<8x2x96xf32>
    %cst_28 = arith.constant dense<0.000000e+00> : vector<2x32xf32>
    %52 = tpu.matmul %35, %6, %cst_28 {dimension_numbers = #tpu.dot_dimension_numbers<[1], [0], [0], [1], [0, 0, 1, 1], [], []>} : vector<2x32xbf16>, vector<32x32xbf16>, vector<2x32xf32> -> vector<2x32xf32>
    %53 = arith.addf %33, %52 : vector<2x32xf32>
    %54 = math.tanh %53 : vector<2x32xf32>
    %55 = vector.extract_strided_slice %43 {offsets = [0, 0, 0], sizes = [1, 2, 96], strides = [1, 1, 1]} : vector<4x2x96xf32> to vector<1x2x96xf32>
    %56 = vector.shape_cast %55 : vector<1x2x96xf32> to vector<2x96xf32>
    %57 = arith.truncf %54 : vector<2x32xf32> to vector<2x32xbf16>
    %cst_29 = arith.constant dense<0.000000e+00> : vector<2x96xf32>
    %58 = tpu.matmul %57, %1, %cst_29 {dimension_numbers = #tpu.dot_dimension_numbers<[1], [0], [0], [1], [0, 0, 1, 1], [], []>} : vector<2x32xbf16>, vector<32x96xbf16>, vector<2x96xf32> -> vector<2x96xf32>
    %59 = arith.addf %58, %16 : vector<2x96xf32>
    %60 = vector.extract_strided_slice %56 {offsets = [0, 0], sizes = [2, 32], strides = [1, 1]} : vector<2x96xf32> to vector<2x32xf32>
    %61 = vector.extract_strided_slice %59 {offsets = [0, 0], sizes = [2, 32], strides = [1, 1]} : vector<2x96xf32> to vector<2x32xf32>
    %62 = arith.addf %60, %61 : vector<2x32xf32>
    %63 = arith.negf %62 : vector<2x32xf32>
    %64 = math.exp %63 : vector<2x32xf32>
    %cst_30 = arith.constant 1.000000e+00 : f32
    %65 = vector.broadcast %cst_30 : f32 to vector<2x32xf32>
    %66 = arith.addf %65, %64 : vector<2x32xf32>
    %67 = arith.divf %65, %66 : vector<2x32xf32>
    %68 = vector.extract_strided_slice %56 {offsets = [0, 32], sizes = [2, 32], strides = [1, 1]} : vector<2x96xf32> to vector<2x32xf32>
    %69 = vector.extract_strided_slice %59 {offsets = [0, 32], sizes = [2, 32], strides = [1, 1]} : vector<2x96xf32> to vector<2x32xf32>
    %70 = arith.addf %68, %69 : vector<2x32xf32>
    %71 = arith.negf %70 : vector<2x32xf32>
    %72 = math.exp %71 : vector<2x32xf32>
    %cst_31 = arith.constant 1.000000e+00 : f32
    %73 = vector.broadcast %cst_31 : f32 to vector<2x32xf32>
    %74 = arith.addf %73, %72 : vector<2x32xf32>
    %75 = arith.divf %73, %74 : vector<2x32xf32>
    %76 = vector.extract_strided_slice %56 {offsets = [0, 64], sizes = [2, 32], strides = [1, 1]} : vector<2x96xf32> to vector<2x32xf32>
    %77 = vector.extract_strided_slice %59 {offsets = [0, 64], sizes = [2, 32], strides = [1, 1]} : vector<2x96xf32> to vector<2x32xf32>
    %78 = arith.mulf %67, %77 : vector<2x32xf32>
    %79 = arith.addf %76, %78 : vector<2x32xf32>
    %80 = math.tanh %79 : vector<2x32xf32>
    %cst_32 = arith.constant 1.000000e+00 : f32
    %81 = vector.broadcast %cst_32 : f32 to vector<2x32xf32>
    %82 = arith.subf %81, %75 : vector<2x32xf32>
    %83 = arith.mulf %82, %80 : vector<2x32xf32>
    %84 = arith.mulf %75, %54 : vector<2x32xf32>
    %85 = arith.addf %83, %84 : vector<2x32xf32>
    %86 = vector.extract_strided_slice %37 {offsets = [0, 0, 0], sizes = [1, 2, 1], strides = [1, 1, 1]} : vector<13x2x1xf32> to vector<1x2x1xf32>
    %87 = vector.shape_cast %86 : vector<1x2x1xf32> to vector<2x1xf32>
    %88 = arith.subf %85, %54 : vector<2x32xf32>
    %89 = vector.broadcast %87 : vector<2x1xf32> to vector<2x32xf32>
    %90 = arith.mulf %89, %88 : vector<2x32xf32>
    %91 = arith.addf %54, %90 : vector<2x32xf32>
    %92 = vector.extract_strided_slice %43 {offsets = [1, 0, 0], sizes = [1, 2, 96], strides = [1, 1, 1]} : vector<4x2x96xf32> to vector<1x2x96xf32>
    %93 = vector.shape_cast %92 : vector<1x2x96xf32> to vector<2x96xf32>
    %94 = arith.truncf %91 : vector<2x32xf32> to vector<2x32xbf16>
    %cst_33 = arith.constant dense<0.000000e+00> : vector<2x96xf32>
    %95 = tpu.matmul %94, %1, %cst_33 {dimension_numbers = #tpu.dot_dimension_numbers<[1], [0], [0], [1], [0, 0, 1, 1], [], []>} : vector<2x32xbf16>, vector<32x96xbf16>, vector<2x96xf32> -> vector<2x96xf32>
    %96 = arith.addf %95, %16 : vector<2x96xf32>
    %97 = vector.extract_strided_slice %93 {offsets = [0, 0], sizes = [2, 32], strides = [1, 1]} : vector<2x96xf32> to vector<2x32xf32>
    %98 = vector.extract_strided_slice %96 {offsets = [0, 0], sizes = [2, 32], strides = [1, 1]} : vector<2x96xf32> to vector<2x32xf32>
    %99 = arith.addf %97, %98 : vector<2x32xf32>
    %100 = arith.negf %99 : vector<2x32xf32>
    %101 = math.exp %100 : vector<2x32xf32>
    %cst_34 = arith.constant 1.000000e+00 : f32
    %102 = vector.broadcast %cst_34 : f32 to vector<2x32xf32>
    %103 = arith.addf %102, %101 : vector<2x32xf32>
    %104 = arith.divf %102, %103 : vector<2x32xf32>
    %105 = vector.extract_strided_slice %93 {offsets = [0, 32], sizes = [2, 32], strides = [1, 1]} : vector<2x96xf32> to vector<2x32xf32>
    %106 = vector.extract_strided_slice %96 {offsets = [0, 32], sizes = [2, 32], strides = [1, 1]} : vector<2x96xf32> to vector<2x32xf32>
    %107 = arith.addf %105, %106 : vector<2x32xf32>
    %108 = arith.negf %107 : vector<2x32xf32>
    %109 = math.exp %108 : vector<2x32xf32>
    %cst_35 = arith.constant 1.000000e+00 : f32
    %110 = vector.broadcast %cst_35 : f32 to vector<2x32xf32>
    %111 = arith.addf %110, %109 : vector<2x32xf32>
    %112 = arith.divf %110, %111 : vector<2x32xf32>
    %113 = vector.extract_strided_slice %93 {offsets = [0, 64], sizes = [2, 32], strides = [1, 1]} : vector<2x96xf32> to vector<2x32xf32>
    %114 = vector.extract_strided_slice %96 {offsets = [0, 64], sizes = [2, 32], strides = [1, 1]} : vector<2x96xf32> to vector<2x32xf32>
    %115 = arith.mulf %104, %114 : vector<2x32xf32>
    %116 = arith.addf %113, %115 : vector<2x32xf32>
    %117 = math.tanh %116 : vector<2x32xf32>
    %cst_36 = arith.constant 1.000000e+00 : f32
    %118 = vector.broadcast %cst_36 : f32 to vector<2x32xf32>
    %119 = arith.subf %118, %112 : vector<2x32xf32>
    %120 = arith.mulf %119, %117 : vector<2x32xf32>
    %121 = arith.mulf %112, %91 : vector<2x32xf32>
    %122 = arith.addf %120, %121 : vector<2x32xf32>
    %123 = vector.extract_strided_slice %37 {offsets = [1, 0, 0], sizes = [1, 2, 1], strides = [1, 1, 1]} : vector<13x2x1xf32> to vector<1x2x1xf32>
    %124 = vector.shape_cast %123 : vector<1x2x1xf32> to vector<2x1xf32>
    %125 = arith.subf %122, %91 : vector<2x32xf32>
    %126 = vector.broadcast %124 : vector<2x1xf32> to vector<2x32xf32>
    %127 = arith.mulf %126, %125 : vector<2x32xf32>
    %128 = arith.addf %91, %127 : vector<2x32xf32>
    %129 = vector.extract_strided_slice %43 {offsets = [2, 0, 0], sizes = [1, 2, 96], strides = [1, 1, 1]} : vector<4x2x96xf32> to vector<1x2x96xf32>
    %130 = vector.shape_cast %129 : vector<1x2x96xf32> to vector<2x96xf32>
    %131 = arith.truncf %128 : vector<2x32xf32> to vector<2x32xbf16>
    %cst_37 = arith.constant dense<0.000000e+00> : vector<2x96xf32>
    %132 = tpu.matmul %131, %1, %cst_37 {dimension_numbers = #tpu.dot_dimension_numbers<[1], [0], [0], [1], [0, 0, 1, 1], [], []>} : vector<2x32xbf16>, vector<32x96xbf16>, vector<2x96xf32> -> vector<2x96xf32>
    %133 = arith.addf %132, %16 : vector<2x96xf32>
    %134 = vector.extract_strided_slice %130 {offsets = [0, 0], sizes = [2, 32], strides = [1, 1]} : vector<2x96xf32> to vector<2x32xf32>
    %135 = vector.extract_strided_slice %133 {offsets = [0, 0], sizes = [2, 32], strides = [1, 1]} : vector<2x96xf32> to vector<2x32xf32>
    %136 = arith.addf %134, %135 : vector<2x32xf32>
    %137 = arith.negf %136 : vector<2x32xf32>
    %138 = math.exp %137 : vector<2x32xf32>
    %cst_38 = arith.constant 1.000000e+00 : f32
    %139 = vector.broadcast %cst_38 : f32 to vector<2x32xf32>
    %140 = arith.addf %139, %138 : vector<2x32xf32>
    %141 = arith.divf %139, %140 : vector<2x32xf32>
    %142 = vector.extract_strided_slice %130 {offsets = [0, 32], sizes = [2, 32], strides = [1, 1]} : vector<2x96xf32> to vector<2x32xf32>
    %143 = vector.extract_strided_slice %133 {offsets = [0, 32], sizes = [2, 32], strides = [1, 1]} : vector<2x96xf32> to vector<2x32xf32>
    %144 = arith.addf %142, %143 : vector<2x32xf32>
    %145 = arith.negf %144 : vector<2x32xf32>
    %146 = math.exp %145 : vector<2x32xf32>
    %cst_39 = arith.constant 1.000000e+00 : f32
    %147 = vector.broadcast %cst_39 : f32 to vector<2x32xf32>
    %148 = arith.addf %147, %146 : vector<2x32xf32>
    %149 = arith.divf %147, %148 : vector<2x32xf32>
    %150 = vector.extract_strided_slice %130 {offsets = [0, 64], sizes = [2, 32], strides = [1, 1]} : vector<2x96xf32> to vector<2x32xf32>
    %151 = vector.extract_strided_slice %133 {offsets = [0, 64], sizes = [2, 32], strides = [1, 1]} : vector<2x96xf32> to vector<2x32xf32>
    %152 = arith.mulf %141, %151 : vector<2x32xf32>
    %153 = arith.addf %150, %152 : vector<2x32xf32>
    %154 = math.tanh %153 : vector<2x32xf32>
    %cst_40 = arith.constant 1.000000e+00 : f32
    %155 = vector.broadcast %cst_40 : f32 to vector<2x32xf32>
    %156 = arith.subf %155, %149 : vector<2x32xf32>
    %157 = arith.mulf %156, %154 : vector<2x32xf32>
    %158 = arith.mulf %149, %128 : vector<2x32xf32>
    %159 = arith.addf %157, %158 : vector<2x32xf32>
    %160 = vector.extract_strided_slice %37 {offsets = [2, 0, 0], sizes = [1, 2, 1], strides = [1, 1, 1]} : vector<13x2x1xf32> to vector<1x2x1xf32>
    %161 = vector.shape_cast %160 : vector<1x2x1xf32> to vector<2x1xf32>
    %162 = arith.subf %159, %128 : vector<2x32xf32>
    %163 = vector.broadcast %161 : vector<2x1xf32> to vector<2x32xf32>
    %164 = arith.mulf %163, %162 : vector<2x32xf32>
    %165 = arith.addf %128, %164 : vector<2x32xf32>
    %166 = vector.extract_strided_slice %43 {offsets = [3, 0, 0], sizes = [1, 2, 96], strides = [1, 1, 1]} : vector<4x2x96xf32> to vector<1x2x96xf32>
    %167 = vector.shape_cast %166 : vector<1x2x96xf32> to vector<2x96xf32>
    %168 = arith.truncf %165 : vector<2x32xf32> to vector<2x32xbf16>
    %cst_41 = arith.constant dense<0.000000e+00> : vector<2x96xf32>
    %169 = tpu.matmul %168, %1, %cst_41 {dimension_numbers = #tpu.dot_dimension_numbers<[1], [0], [0], [1], [0, 0, 1, 1], [], []>} : vector<2x32xbf16>, vector<32x96xbf16>, vector<2x96xf32> -> vector<2x96xf32>
    %170 = arith.addf %169, %16 : vector<2x96xf32>
    %171 = vector.extract_strided_slice %167 {offsets = [0, 0], sizes = [2, 32], strides = [1, 1]} : vector<2x96xf32> to vector<2x32xf32>
    %172 = vector.extract_strided_slice %170 {offsets = [0, 0], sizes = [2, 32], strides = [1, 1]} : vector<2x96xf32> to vector<2x32xf32>
    %173 = arith.addf %171, %172 : vector<2x32xf32>
    %174 = arith.negf %173 : vector<2x32xf32>
    %175 = math.exp %174 : vector<2x32xf32>
    %cst_42 = arith.constant 1.000000e+00 : f32
    %176 = vector.broadcast %cst_42 : f32 to vector<2x32xf32>
    %177 = arith.addf %176, %175 : vector<2x32xf32>
    %178 = arith.divf %176, %177 : vector<2x32xf32>
    %179 = vector.extract_strided_slice %167 {offsets = [0, 32], sizes = [2, 32], strides = [1, 1]} : vector<2x96xf32> to vector<2x32xf32>
    %180 = vector.extract_strided_slice %170 {offsets = [0, 32], sizes = [2, 32], strides = [1, 1]} : vector<2x96xf32> to vector<2x32xf32>
    %181 = arith.addf %179, %180 : vector<2x32xf32>
    %182 = arith.negf %181 : vector<2x32xf32>
    %183 = math.exp %182 : vector<2x32xf32>
    %cst_43 = arith.constant 1.000000e+00 : f32
    %184 = vector.broadcast %cst_43 : f32 to vector<2x32xf32>
    %185 = arith.addf %184, %183 : vector<2x32xf32>
    %186 = arith.divf %184, %185 : vector<2x32xf32>
    %187 = vector.extract_strided_slice %167 {offsets = [0, 64], sizes = [2, 32], strides = [1, 1]} : vector<2x96xf32> to vector<2x32xf32>
    %188 = vector.extract_strided_slice %170 {offsets = [0, 64], sizes = [2, 32], strides = [1, 1]} : vector<2x96xf32> to vector<2x32xf32>
    %189 = arith.mulf %178, %188 : vector<2x32xf32>
    %190 = arith.addf %187, %189 : vector<2x32xf32>
    %191 = math.tanh %190 : vector<2x32xf32>
    %cst_44 = arith.constant 1.000000e+00 : f32
    %192 = vector.broadcast %cst_44 : f32 to vector<2x32xf32>
    %193 = arith.subf %192, %186 : vector<2x32xf32>
    %194 = arith.mulf %193, %191 : vector<2x32xf32>
    %195 = arith.mulf %186, %165 : vector<2x32xf32>
    %196 = arith.addf %194, %195 : vector<2x32xf32>
    %197 = vector.extract_strided_slice %37 {offsets = [3, 0, 0], sizes = [1, 2, 1], strides = [1, 1, 1]} : vector<13x2x1xf32> to vector<1x2x1xf32>
    %198 = vector.shape_cast %197 : vector<1x2x1xf32> to vector<2x1xf32>
    %199 = arith.subf %196, %165 : vector<2x32xf32>
    %200 = vector.broadcast %198 : vector<2x1xf32> to vector<2x32xf32>
    %201 = arith.mulf %200, %199 : vector<2x32xf32>
    %202 = arith.addf %165, %201 : vector<2x32xf32>
    %203 = vector.broadcast %26 : vector<1x32xf32> to vector<2x32xf32>
    %204 = arith.mulf %202, %203 : vector<2x32xf32>
    %cst_45 = arith.constant dense<0.000000e+00> : vector<2xf32>
    %205 = vector.multi_reduction <add>, %204, %cst_45 [1] : vector<2x32xf32> to vector<2xf32>
    %206 = vector.shape_cast %205 : vector<2xf32> to vector<2x1xf32>
    %207 = arith.addf %206, %39 : vector<2x1xf32>
    %208 = arith.negf %207 : vector<2x1xf32>
    %209 = math.exp %208 : vector<2x1xf32>
    %cst_46 = arith.constant 1.000000e+00 : f32
    %210 = vector.broadcast %cst_46 : f32 to vector<2x1xf32>
    %211 = arith.addf %210, %209 : vector<2x1xf32>
    %212 = arith.divf %210, %211 : vector<2x1xf32>
    %c0_47 = arith.constant 0 : index
    %c0_48 = arith.constant 0 : index
    %213 = vector.load %arg5[%c0_47, %c0_48] : memref<2x1xf32, #tpu.memory_space<vmem>>, vector<2x1xf32>
    tpu.vector_store %arg5[%c0_47, %c0_48], %212 {strides = array<i32>} : memref<2x1xf32, #tpu.memory_space<vmem>>, vector<2x1xf32>,
    %cst_49 = arith.constant 0.000000e+00 : f32
    %214 = vector.broadcast %cst_49 : f32 to vector<2x32xf32>
    %215 = vector.extract_strided_slice %47 {offsets = [0, 0, 0], sizes = [1, 2, 96], strides = [1, 1, 1]} : vector<8x2x96xf32> to vector<1x2x96xf32>
    %216 = vector.shape_cast %215 : vector<1x2x96xf32> to vector<2x96xf32>
    %217 = arith.truncf %214 : vector<2x32xf32> to vector<2x32xbf16>
    %cst_50 = arith.constant dense<0.000000e+00> : vector<2x96xf32>
    %218 = tpu.matmul %217, %3, %cst_50 {dimension_numbers = #tpu.dot_dimension_numbers<[1], [0], [0], [1], [0, 0, 1, 1], [], []>} : vector<2x32xbf16>, vector<32x96xbf16>, vector<2x96xf32> -> vector<2x96xf32>
    %219 = arith.addf %218, %19 : vector<2x96xf32>
    %220 = vector.extract_strided_slice %216 {offsets = [0, 0], sizes = [2, 32], strides = [1, 1]} : vector<2x96xf32> to vector<2x32xf32>
    %221 = vector.extract_strided_slice %219 {offsets = [0, 0], sizes = [2, 32], strides = [1, 1]} : vector<2x96xf32> to vector<2x32xf32>
    %222 = arith.addf %220, %221 : vector<2x32xf32>
    %223 = arith.negf %222 : vector<2x32xf32>
    %224 = math.exp %223 : vector<2x32xf32>
    %cst_51 = arith.constant 1.000000e+00 : f32
    %225 = vector.broadcast %cst_51 : f32 to vector<2x32xf32>
    %226 = arith.addf %225, %224 : vector<2x32xf32>
    %227 = arith.divf %225, %226 : vector<2x32xf32>
    %228 = vector.extract_strided_slice %216 {offsets = [0, 32], sizes = [2, 32], strides = [1, 1]} : vector<2x96xf32> to vector<2x32xf32>
    %229 = vector.extract_strided_slice %219 {offsets = [0, 32], sizes = [2, 32], strides = [1, 1]} : vector<2x96xf32> to vector<2x32xf32>
    %230 = arith.addf %228, %229 : vector<2x32xf32>
    %231 = arith.negf %230 : vector<2x32xf32>
    %232 = math.exp %231 : vector<2x32xf32>
    %cst_52 = arith.constant 1.000000e+00 : f32
    %233 = vector.broadcast %cst_52 : f32 to vector<2x32xf32>
    %234 = arith.addf %233, %232 : vector<2x32xf32>
    %235 = arith.divf %233, %234 : vector<2x32xf32>
    %236 = vector.extract_strided_slice %216 {offsets = [0, 64], sizes = [2, 32], strides = [1, 1]} : vector<2x96xf32> to vector<2x32xf32>
    %237 = vector.extract_strided_slice %219 {offsets = [0, 64], sizes = [2, 32], strides = [1, 1]} : vector<2x96xf32> to vector<2x32xf32>
    %238 = arith.mulf %227, %237 : vector<2x32xf32>
    %239 = arith.addf %236, %238 : vector<2x32xf32>
    %240 = math.tanh %239 : vector<2x32xf32>
    %cst_53 = arith.constant 1.000000e+00 : f32
    %241 = vector.broadcast %cst_53 : f32 to vector<2x32xf32>
    %242 = arith.subf %241, %235 : vector<2x32xf32>
    %243 = arith.mulf %242, %240 : vector<2x32xf32>
    %244 = arith.mulf %235, %214 : vector<2x32xf32>
    %245 = arith.addf %243, %244 : vector<2x32xf32>
    %246 = vector.extract_strided_slice %37 {offsets = [4, 0, 0], sizes = [1, 2, 1], strides = [1, 1, 1]} : vector<13x2x1xf32> to vector<1x2x1xf32>
    %247 = vector.shape_cast %246 : vector<1x2x1xf32> to vector<2x1xf32>
    %248 = arith.subf %245, %214 : vector<2x32xf32>
    %249 = vector.broadcast %247 : vector<2x1xf32> to vector<2x32xf32>
    %250 = arith.mulf %249, %248 : vector<2x32xf32>
    %251 = arith.addf %214, %250 : vector<2x32xf32>
    %252 = vector.extract_strided_slice %47 {offsets = [1, 0, 0], sizes = [1, 2, 96], strides = [1, 1, 1]} : vector<8x2x96xf32> to vector<1x2x96xf32>
    %253 = vector.shape_cast %252 : vector<1x2x96xf32> to vector<2x96xf32>
    %254 = arith.truncf %251 : vector<2x32xf32> to vector<2x32xbf16>
    %cst_54 = arith.constant dense<0.000000e+00> : vector<2x96xf32>
    %255 = tpu.matmul %254, %3, %cst_54 {dimension_numbers = #tpu.dot_dimension_numbers<[1], [0], [0], [1], [0, 0, 1, 1], [], []>} : vector<2x32xbf16>, vector<32x96xbf16>, vector<2x96xf32> -> vector<2x96xf32>
    %256 = arith.addf %255, %19 : vector<2x96xf32>
    %257 = vector.extract_strided_slice %253 {offsets = [0, 0], sizes = [2, 32], strides = [1, 1]} : vector<2x96xf32> to vector<2x32xf32>
    %258 = vector.extract_strided_slice %256 {offsets = [0, 0], sizes = [2, 32], strides = [1, 1]} : vector<2x96xf32> to vector<2x32xf32>
    %259 = arith.addf %257, %258 : vector<2x32xf32>
    %260 = arith.negf %259 : vector<2x32xf32>
    %261 = math.exp %260 : vector<2x32xf32>
    %cst_55 = arith.constant 1.000000e+00 : f32
    %262 = vector.broadcast %cst_55 : f32 to vector<2x32xf32>
    %263 = arith.addf %262, %261 : vector<2x32xf32>
    %264 = arith.divf %262, %263 : vector<2x32xf32>
    %265 = vector.extract_strided_slice %253 {offsets = [0, 32], sizes = [2, 32], strides = [1, 1]} : vector<2x96xf32> to vector<2x32xf32>
    %266 = vector.extract_strided_slice %256 {offsets = [0, 32], sizes = [2, 32], strides = [1, 1]} : vector<2x96xf32> to vector<2x32xf32>
    %267 = arith.addf %265, %266 : vector<2x32xf32>
    %268 = arith.negf %267 : vector<2x32xf32>
    %269 = math.exp %268 : vector<2x32xf32>
    %cst_56 = arith.constant 1.000000e+00 : f32
    %270 = vector.broadcast %cst_56 : f32 to vector<2x32xf32>
    %271 = arith.addf %270, %269 : vector<2x32xf32>
    %272 = arith.divf %270, %271 : vector<2x32xf32>
    %273 = vector.extract_strided_slice %253 {offsets = [0, 64], sizes = [2, 32], strides = [1, 1]} : vector<2x96xf32> to vector<2x32xf32>
    %274 = vector.extract_strided_slice %256 {offsets = [0, 64], sizes = [2, 32], strides = [1, 1]} : vector<2x96xf32> to vector<2x32xf32>
    %275 = arith.mulf %264, %274 : vector<2x32xf32>
    %276 = arith.addf %273, %275 : vector<2x32xf32>
    %277 = math.tanh %276 : vector<2x32xf32>
    %cst_57 = arith.constant 1.000000e+00 : f32
    %278 = vector.broadcast %cst_57 : f32 to vector<2x32xf32>
    %279 = arith.subf %278, %272 : vector<2x32xf32>
    %280 = arith.mulf %279, %277 : vector<2x32xf32>
    %281 = arith.mulf %272, %251 : vector<2x32xf32>
    %282 = arith.addf %280, %281 : vector<2x32xf32>
    %283 = vector.extract_strided_slice %37 {offsets = [5, 0, 0], sizes = [1, 2, 1], strides = [1, 1, 1]} : vector<13x2x1xf32> to vector<1x2x1xf32>
    %284 = vector.shape_cast %283 : vector<1x2x1xf32> to vector<2x1xf32>
    %285 = arith.subf %282, %251 : vector<2x32xf32>
    %286 = vector.broadcast %284 : vector<2x1xf32> to vector<2x32xf32>
    %287 = arith.mulf %286, %285 : vector<2x32xf32>
    %288 = arith.addf %251, %287 : vector<2x32xf32>
    %289 = vector.extract_strided_slice %47 {offsets = [2, 0, 0], sizes = [1, 2, 96], strides = [1, 1, 1]} : vector<8x2x96xf32> to vector<1x2x96xf32>
    %290 = vector.shape_cast %289 : vector<1x2x96xf32> to vector<2x96xf32>
    %291 = arith.truncf %288 : vector<2x32xf32> to vector<2x32xbf16>
    %cst_58 = arith.constant dense<0.000000e+00> : vector<2x96xf32>
    %292 = tpu.matmul %291, %3, %cst_58 {dimension_numbers = #tpu.dot_dimension_numbers<[1], [0], [0], [1], [0, 0, 1, 1], [], []>} : vector<2x32xbf16>, vector<32x96xbf16>, vector<2x96xf32> -> vector<2x96xf32>
    %293 = arith.addf %292, %19 : vector<2x96xf32>
    %294 = vector.extract_strided_slice %290 {offsets = [0, 0], sizes = [2, 32], strides = [1, 1]} : vector<2x96xf32> to vector<2x32xf32>
    %295 = vector.extract_strided_slice %293 {offsets = [0, 0], sizes = [2, 32], strides = [1, 1]} : vector<2x96xf32> to vector<2x32xf32>
    %296 = arith.addf %294, %295 : vector<2x32xf32>
    %297 = arith.negf %296 : vector<2x32xf32>
    %298 = math.exp %297 : vector<2x32xf32>
    %cst_59 = arith.constant 1.000000e+00 : f32
    %299 = vector.broadcast %cst_59 : f32 to vector<2x32xf32>
    %300 = arith.addf %299, %298 : vector<2x32xf32>
    %301 = arith.divf %299, %300 : vector<2x32xf32>
    %302 = vector.extract_strided_slice %290 {offsets = [0, 32], sizes = [2, 32], strides = [1, 1]} : vector<2x96xf32> to vector<2x32xf32>
    %303 = vector.extract_strided_slice %293 {offsets = [0, 32], sizes = [2, 32], strides = [1, 1]} : vector<2x96xf32> to vector<2x32xf32>
    %304 = arith.addf %302, %303 : vector<2x32xf32>
    %305 = arith.negf %304 : vector<2x32xf32>
    %306 = math.exp %305 : vector<2x32xf32>
    %cst_60 = arith.constant 1.000000e+00 : f32
    %307 = vector.broadcast %cst_60 : f32 to vector<2x32xf32>
    %308 = arith.addf %307, %306 : vector<2x32xf32>
    %309 = arith.divf %307, %308 : vector<2x32xf32>
    %310 = vector.extract_strided_slice %290 {offsets = [0, 64], sizes = [2, 32], strides = [1, 1]} : vector<2x96xf32> to vector<2x32xf32>
    %311 = vector.extract_strided_slice %293 {offsets = [0, 64], sizes = [2, 32], strides = [1, 1]} : vector<2x96xf32> to vector<2x32xf32>
    %312 = arith.mulf %301, %311 : vector<2x32xf32>
    %313 = arith.addf %310, %312 : vector<2x32xf32>
    %314 = math.tanh %313 : vector<2x32xf32>
    %cst_61 = arith.constant 1.000000e+00 : f32
    %315 = vector.broadcast %cst_61 : f32 to vector<2x32xf32>
    %316 = arith.subf %315, %309 : vector<2x32xf32>
    %317 = arith.mulf %316, %314 : vector<2x32xf32>
    %318 = arith.mulf %309, %288 : vector<2x32xf32>
    %319 = arith.addf %317, %318 : vector<2x32xf32>
    %320 = vector.extract_strided_slice %37 {offsets = [6, 0, 0], sizes = [1, 2, 1], strides = [1, 1, 1]} : vector<13x2x1xf32> to vector<1x2x1xf32>
    %321 = vector.shape_cast %320 : vector<1x2x1xf32> to vector<2x1xf32>
    %322 = arith.subf %319, %288 : vector<2x32xf32>
    %323 = vector.broadcast %321 : vector<2x1xf32> to vector<2x32xf32>
    %324 = arith.mulf %323, %322 : vector<2x32xf32>
    %325 = arith.addf %288, %324 : vector<2x32xf32>
    %326 = vector.extract_strided_slice %47 {offsets = [3, 0, 0], sizes = [1, 2, 96], strides = [1, 1, 1]} : vector<8x2x96xf32> to vector<1x2x96xf32>
    %327 = vector.shape_cast %326 : vector<1x2x96xf32> to vector<2x96xf32>
    %328 = arith.truncf %325 : vector<2x32xf32> to vector<2x32xbf16>
    %cst_62 = arith.constant dense<0.000000e+00> : vector<2x96xf32>
    %329 = tpu.matmul %328, %3, %cst_62 {dimension_numbers = #tpu.dot_dimension_numbers<[1], [0], [0], [1], [0, 0, 1, 1], [], []>} : vector<2x32xbf16>, vector<32x96xbf16>, vector<2x96xf32> -> vector<2x96xf32>
    %330 = arith.addf %329, %19 : vector<2x96xf32>
    %331 = vector.extract_strided_slice %327 {offsets = [0, 0], sizes = [2, 32], strides = [1, 1]} : vector<2x96xf32> to vector<2x32xf32>
    %332 = vector.extract_strided_slice %330 {offsets = [0, 0], sizes = [2, 32], strides = [1, 1]} : vector<2x96xf32> to vector<2x32xf32>
    %333 = arith.addf %331, %332 : vector<2x32xf32>
    %334 = arith.negf %333 : vector<2x32xf32>
    %335 = math.exp %334 : vector<2x32xf32>
    %cst_63 = arith.constant 1.000000e+00 : f32
    %336 = vector.broadcast %cst_63 : f32 to vector<2x32xf32>
    %337 = arith.addf %336, %335 : vector<2x32xf32>
    %338 = arith.divf %336, %337 : vector<2x32xf32>
    %339 = vector.extract_strided_slice %327 {offsets = [0, 32], sizes = [2, 32], strides = [1, 1]} : vector<2x96xf32> to vector<2x32xf32>
    %340 = vector.extract_strided_slice %330 {offsets = [0, 32], sizes = [2, 32], strides = [1, 1]} : vector<2x96xf32> to vector<2x32xf32>
    %341 = arith.addf %339, %340 : vector<2x32xf32>
    %342 = arith.negf %341 : vector<2x32xf32>
    %343 = math.exp %342 : vector<2x32xf32>
    %cst_64 = arith.constant 1.000000e+00 : f32
    %344 = vector.broadcast %cst_64 : f32 to vector<2x32xf32>
    %345 = arith.addf %344, %343 : vector<2x32xf32>
    %346 = arith.divf %344, %345 : vector<2x32xf32>
    %347 = vector.extract_strided_slice %327 {offsets = [0, 64], sizes = [2, 32], strides = [1, 1]} : vector<2x96xf32> to vector<2x32xf32>
    %348 = vector.extract_strided_slice %330 {offsets = [0, 64], sizes = [2, 32], strides = [1, 1]} : vector<2x96xf32> to vector<2x32xf32>
    %349 = arith.mulf %338, %348 : vector<2x32xf32>
    %350 = arith.addf %347, %349 : vector<2x32xf32>
    %351 = math.tanh %350 : vector<2x32xf32>
    %cst_65 = arith.constant 1.000000e+00 : f32
    %352 = vector.broadcast %cst_65 : f32 to vector<2x32xf32>
    %353 = arith.subf %352, %346 : vector<2x32xf32>
    %354 = arith.mulf %353, %351 : vector<2x32xf32>
    %355 = arith.mulf %346, %325 : vector<2x32xf32>
    %356 = arith.addf %354, %355 : vector<2x32xf32>
    %357 = vector.extract_strided_slice %37 {offsets = [7, 0, 0], sizes = [1, 2, 1], strides = [1, 1, 1]} : vector<13x2x1xf32> to vector<1x2x1xf32>
    %358 = vector.shape_cast %357 : vector<1x2x1xf32> to vector<2x1xf32>
    %359 = arith.subf %356, %325 : vector<2x32xf32>
    %360 = vector.broadcast %358 : vector<2x1xf32> to vector<2x32xf32>
    %361 = arith.mulf %360, %359 : vector<2x32xf32>
    %362 = arith.addf %325, %361 : vector<2x32xf32>
    %363 = vector.extract_strided_slice %47 {offsets = [4, 0, 0], sizes = [1, 2, 96], strides = [1, 1, 1]} : vector<8x2x96xf32> to vector<1x2x96xf32>
    %364 = vector.shape_cast %363 : vector<1x2x96xf32> to vector<2x96xf32>
    %365 = arith.truncf %362 : vector<2x32xf32> to vector<2x32xbf16>
    %cst_66 = arith.constant dense<0.000000e+00> : vector<2x96xf32>
    %366 = tpu.matmul %365, %3, %cst_66 {dimension_numbers = #tpu.dot_dimension_numbers<[1], [0], [0], [1], [0, 0, 1, 1], [], []>} : vector<2x32xbf16>, vector<32x96xbf16>, vector<2x96xf32> -> vector<2x96xf32>
    %367 = arith.addf %366, %19 : vector<2x96xf32>
    %368 = vector.extract_strided_slice %364 {offsets = [0, 0], sizes = [2, 32], strides = [1, 1]} : vector<2x96xf32> to vector<2x32xf32>
    %369 = vector.extract_strided_slice %367 {offsets = [0, 0], sizes = [2, 32], strides = [1, 1]} : vector<2x96xf32> to vector<2x32xf32>
    %370 = arith.addf %368, %369 : vector<2x32xf32>
    %371 = arith.negf %370 : vector<2x32xf32>
    %372 = math.exp %371 : vector<2x32xf32>
    %cst_67 = arith.constant 1.000000e+00 : f32
    %373 = vector.broadcast %cst_67 : f32 to vector<2x32xf32>
    %374 = arith.addf %373, %372 : vector<2x32xf32>
    %375 = arith.divf %373, %374 : vector<2x32xf32>
    %376 = vector.extract_strided_slice %364 {offsets = [0, 32], sizes = [2, 32], strides = [1, 1]} : vector<2x96xf32> to vector<2x32xf32>
    %377 = vector.extract_strided_slice %367 {offsets = [0, 32], sizes = [2, 32], strides = [1, 1]} : vector<2x96xf32> to vector<2x32xf32>
    %378 = arith.addf %376, %377 : vector<2x32xf32>
    %379 = arith.negf %378 : vector<2x32xf32>
    %380 = math.exp %379 : vector<2x32xf32>
    %cst_68 = arith.constant 1.000000e+00 : f32
    %381 = vector.broadcast %cst_68 : f32 to vector<2x32xf32>
    %382 = arith.addf %381, %380 : vector<2x32xf32>
    %383 = arith.divf %381, %382 : vector<2x32xf32>
    %384 = vector.extract_strided_slice %364 {offsets = [0, 64], sizes = [2, 32], strides = [1, 1]} : vector<2x96xf32> to vector<2x32xf32>
    %385 = vector.extract_strided_slice %367 {offsets = [0, 64], sizes = [2, 32], strides = [1, 1]} : vector<2x96xf32> to vector<2x32xf32>
    %386 = arith.mulf %375, %385 : vector<2x32xf32>
    %387 = arith.addf %384, %386 : vector<2x32xf32>
    %388 = math.tanh %387 : vector<2x32xf32>
    %cst_69 = arith.constant 1.000000e+00 : f32
    %389 = vector.broadcast %cst_69 : f32 to vector<2x32xf32>
    %390 = arith.subf %389, %383 : vector<2x32xf32>
    %391 = arith.mulf %390, %388 : vector<2x32xf32>
    %392 = arith.mulf %383, %362 : vector<2x32xf32>
    %393 = arith.addf %391, %392 : vector<2x32xf32>
    %394 = vector.extract_strided_slice %37 {offsets = [8, 0, 0], sizes = [1, 2, 1], strides = [1, 1, 1]} : vector<13x2x1xf32> to vector<1x2x1xf32>
    %395 = vector.shape_cast %394 : vector<1x2x1xf32> to vector<2x1xf32>
    %396 = arith.subf %393, %362 : vector<2x32xf32>
    %397 = vector.broadcast %395 : vector<2x1xf32> to vector<2x32xf32>
    %398 = arith.mulf %397, %396 : vector<2x32xf32>
    %399 = arith.addf %362, %398 : vector<2x32xf32>
    %400 = vector.extract_strided_slice %47 {offsets = [5, 0, 0], sizes = [1, 2, 96], strides = [1, 1, 1]} : vector<8x2x96xf32> to vector<1x2x96xf32>
    %401 = vector.shape_cast %400 : vector<1x2x96xf32> to vector<2x96xf32>
    %402 = arith.truncf %399 : vector<2x32xf32> to vector<2x32xbf16>
    %cst_70 = arith.constant dense<0.000000e+00> : vector<2x96xf32>
    %403 = tpu.matmul %402, %3, %cst_70 {dimension_numbers = #tpu.dot_dimension_numbers<[1], [0], [0], [1], [0, 0, 1, 1], [], []>} : vector<2x32xbf16>, vector<32x96xbf16>, vector<2x96xf32> -> vector<2x96xf32>
    %404 = arith.addf %403, %19 : vector<2x96xf32>
    %405 = vector.extract_strided_slice %401 {offsets = [0, 0], sizes = [2, 32], strides = [1, 1]} : vector<2x96xf32> to vector<2x32xf32>
    %406 = vector.extract_strided_slice %404 {offsets = [0, 0], sizes = [2, 32], strides = [1, 1]} : vector<2x96xf32> to vector<2x32xf32>
    %407 = arith.addf %405, %406 : vector<2x32xf32>
    %408 = arith.negf %407 : vector<2x32xf32>
    %409 = math.exp %408 : vector<2x32xf32>
    %cst_71 = arith.constant 1.000000e+00 : f32
    %410 = vector.broadcast %cst_71 : f32 to vector<2x32xf32>
    %411 = arith.addf %410, %409 : vector<2x32xf32>
    %412 = arith.divf %410, %411 : vector<2x32xf32>
    %413 = vector.extract_strided_slice %401 {offsets = [0, 32], sizes = [2, 32], strides = [1, 1]} : vector<2x96xf32> to vector<2x32xf32>
    %414 = vector.extract_strided_slice %404 {offsets = [0, 32], sizes = [2, 32], strides = [1, 1]} : vector<2x96xf32> to vector<2x32xf32>
    %415 = arith.addf %413, %414 : vector<2x32xf32>
    %416 = arith.negf %415 : vector<2x32xf32>
    %417 = math.exp %416 : vector<2x32xf32>
    %cst_72 = arith.constant 1.000000e+00 : f32
    %418 = vector.broadcast %cst_72 : f32 to vector<2x32xf32>
    %419 = arith.addf %418, %417 : vector<2x32xf32>
    %420 = arith.divf %418, %419 : vector<2x32xf32>
    %421 = vector.extract_strided_slice %401 {offsets = [0, 64], sizes = [2, 32], strides = [1, 1]} : vector<2x96xf32> to vector<2x32xf32>
    %422 = vector.extract_strided_slice %404 {offsets = [0, 64], sizes = [2, 32], strides = [1, 1]} : vector<2x96xf32> to vector<2x32xf32>
    %423 = arith.mulf %412, %422 : vector<2x32xf32>
    %424 = arith.addf %421, %423 : vector<2x32xf32>
    %425 = math.tanh %424 : vector<2x32xf32>
    %cst_73 = arith.constant 1.000000e+00 : f32
    %426 = vector.broadcast %cst_73 : f32 to vector<2x32xf32>
    %427 = arith.subf %426, %420 : vector<2x32xf32>
    %428 = arith.mulf %427, %425 : vector<2x32xf32>
    %429 = arith.mulf %420, %399 : vector<2x32xf32>
    %430 = arith.addf %428, %429 : vector<2x32xf32>
    %431 = vector.extract_strided_slice %37 {offsets = [9, 0, 0], sizes = [1, 2, 1], strides = [1, 1, 1]} : vector<13x2x1xf32> to vector<1x2x1xf32>
    %432 = vector.shape_cast %431 : vector<1x2x1xf32> to vector<2x1xf32>
    %433 = arith.subf %430, %399 : vector<2x32xf32>
    %434 = vector.broadcast %432 : vector<2x1xf32> to vector<2x32xf32>
    %435 = arith.mulf %434, %433 : vector<2x32xf32>
    %436 = arith.addf %399, %435 : vector<2x32xf32>
    %437 = vector.extract_strided_slice %47 {offsets = [6, 0, 0], sizes = [1, 2, 96], strides = [1, 1, 1]} : vector<8x2x96xf32> to vector<1x2x96xf32>
    %438 = vector.shape_cast %437 : vector<1x2x96xf32> to vector<2x96xf32>
    %439 = arith.truncf %436 : vector<2x32xf32> to vector<2x32xbf16>
    %cst_74 = arith.constant dense<0.000000e+00> : vector<2x96xf32>
    %440 = tpu.matmul %439, %3, %cst_74 {dimension_numbers = #tpu.dot_dimension_numbers<[1], [0], [0], [1], [0, 0, 1, 1], [], []>} : vector<2x32xbf16>, vector<32x96xbf16>, vector<2x96xf32> -> vector<2x96xf32>
    %441 = arith.addf %440, %19 : vector<2x96xf32>
    %442 = vector.extract_strided_slice %438 {offsets = [0, 0], sizes = [2, 32], strides = [1, 1]} : vector<2x96xf32> to vector<2x32xf32>
    %443 = vector.extract_strided_slice %441 {offsets = [0, 0], sizes = [2, 32], strides = [1, 1]} : vector<2x96xf32> to vector<2x32xf32>
    %444 = arith.addf %442, %443 : vector<2x32xf32>
    %445 = arith.negf %444 : vector<2x32xf32>
    %446 = math.exp %445 : vector<2x32xf32>
    %cst_75 = arith.constant 1.000000e+00 : f32
    %447 = vector.broadcast %cst_75 : f32 to vector<2x32xf32>
    %448 = arith.addf %447, %446 : vector<2x32xf32>
    %449 = arith.divf %447, %448 : vector<2x32xf32>
    %450 = vector.extract_strided_slice %438 {offsets = [0, 32], sizes = [2, 32], strides = [1, 1]} : vector<2x96xf32> to vector<2x32xf32>
    %451 = vector.extract_strided_slice %441 {offsets = [0, 32], sizes = [2, 32], strides = [1, 1]} : vector<2x96xf32> to vector<2x32xf32>
    %452 = arith.addf %450, %451 : vector<2x32xf32>
    %453 = arith.negf %452 : vector<2x32xf32>
    %454 = math.exp %453 : vector<2x32xf32>
    %cst_76 = arith.constant 1.000000e+00 : f32
    %455 = vector.broadcast %cst_76 : f32 to vector<2x32xf32>
    %456 = arith.addf %455, %454 : vector<2x32xf32>
    %457 = arith.divf %455, %456 : vector<2x32xf32>
    %458 = vector.extract_strided_slice %438 {offsets = [0, 64], sizes = [2, 32], strides = [1, 1]} : vector<2x96xf32> to vector<2x32xf32>
    %459 = vector.extract_strided_slice %441 {offsets = [0, 64], sizes = [2, 32], strides = [1, 1]} : vector<2x96xf32> to vector<2x32xf32>
    %460 = arith.mulf %449, %459 : vector<2x32xf32>
    %461 = arith.addf %458, %460 : vector<2x32xf32>
    %462 = math.tanh %461 : vector<2x32xf32>
    %cst_77 = arith.constant 1.000000e+00 : f32
    %463 = vector.broadcast %cst_77 : f32 to vector<2x32xf32>
    %464 = arith.subf %463, %457 : vector<2x32xf32>
    %465 = arith.mulf %464, %462 : vector<2x32xf32>
    %466 = arith.mulf %457, %436 : vector<2x32xf32>
    %467 = arith.addf %465, %466 : vector<2x32xf32>
    %468 = vector.extract_strided_slice %37 {offsets = [10, 0, 0], sizes = [1, 2, 1], strides = [1, 1, 1]} : vector<13x2x1xf32> to vector<1x2x1xf32>
    %469 = vector.shape_cast %468 : vector<1x2x1xf32> to vector<2x1xf32>
    %470 = arith.subf %467, %436 : vector<2x32xf32>
    %471 = vector.broadcast %469 : vector<2x1xf32> to vector<2x32xf32>
    %472 = arith.mulf %471, %470 : vector<2x32xf32>
    %473 = arith.addf %436, %472 : vector<2x32xf32>
    %474 = vector.extract_strided_slice %47 {offsets = [7, 0, 0], sizes = [1, 2, 96], strides = [1, 1, 1]} : vector<8x2x96xf32> to vector<1x2x96xf32>
    %475 = vector.shape_cast %474 : vector<1x2x96xf32> to vector<2x96xf32>
    %476 = arith.truncf %473 : vector<2x32xf32> to vector<2x32xbf16>
    %cst_78 = arith.constant dense<0.000000e+00> : vector<2x96xf32>
    %477 = tpu.matmul %476, %3, %cst_78 {dimension_numbers = #tpu.dot_dimension_numbers<[1], [0], [0], [1], [0, 0, 1, 1], [], []>} : vector<2x32xbf16>, vector<32x96xbf16>, vector<2x96xf32> -> vector<2x96xf32>
    %478 = arith.addf %477, %19 : vector<2x96xf32>
    %479 = vector.extract_strided_slice %475 {offsets = [0, 0], sizes = [2, 32], strides = [1, 1]} : vector<2x96xf32> to vector<2x32xf32>
    %480 = vector.extract_strided_slice %478 {offsets = [0, 0], sizes = [2, 32], strides = [1, 1]} : vector<2x96xf32> to vector<2x32xf32>
    %481 = arith.addf %479, %480 : vector<2x32xf32>
    %482 = arith.negf %481 : vector<2x32xf32>
    %483 = math.exp %482 : vector<2x32xf32>
    %cst_79 = arith.constant 1.000000e+00 : f32
    %484 = vector.broadcast %cst_79 : f32 to vector<2x32xf32>
    %485 = arith.addf %484, %483 : vector<2x32xf32>
    %486 = arith.divf %484, %485 : vector<2x32xf32>
    %487 = vector.extract_strided_slice %475 {offsets = [0, 32], sizes = [2, 32], strides = [1, 1]} : vector<2x96xf32> to vector<2x32xf32>
    %488 = vector.extract_strided_slice %478 {offsets = [0, 32], sizes = [2, 32], strides = [1, 1]} : vector<2x96xf32> to vector<2x32xf32>
    %489 = arith.addf %487, %488 : vector<2x32xf32>
    %490 = arith.negf %489 : vector<2x32xf32>
    %491 = math.exp %490 : vector<2x32xf32>
    %cst_80 = arith.constant 1.000000e+00 : f32
    %492 = vector.broadcast %cst_80 : f32 to vector<2x32xf32>
    %493 = arith.addf %492, %491 : vector<2x32xf32>
    %494 = arith.divf %492, %493 : vector<2x32xf32>
    %495 = vector.extract_strided_slice %475 {offsets = [0, 64], sizes = [2, 32], strides = [1, 1]} : vector<2x96xf32> to vector<2x32xf32>
    %496 = vector.extract_strided_slice %478 {offsets = [0, 64], sizes = [2, 32], strides = [1, 1]} : vector<2x96xf32> to vector<2x32xf32>
    %497 = arith.mulf %486, %496 : vector<2x32xf32>
    %498 = arith.addf %495, %497 : vector<2x32xf32>
    %499 = math.tanh %498 : vector<2x32xf32>
    %cst_81 = arith.constant 1.000000e+00 : f32
    %500 = vector.broadcast %cst_81 : f32 to vector<2x32xf32>
    %501 = arith.subf %500, %494 : vector<2x32xf32>
    %502 = arith.mulf %501, %499 : vector<2x32xf32>
    %503 = arith.mulf %494, %473 : vector<2x32xf32>
    %504 = arith.addf %502, %503 : vector<2x32xf32>
    %505 = vector.extract_strided_slice %37 {offsets = [11, 0, 0], sizes = [1, 2, 1], strides = [1, 1, 1]} : vector<13x2x1xf32> to vector<1x2x1xf32>
    %506 = vector.shape_cast %505 : vector<1x2x1xf32> to vector<2x1xf32>
    %507 = arith.subf %504, %473 : vector<2x32xf32>
    %508 = vector.broadcast %506 : vector<2x1xf32> to vector<2x32xf32>
    %509 = arith.mulf %508, %507 : vector<2x32xf32>
    %510 = arith.addf %473, %509 : vector<2x32xf32>
    %511 = vector.shape_cast %251 : vector<2x32xf32> to vector<2x1x32xf32>
    %512 = vector.shape_cast %288 : vector<2x32xf32> to vector<2x1x32xf32>
    %513 = vector.shape_cast %325 : vector<2x32xf32> to vector<2x1x32xf32>
    %514 = vector.shape_cast %362 : vector<2x32xf32> to vector<2x1x32xf32>
    %515 = vector.shape_cast %399 : vector<2x32xf32> to vector<2x1x32xf32>
    %516 = vector.shape_cast %436 : vector<2x32xf32> to vector<2x1x32xf32>
    %517 = vector.shape_cast %473 : vector<2x32xf32> to vector<2x1x32xf32>
    %518 = vector.shape_cast %510 : vector<2x32xf32> to vector<2x1x32xf32>
    %519 = tpu.concatenate %511, %512, %513, %514, %515, %516, %517, %518 in 1 : vector<2x1x32xf32>, vector<2x1x32xf32>, vector<2x1x32xf32>, vector<2x1x32xf32>, vector<2x1x32xf32>, vector<2x1x32xf32>, vector<2x1x32xf32>, vector<2x1x32xf32> -> vector<2x8x32xf32>
    %520 = arith.truncf %519 : vector<2x8x32xf32> to vector<2x8x32xbf16>
    %521 = vector.shape_cast %7 : vector<32x32xbf16> to vector<1x32x32xbf16>
    %522 = vector.broadcast %521 : vector<1x32x32xbf16> to vector<2x32x32xbf16>
    "tpu.trace_start"() <{level = 10 : i32, message = "bsh,bhk->bsk"}> : () -> ()
    %cst_82 = arith.constant dense<0.000000e+00> : vector<2x8x32xf32>
    %523 = tpu.matmul %520, %522, %cst_82 {dimension_numbers = #tpu.dot_dimension_numbers<[2], [1], [1], [2], [0, 0, 0, 1, 1, 2], [0], [0]>} : vector<2x8x32xbf16>, vector<2x32x32xbf16>, vector<2x8x32xf32> -> vector<2x8x32xf32>
    "tpu.trace_stop"() : () -> ()
    %524 = arith.truncf %523 : vector<2x8x32xf32> to vector<2x8x32xbf16>
    %525 = vector.shape_cast %8 : vector<32x32xbf16> to vector<1x32x32xbf16>
    %526 = vector.broadcast %525 : vector<1x32x32xbf16> to vector<2x32x32xbf16>
    "tpu.trace_start"() <{level = 10 : i32, message = "bsh,bhk->bsk"}> : () -> ()
    %cst_83 = arith.constant dense<0.000000e+00> : vector<2x8x32xf32>
    %527 = tpu.matmul %520, %526, %cst_83 {dimension_numbers = #tpu.dot_dimension_numbers<[2], [1], [1], [2], [0, 0, 0, 1, 1, 2], [0], [0]>} : vector<2x8x32xbf16>, vector<2x32x32xbf16>, vector<2x8x32xf32> -> vector<2x8x32xf32>
    "tpu.trace_stop"() : () -> ()
    %528 = arith.truncf %527 : vector<2x8x32xf32> to vector<2x8x32xbf16>
    %529 = arith.addf %510, %202 : vector<2x32xf32>
    %530 = vector.extract_strided_slice %51 {offsets = [0, 0, 0], sizes = [1, 2, 96], strides = [1, 1, 1]} : vector<8x2x96xf32> to vector<1x2x96xf32>
    %531 = vector.shape_cast %530 : vector<1x2x96xf32> to vector<2x96xf32>
    %532 = arith.truncf %529 : vector<2x32xf32> to vector<2x32xbf16>
    %cst_84 = arith.constant dense<0.000000e+00> : vector<2x96xf32>
    %533 = tpu.matmul %532, %5, %cst_84 {dimension_numbers = #tpu.dot_dimension_numbers<[1], [0], [0], [1], [0, 0, 1, 1], [], []>} : vector<2x32xbf16>, vector<32x96xbf16>, vector<2x96xf32> -> vector<2x96xf32>
    %534 = arith.addf %533, %22 : vector<2x96xf32>
    %535 = vector.extract_strided_slice %531 {offsets = [0, 0], sizes = [2, 32], strides = [1, 1]} : vector<2x96xf32> to vector<2x32xf32>
    %536 = vector.extract_strided_slice %534 {offsets = [0, 0], sizes = [2, 32], strides = [1, 1]} : vector<2x96xf32> to vector<2x32xf32>
    %537 = arith.addf %535, %536 : vector<2x32xf32>
    %538 = arith.negf %537 : vector<2x32xf32>
    %539 = math.exp %538 : vector<2x32xf32>
    %cst_85 = arith.constant 1.000000e+00 : f32
    %540 = vector.broadcast %cst_85 : f32 to vector<2x32xf32>
    %541 = arith.addf %540, %539 : vector<2x32xf32>
    %542 = arith.divf %540, %541 : vector<2x32xf32>
    %543 = vector.extract_strided_slice %531 {offsets = [0, 32], sizes = [2, 32], strides = [1, 1]} : vector<2x96xf32> to vector<2x32xf32>
    %544 = vector.extract_strided_slice %534 {offsets = [0, 32], sizes = [2, 32], strides = [1, 1]} : vector<2x96xf32> to vector<2x32xf32>
    %545 = arith.addf %543, %544 : vector<2x32xf32>
    %546 = arith.negf %545 : vector<2x32xf32>
    %547 = math.exp %546 : vector<2x32xf32>
    %cst_86 = arith.constant 1.000000e+00 : f32
    %548 = vector.broadcast %cst_86 : f32 to vector<2x32xf32>
    %549 = arith.addf %548, %547 : vector<2x32xf32>
    %550 = arith.divf %548, %549 : vector<2x32xf32>
    %551 = vector.extract_strided_slice %531 {offsets = [0, 64], sizes = [2, 32], strides = [1, 1]} : vector<2x96xf32> to vector<2x32xf32>
    %552 = vector.extract_strided_slice %534 {offsets = [0, 64], sizes = [2, 32], strides = [1, 1]} : vector<2x96xf32> to vector<2x32xf32>
    %553 = arith.mulf %542, %552 : vector<2x32xf32>
    %554 = arith.addf %551, %553 : vector<2x32xf32>
    %555 = math.tanh %554 : vector<2x32xf32>
    %cst_87 = arith.constant 1.000000e+00 : f32
    %556 = vector.broadcast %cst_87 : f32 to vector<2x32xf32>
    %557 = arith.subf %556, %550 : vector<2x32xf32>
    %558 = arith.mulf %557, %555 : vector<2x32xf32>
    %559 = arith.mulf %550, %529 : vector<2x32xf32>
    %560 = arith.addf %558, %559 : vector<2x32xf32>
    %561 = arith.truncf %560 : vector<2x32xf32> to vector<2x32xbf16>
    %cst_88 = arith.constant dense<0.000000e+00> : vector<2x32xf32>
    %562 = tpu.matmul %561, %9, %cst_88 {dimension_numbers = #tpu.dot_dimension_numbers<[1], [0], [0], [1], [0, 0, 1, 1], [], []>} : vector<2x32xbf16>, vector<32x32xbf16>, vector<2x32xf32> -> vector<2x32xf32>
    %563 = vector.shape_cast %561 : vector<2x32xbf16> to vector<2x1x32xbf16>
    "tpu.trace_start"() <{level = 10 : i32, message = "bqk,bsk->bqs"}> : () -> ()
    %cst_89 = arith.constant dense<0.000000e+00> : vector<2x1x8xf32>
    %564 = tpu.matmul %563, %524, %cst_89 {dimension_numbers = #tpu.dot_dimension_numbers<[2], [2], [1], [1], [0, 0, 0, 1, 1, 1], [0], [0]>} : vector<2x1x32xbf16>, vector<2x8x32xbf16>, vector<2x1x8xf32> -> vector<2x1x8xf32>
    "tpu.trace_stop"() : () -> ()
    %565 = vector.shape_cast %564 : vector<2x1x8xf32> to vector<2x8xf32>
    %566 = arith.addf %565, %36 : vector<2x8xf32>
    %cst_90 = arith.constant dense<0xFF800000> : vector<2xf32>
    %567 = vector.multi_reduction <maximumf>, %566, %cst_90 [1] : vector<2x8xf32> to vector<2xf32>
    %568 = vector.shape_cast %567 : vector<2xf32> to vector<2x1xf32>
    %569 = vector.broadcast %568 : vector<2x1xf32> to vector<2x8xf32>
    %570 = arith.subf %566, %569 : vector<2x8xf32>
    %571 = math.exp %570 : vector<2x8xf32>
    %cst_91 = arith.constant dense<0.000000e+00> : vector<2xf32>
    %572 = vector.multi_reduction <add>, %571, %cst_91 [1] : vector<2x8xf32> to vector<2xf32>
    %573 = vector.shape_cast %572 : vector<2xf32> to vector<2x1xf32>
    %574 = tpu.reciprocal %573 : vector<2x1xf32> -> vector<2x1xf32>
    %575 = vector.broadcast %574 : vector<2x1xf32> to vector<2x8xf32>
    %576 = arith.mulf %571, %575 : vector<2x8xf32>
    %577 = vector.shape_cast %576 : vector<2x8xf32> to vector<2x1x8xf32>
    %578 = arith.truncf %577 : vector<2x1x8xf32> to vector<2x1x8xbf16>
    "tpu.trace_start"() <{level = 10 : i32, message = "bqs,bsk->bqk"}> : () -> ()
    %cst_92 = arith.constant dense<0.000000e+00> : vector<2x1x32xf32>
    %579 = tpu.matmul %578, %528, %cst_92 {dimension_numbers = #tpu.dot_dimension_numbers<[2], [1], [1], [2], [0, 0, 0, 1, 1, 2], [0], [0]>} : vector<2x1x8xbf16>, vector<2x8x32xbf16>, vector<2x1x32xf32> -> vector<2x1x32xf32>
    "tpu.trace_stop"() : () -> ()
    %580 = vector.shape_cast %579 : vector<2x1x32xf32> to vector<2x32xf32>
    %581 = arith.addf %580, %562 : vector<2x32xf32>
    %582 = arith.addf %581, %25 : vector<2x32xf32>
    %583 = math.tanh %582 : vector<2x32xf32>
    %584 = vector.extract_strided_slice %51 {offsets = [1, 0, 0], sizes = [1, 2, 96], strides = [1, 1, 1]} : vector<8x2x96xf32> to vector<1x2x96xf32>
    %585 = vector.shape_cast %584 : vector<1x2x96xf32> to vector<2x96xf32>
    %586 = arith.truncf %560 : vector<2x32xf32> to vector<2x32xbf16>
    %cst_93 = arith.constant dense<0.000000e+00> : vector<2x96xf32>
    %587 = tpu.matmul %586, %5, %cst_93 {dimension_numbers = #tpu.dot_dimension_numbers<[1], [0], [0], [1], [0, 0, 1, 1], [], []>} : vector<2x32xbf16>, vector<32x96xbf16>, vector<2x96xf32> -> vector<2x96xf32>
    %588 = arith.addf %587, %22 : vector<2x96xf32>
    %589 = vector.extract_strided_slice %585 {offsets = [0, 0], sizes = [2, 32], strides = [1, 1]} : vector<2x96xf32> to vector<2x32xf32>
    %590 = vector.extract_strided_slice %588 {offsets = [0, 0], sizes = [2, 32], strides = [1, 1]} : vector<2x96xf32> to vector<2x32xf32>
    %591 = arith.addf %589, %590 : vector<2x32xf32>
    %592 = arith.negf %591 : vector<2x32xf32>
    %593 = math.exp %592 : vector<2x32xf32>
    %cst_94 = arith.constant 1.000000e+00 : f32
    %594 = vector.broadcast %cst_94 : f32 to vector<2x32xf32>
    %595 = arith.addf %594, %593 : vector<2x32xf32>
    %596 = arith.divf %594, %595 : vector<2x32xf32>
    %597 = vector.extract_strided_slice %585 {offsets = [0, 32], sizes = [2, 32], strides = [1, 1]} : vector<2x96xf32> to vector<2x32xf32>
    %598 = vector.extract_strided_slice %588 {offsets = [0, 32], sizes = [2, 32], strides = [1, 1]} : vector<2x96xf32> to vector<2x32xf32>
    %599 = arith.addf %597, %598 : vector<2x32xf32>
    %600 = arith.negf %599 : vector<2x32xf32>
    %601 = math.exp %600 : vector<2x32xf32>
    %cst_95 = arith.constant 1.000000e+00 : f32
    %602 = vector.broadcast %cst_95 : f32 to vector<2x32xf32>
    %603 = arith.addf %602, %601 : vector<2x32xf32>
    %604 = arith.divf %602, %603 : vector<2x32xf32>
    %605 = vector.extract_strided_slice %585 {offsets = [0, 64], sizes = [2, 32], strides = [1, 1]} : vector<2x96xf32> to vector<2x32xf32>
    %606 = vector.extract_strided_slice %588 {offsets = [0, 64], sizes = [2, 32], strides = [1, 1]} : vector<2x96xf32> to vector<2x32xf32>
    %607 = arith.mulf %596, %606 : vector<2x32xf32>
    %608 = arith.addf %605, %607 : vector<2x32xf32>
    %609 = math.tanh %608 : vector<2x32xf32>
    %cst_96 = arith.constant 1.000000e+00 : f32
    %610 = vector.broadcast %cst_96 : f32 to vector<2x32xf32>
    %611 = arith.subf %610, %604 : vector<2x32xf32>
    %612 = arith.mulf %611, %609 : vector<2x32xf32>
    %613 = arith.mulf %604, %560 : vector<2x32xf32>
    %614 = arith.addf %612, %613 : vector<2x32xf32>
    %615 = arith.truncf %614 : vector<2x32xf32> to vector<2x32xbf16>
    %cst_97 = arith.constant dense<0.000000e+00> : vector<2x32xf32>
    %616 = tpu.matmul %615, %9, %cst_97 {dimension_numbers = #tpu.dot_dimension_numbers<[1], [0], [0], [1], [0, 0, 1, 1], [], []>} : vector<2x32xbf16>, vector<32x32xbf16>, vector<2x32xf32> -> vector<2x32xf32>
    %617 = vector.shape_cast %615 : vector<2x32xbf16> to vector<2x1x32xbf16>
    "tpu.trace_start"() <{level = 10 : i32, message = "bqk,bsk->bqs"}> : () -> ()
    %cst_98 = arith.constant dense<0.000000e+00> : vector<2x1x8xf32>
    %618 = tpu.matmul %617, %524, %cst_98 {dimension_numbers = #tpu.dot_dimension_numbers<[2], [2], [1], [1], [0, 0, 0, 1, 1, 1], [0], [0]>} : vector<2x1x32xbf16>, vector<2x8x32xbf16>, vector<2x1x8xf32> -> vector<2x1x8xf32>
    "tpu.trace_stop"() : () -> ()
    %619 = vector.shape_cast %618 : vector<2x1x8xf32> to vector<2x8xf32>
    %620 = arith.addf %619, %36 : vector<2x8xf32>
    %cst_99 = arith.constant dense<0xFF800000> : vector<2xf32>
    %621 = vector.multi_reduction <maximumf>, %620, %cst_99 [1] : vector<2x8xf32> to vector<2xf32>
    %622 = vector.shape_cast %621 : vector<2xf32> to vector<2x1xf32>
    %623 = vector.broadcast %622 : vector<2x1xf32> to vector<2x8xf32>
    %624 = arith.subf %620, %623 : vector<2x8xf32>
    %625 = math.exp %624 : vector<2x8xf32>
    %cst_100 = arith.constant dense<0.000000e+00> : vector<2xf32>
    %626 = vector.multi_reduction <add>, %625, %cst_100 [1] : vector<2x8xf32> to vector<2xf32>
    %627 = vector.shape_cast %626 : vector<2xf32> to vector<2x1xf32>
    %628 = tpu.reciprocal %627 : vector<2x1xf32> -> vector<2x1xf32>
    %629 = vector.broadcast %628 : vector<2x1xf32> to vector<2x8xf32>
    %630 = arith.mulf %625, %629 : vector<2x8xf32>
    %631 = vector.shape_cast %630 : vector<2x8xf32> to vector<2x1x8xf32>
    %632 = arith.truncf %631 : vector<2x1x8xf32> to vector<2x1x8xbf16>
    "tpu.trace_start"() <{level = 10 : i32, message = "bqs,bsk->bqk"}> : () -> ()
    %cst_101 = arith.constant dense<0.000000e+00> : vector<2x1x32xf32>
    %633 = tpu.matmul %632, %528, %cst_101 {dimension_numbers = #tpu.dot_dimension_numbers<[2], [1], [1], [2], [0, 0, 0, 1, 1, 2], [0], [0]>} : vector<2x1x8xbf16>, vector<2x8x32xbf16>, vector<2x1x32xf32> -> vector<2x1x32xf32>
    "tpu.trace_stop"() : () -> ()
    %634 = vector.shape_cast %633 : vector<2x1x32xf32> to vector<2x32xf32>
    %635 = arith.addf %634, %616 : vector<2x32xf32>
    %636 = arith.addf %635, %25 : vector<2x32xf32>
    %637 = math.tanh %636 : vector<2x32xf32>
    %638 = vector.extract_strided_slice %51 {offsets = [2, 0, 0], sizes = [1, 2, 96], strides = [1, 1, 1]} : vector<8x2x96xf32> to vector<1x2x96xf32>
    %639 = vector.shape_cast %638 : vector<1x2x96xf32> to vector<2x96xf32>
    %640 = arith.truncf %614 : vector<2x32xf32> to vector<2x32xbf16>
    %cst_102 = arith.constant dense<0.000000e+00> : vector<2x96xf32>
    %641 = tpu.matmul %640, %5, %cst_102 {dimension_numbers = #tpu.dot_dimension_numbers<[1], [0], [0], [1], [0, 0, 1, 1], [], []>} : vector<2x32xbf16>, vector<32x96xbf16>, vector<2x96xf32> -> vector<2x96xf32>
    %642 = arith.addf %641, %22 : vector<2x96xf32>
    %643 = vector.extract_strided_slice %639 {offsets = [0, 0], sizes = [2, 32], strides = [1, 1]} : vector<2x96xf32> to vector<2x32xf32>
    %644 = vector.extract_strided_slice %642 {offsets = [0, 0], sizes = [2, 32], strides = [1, 1]} : vector<2x96xf32> to vector<2x32xf32>
    %645 = arith.addf %643, %644 : vector<2x32xf32>
    %646 = arith.negf %645 : vector<2x32xf32>
    %647 = math.exp %646 : vector<2x32xf32>
    %cst_103 = arith.constant 1.000000e+00 : f32
    %648 = vector.broadcast %cst_103 : f32 to vector<2x32xf32>
    %649 = arith.addf %648, %647 : vector<2x32xf32>
    %650 = arith.divf %648, %649 : vector<2x32xf32>
    %651 = vector.extract_strided_slice %639 {offsets = [0, 32], sizes = [2, 32], strides = [1, 1]} : vector<2x96xf32> to vector<2x32xf32>
    %652 = vector.extract_strided_slice %642 {offsets = [0, 32], sizes = [2, 32], strides = [1, 1]} : vector<2x96xf32> to vector<2x32xf32>
    %653 = arith.addf %651, %652 : vector<2x32xf32>
    %654 = arith.negf %653 : vector<2x32xf32>
    %655 = math.exp %654 : vector<2x32xf32>
    %cst_104 = arith.constant 1.000000e+00 : f32
    %656 = vector.broadcast %cst_104 : f32 to vector<2x32xf32>
    %657 = arith.addf %656, %655 : vector<2x32xf32>
    %658 = arith.divf %656, %657 : vector<2x32xf32>
    %659 = vector.extract_strided_slice %639 {offsets = [0, 64], sizes = [2, 32], strides = [1, 1]} : vector<2x96xf32> to vector<2x32xf32>
    %660 = vector.extract_strided_slice %642 {offsets = [0, 64], sizes = [2, 32], strides = [1, 1]} : vector<2x96xf32> to vector<2x32xf32>
    %661 = arith.mulf %650, %660 : vector<2x32xf32>
    %662 = arith.addf %659, %661 : vector<2x32xf32>
    %663 = math.tanh %662 : vector<2x32xf32>
    %cst_105 = arith.constant 1.000000e+00 : f32
    %664 = vector.broadcast %cst_105 : f32 to vector<2x32xf32>
    %665 = arith.subf %664, %658 : vector<2x32xf32>
    %666 = arith.mulf %665, %663 : vector<2x32xf32>
    %667 = arith.mulf %658, %614 : vector<2x32xf32>
    %668 = arith.addf %666, %667 : vector<2x32xf32>
    %669 = arith.truncf %668 : vector<2x32xf32> to vector<2x32xbf16>
    %cst_106 = arith.constant dense<0.000000e+00> : vector<2x32xf32>
    %670 = tpu.matmul %669, %9, %cst_106 {dimension_numbers = #tpu.dot_dimension_numbers<[1], [0], [0], [1], [0, 0, 1, 1], [], []>} : vector<2x32xbf16>, vector<32x32xbf16>, vector<2x32xf32> -> vector<2x32xf32>
    %671 = vector.shape_cast %669 : vector<2x32xbf16> to vector<2x1x32xbf16>
    "tpu.trace_start"() <{level = 10 : i32, message = "bqk,bsk->bqs"}> : () -> ()
    %cst_107 = arith.constant dense<0.000000e+00> : vector<2x1x8xf32>
    %672 = tpu.matmul %671, %524, %cst_107 {dimension_numbers = #tpu.dot_dimension_numbers<[2], [2], [1], [1], [0, 0, 0, 1, 1, 1], [0], [0]>} : vector<2x1x32xbf16>, vector<2x8x32xbf16>, vector<2x1x8xf32> -> vector<2x1x8xf32>
    "tpu.trace_stop"() : () -> ()
    %673 = vector.shape_cast %672 : vector<2x1x8xf32> to vector<2x8xf32>
    %674 = arith.addf %673, %36 : vector<2x8xf32>
    %cst_108 = arith.constant dense<0xFF800000> : vector<2xf32>
    %675 = vector.multi_reduction <maximumf>, %674, %cst_108 [1] : vector<2x8xf32> to vector<2xf32>
    %676 = vector.shape_cast %675 : vector<2xf32> to vector<2x1xf32>
    %677 = vector.broadcast %676 : vector<2x1xf32> to vector<2x8xf32>
    %678 = arith.subf %674, %677 : vector<2x8xf32>
    %679 = math.exp %678 : vector<2x8xf32>
    %cst_109 = arith.constant dense<0.000000e+00> : vector<2xf32>
    %680 = vector.multi_reduction <add>, %679, %cst_109 [1] : vector<2x8xf32> to vector<2xf32>
    %681 = vector.shape_cast %680 : vector<2xf32> to vector<2x1xf32>
    %682 = tpu.reciprocal %681 : vector<2x1xf32> -> vector<2x1xf32>
    %683 = vector.broadcast %682 : vector<2x1xf32> to vector<2x8xf32>
    %684 = arith.mulf %679, %683 : vector<2x8xf32>
    %685 = vector.shape_cast %684 : vector<2x8xf32> to vector<2x1x8xf32>
    %686 = arith.truncf %685 : vector<2x1x8xf32> to vector<2x1x8xbf16>
    "tpu.trace_start"() <{level = 10 : i32, message = "bqs,bsk->bqk"}> : () -> ()
    %cst_110 = arith.constant dense<0.000000e+00> : vector<2x1x32xf32>
    %687 = tpu.matmul %686, %528, %cst_110 {dimension_numbers = #tpu.dot_dimension_numbers<[2], [1], [1], [2], [0, 0, 0, 1, 1, 2], [0], [0]>} : vector<2x1x8xbf16>, vector<2x8x32xbf16>, vector<2x1x32xf32> -> vector<2x1x32xf32>
    "tpu.trace_stop"() : () -> ()
    %688 = vector.shape_cast %687 : vector<2x1x32xf32> to vector<2x32xf32>
    %689 = arith.addf %688, %670 : vector<2x32xf32>
    %690 = arith.addf %689, %25 : vector<2x32xf32>
    %691 = math.tanh %690 : vector<2x32xf32>
    %692 = vector.extract_strided_slice %51 {offsets = [3, 0, 0], sizes = [1, 2, 96], strides = [1, 1, 1]} : vector<8x2x96xf32> to vector<1x2x96xf32>
    %693 = vector.shape_cast %692 : vector<1x2x96xf32> to vector<2x96xf32>
    %694 = arith.truncf %668 : vector<2x32xf32> to vector<2x32xbf16>
    %cst_111 = arith.constant dense<0.000000e+00> : vector<2x96xf32>
    %695 = tpu.matmul %694, %5, %cst_111 {dimension_numbers = #tpu.dot_dimension_numbers<[1], [0], [0], [1], [0, 0, 1, 1], [], []>} : vector<2x32xbf16>, vector<32x96xbf16>, vector<2x96xf32> -> vector<2x96xf32>
    %696 = arith.addf %695, %22 : vector<2x96xf32>
    %697 = vector.extract_strided_slice %693 {offsets = [0, 0], sizes = [2, 32], strides = [1, 1]} : vector<2x96xf32> to vector<2x32xf32>
    %698 = vector.extract_strided_slice %696 {offsets = [0, 0], sizes = [2, 32], strides = [1, 1]} : vector<2x96xf32> to vector<2x32xf32>
    %699 = arith.addf %697, %698 : vector<2x32xf32>
    %700 = arith.negf %699 : vector<2x32xf32>
    %701 = math.exp %700 : vector<2x32xf32>
    %cst_112 = arith.constant 1.000000e+00 : f32
    %702 = vector.broadcast %cst_112 : f32 to vector<2x32xf32>
    %703 = arith.addf %702, %701 : vector<2x32xf32>
    %704 = arith.divf %702, %703 : vector<2x32xf32>
    %705 = vector.extract_strided_slice %693 {offsets = [0, 32], sizes = [2, 32], strides = [1, 1]} : vector<2x96xf32> to vector<2x32xf32>
    %706 = vector.extract_strided_slice %696 {offsets = [0, 32], sizes = [2, 32], strides = [1, 1]} : vector<2x96xf32> to vector<2x32xf32>
    %707 = arith.addf %705, %706 : vector<2x32xf32>
    %708 = arith.negf %707 : vector<2x32xf32>
    %709 = math.exp %708 : vector<2x32xf32>
    %cst_113 = arith.constant 1.000000e+00 : f32
    %710 = vector.broadcast %cst_113 : f32 to vector<2x32xf32>
    %711 = arith.addf %710, %709 : vector<2x32xf32>
    %712 = arith.divf %710, %711 : vector<2x32xf32>
    %713 = vector.extract_strided_slice %693 {offsets = [0, 64], sizes = [2, 32], strides = [1, 1]} : vector<2x96xf32> to vector<2x32xf32>
    %714 = vector.extract_strided_slice %696 {offsets = [0, 64], sizes = [2, 32], strides = [1, 1]} : vector<2x96xf32> to vector<2x32xf32>
    %715 = arith.mulf %704, %714 : vector<2x32xf32>
    %716 = arith.addf %713, %715 : vector<2x32xf32>
    %717 = math.tanh %716 : vector<2x32xf32>
    %cst_114 = arith.constant 1.000000e+00 : f32
    %718 = vector.broadcast %cst_114 : f32 to vector<2x32xf32>
    %719 = arith.subf %718, %712 : vector<2x32xf32>
    %720 = arith.mulf %719, %717 : vector<2x32xf32>
    %721 = arith.mulf %712, %668 : vector<2x32xf32>
    %722 = arith.addf %720, %721 : vector<2x32xf32>
    %723 = arith.truncf %722 : vector<2x32xf32> to vector<2x32xbf16>
    %cst_115 = arith.constant dense<0.000000e+00> : vector<2x32xf32>
    %724 = tpu.matmul %723, %9, %cst_115 {dimension_numbers = #tpu.dot_dimension_numbers<[1], [0], [0], [1], [0, 0, 1, 1], [], []>} : vector<2x32xbf16>, vector<32x32xbf16>, vector<2x32xf32> -> vector<2x32xf32>
    %725 = vector.shape_cast %723 : vector<2x32xbf16> to vector<2x1x32xbf16>
    "tpu.trace_start"() <{level = 10 : i32, message = "bqk,bsk->bqs"}> : () -> ()
    %cst_116 = arith.constant dense<0.000000e+00> : vector<2x1x8xf32>
    %726 = tpu.matmul %725, %524, %cst_116 {dimension_numbers = #tpu.dot_dimension_numbers<[2], [2], [1], [1], [0, 0, 0, 1, 1, 1], [0], [0]>} : vector<2x1x32xbf16>, vector<2x8x32xbf16>, vector<2x1x8xf32> -> vector<2x1x8xf32>
    "tpu.trace_stop"() : () -> ()
    %727 = vector.shape_cast %726 : vector<2x1x8xf32> to vector<2x8xf32>
    %728 = arith.addf %727, %36 : vector<2x8xf32>
    %cst_117 = arith.constant dense<0xFF800000> : vector<2xf32>
    %729 = vector.multi_reduction <maximumf>, %728, %cst_117 [1] : vector<2x8xf32> to vector<2xf32>
    %730 = vector.shape_cast %729 : vector<2xf32> to vector<2x1xf32>
    %731 = vector.broadcast %730 : vector<2x1xf32> to vector<2x8xf32>
    %732 = arith.subf %728, %731 : vector<2x8xf32>
    %733 = math.exp %732 : vector<2x8xf32>
    %cst_118 = arith.constant dense<0.000000e+00> : vector<2xf32>
    %734 = vector.multi_reduction <add>, %733, %cst_118 [1] : vector<2x8xf32> to vector<2xf32>
    %735 = vector.shape_cast %734 : vector<2xf32> to vector<2x1xf32>
    %736 = tpu.reciprocal %735 : vector<2x1xf32> -> vector<2x1xf32>
    %737 = vector.broadcast %736 : vector<2x1xf32> to vector<2x8xf32>
    %738 = arith.mulf %733, %737 : vector<2x8xf32>
    %739 = vector.shape_cast %738 : vector<2x8xf32> to vector<2x1x8xf32>
    %740 = arith.truncf %739 : vector<2x1x8xf32> to vector<2x1x8xbf16>
    "tpu.trace_start"() <{level = 10 : i32, message = "bqs,bsk->bqk"}> : () -> ()
    %cst_119 = arith.constant dense<0.000000e+00> : vector<2x1x32xf32>
    %741 = tpu.matmul %740, %528, %cst_119 {dimension_numbers = #tpu.dot_dimension_numbers<[2], [1], [1], [2], [0, 0, 0, 1, 1, 2], [0], [0]>} : vector<2x1x8xbf16>, vector<2x8x32xbf16>, vector<2x1x32xf32> -> vector<2x1x32xf32>
    "tpu.trace_stop"() : () -> ()
    %742 = vector.shape_cast %741 : vector<2x1x32xf32> to vector<2x32xf32>
    %743 = arith.addf %742, %724 : vector<2x32xf32>
    %744 = arith.addf %743, %25 : vector<2x32xf32>
    %745 = math.tanh %744 : vector<2x32xf32>
    %746 = vector.extract_strided_slice %51 {offsets = [4, 0, 0], sizes = [1, 2, 96], strides = [1, 1, 1]} : vector<8x2x96xf32> to vector<1x2x96xf32>
    %747 = vector.shape_cast %746 : vector<1x2x96xf32> to vector<2x96xf32>
    %748 = arith.truncf %722 : vector<2x32xf32> to vector<2x32xbf16>
    %cst_120 = arith.constant dense<0.000000e+00> : vector<2x96xf32>
    %749 = tpu.matmul %748, %5, %cst_120 {dimension_numbers = #tpu.dot_dimension_numbers<[1], [0], [0], [1], [0, 0, 1, 1], [], []>} : vector<2x32xbf16>, vector<32x96xbf16>, vector<2x96xf32> -> vector<2x96xf32>
    %750 = arith.addf %749, %22 : vector<2x96xf32>
    %751 = vector.extract_strided_slice %747 {offsets = [0, 0], sizes = [2, 32], strides = [1, 1]} : vector<2x96xf32> to vector<2x32xf32>
    %752 = vector.extract_strided_slice %750 {offsets = [0, 0], sizes = [2, 32], strides = [1, 1]} : vector<2x96xf32> to vector<2x32xf32>
    %753 = arith.addf %751, %752 : vector<2x32xf32>
    %754 = arith.negf %753 : vector<2x32xf32>
    %755 = math.exp %754 : vector<2x32xf32>
    %cst_121 = arith.constant 1.000000e+00 : f32
    %756 = vector.broadcast %cst_121 : f32 to vector<2x32xf32>
    %757 = arith.addf %756, %755 : vector<2x32xf32>
    %758 = arith.divf %756, %757 : vector<2x32xf32>
    %759 = vector.extract_strided_slice %747 {offsets = [0, 32], sizes = [2, 32], strides = [1, 1]} : vector<2x96xf32> to vector<2x32xf32>
    %760 = vector.extract_strided_slice %750 {offsets = [0, 32], sizes = [2, 32], strides = [1, 1]} : vector<2x96xf32> to vector<2x32xf32>
    %761 = arith.addf %759, %760 : vector<2x32xf32>
    %762 = arith.negf %761 : vector<2x32xf32>
    %763 = math.exp %762 : vector<2x32xf32>
    %cst_122 = arith.constant 1.000000e+00 : f32
    %764 = vector.broadcast %cst_122 : f32 to vector<2x32xf32>
    %765 = arith.addf %764, %763 : vector<2x32xf32>
    %766 = arith.divf %764, %765 : vector<2x32xf32>
    %767 = vector.extract_strided_slice %747 {offsets = [0, 64], sizes = [2, 32], strides = [1, 1]} : vector<2x96xf32> to vector<2x32xf32>
    %768 = vector.extract_strided_slice %750 {offsets = [0, 64], sizes = [2, 32], strides = [1, 1]} : vector<2x96xf32> to vector<2x32xf32>
    %769 = arith.mulf %758, %768 : vector<2x32xf32>
    %770 = arith.addf %767, %769 : vector<2x32xf32>
    %771 = math.tanh %770 : vector<2x32xf32>
    %cst_123 = arith.constant 1.000000e+00 : f32
    %772 = vector.broadcast %cst_123 : f32 to vector<2x32xf32>
    %773 = arith.subf %772, %766 : vector<2x32xf32>
    %774 = arith.mulf %773, %771 : vector<2x32xf32>
    %775 = arith.mulf %766, %722 : vector<2x32xf32>
    %776 = arith.addf %774, %775 : vector<2x32xf32>
    %777 = arith.truncf %776 : vector<2x32xf32> to vector<2x32xbf16>
    %cst_124 = arith.constant dense<0.000000e+00> : vector<2x32xf32>
    %778 = tpu.matmul %777, %9, %cst_124 {dimension_numbers = #tpu.dot_dimension_numbers<[1], [0], [0], [1], [0, 0, 1, 1], [], []>} : vector<2x32xbf16>, vector<32x32xbf16>, vector<2x32xf32> -> vector<2x32xf32>
    %779 = vector.shape_cast %777 : vector<2x32xbf16> to vector<2x1x32xbf16>
    "tpu.trace_start"() <{level = 10 : i32, message = "bqk,bsk->bqs"}> : () -> ()
    %cst_125 = arith.constant dense<0.000000e+00> : vector<2x1x8xf32>
    %780 = tpu.matmul %779, %524, %cst_125 {dimension_numbers = #tpu.dot_dimension_numbers<[2], [2], [1], [1], [0, 0, 0, 1, 1, 1], [0], [0]>} : vector<2x1x32xbf16>, vector<2x8x32xbf16>, vector<2x1x8xf32> -> vector<2x1x8xf32>
    "tpu.trace_stop"() : () -> ()
    %781 = vector.shape_cast %780 : vector<2x1x8xf32> to vector<2x8xf32>
    %782 = arith.addf %781, %36 : vector<2x8xf32>
    %cst_126 = arith.constant dense<0xFF800000> : vector<2xf32>
    %783 = vector.multi_reduction <maximumf>, %782, %cst_126 [1] : vector<2x8xf32> to vector<2xf32>
    %784 = vector.shape_cast %783 : vector<2xf32> to vector<2x1xf32>
    %785 = vector.broadcast %784 : vector<2x1xf32> to vector<2x8xf32>
    %786 = arith.subf %782, %785 : vector<2x8xf32>
    %787 = math.exp %786 : vector<2x8xf32>
    %cst_127 = arith.constant dense<0.000000e+00> : vector<2xf32>
    %788 = vector.multi_reduction <add>, %787, %cst_127 [1] : vector<2x8xf32> to vector<2xf32>
    %789 = vector.shape_cast %788 : vector<2xf32> to vector<2x1xf32>
    %790 = tpu.reciprocal %789 : vector<2x1xf32> -> vector<2x1xf32>
    %791 = vector.broadcast %790 : vector<2x1xf32> to vector<2x8xf32>
    %792 = arith.mulf %787, %791 : vector<2x8xf32>
    %793 = vector.shape_cast %792 : vector<2x8xf32> to vector<2x1x8xf32>
    %794 = arith.truncf %793 : vector<2x1x8xf32> to vector<2x1x8xbf16>
    "tpu.trace_start"() <{level = 10 : i32, message = "bqs,bsk->bqk"}> : () -> ()
    %cst_128 = arith.constant dense<0.000000e+00> : vector<2x1x32xf32>
    %795 = tpu.matmul %794, %528, %cst_128 {dimension_numbers = #tpu.dot_dimension_numbers<[2], [1], [1], [2], [0, 0, 0, 1, 1, 2], [0], [0]>} : vector<2x1x8xbf16>, vector<2x8x32xbf16>, vector<2x1x32xf32> -> vector<2x1x32xf32>
    "tpu.trace_stop"() : () -> ()
    %796 = vector.shape_cast %795 : vector<2x1x32xf32> to vector<2x32xf32>
    %797 = arith.addf %796, %778 : vector<2x32xf32>
    %798 = arith.addf %797, %25 : vector<2x32xf32>
    %799 = math.tanh %798 : vector<2x32xf32>
    %800 = vector.extract_strided_slice %51 {offsets = [5, 0, 0], sizes = [1, 2, 96], strides = [1, 1, 1]} : vector<8x2x96xf32> to vector<1x2x96xf32>
    %801 = vector.shape_cast %800 : vector<1x2x96xf32> to vector<2x96xf32>
    %802 = arith.truncf %776 : vector<2x32xf32> to vector<2x32xbf16>
    %cst_129 = arith.constant dense<0.000000e+00> : vector<2x96xf32>
    %803 = tpu.matmul %802, %5, %cst_129 {dimension_numbers = #tpu.dot_dimension_numbers<[1], [0], [0], [1], [0, 0, 1, 1], [], []>} : vector<2x32xbf16>, vector<32x96xbf16>, vector<2x96xf32> -> vector<2x96xf32>
    %804 = arith.addf %803, %22 : vector<2x96xf32>
    %805 = vector.extract_strided_slice %801 {offsets = [0, 0], sizes = [2, 32], strides = [1, 1]} : vector<2x96xf32> to vector<2x32xf32>
    %806 = vector.extract_strided_slice %804 {offsets = [0, 0], sizes = [2, 32], strides = [1, 1]} : vector<2x96xf32> to vector<2x32xf32>
    %807 = arith.addf %805, %806 : vector<2x32xf32>
    %808 = arith.negf %807 : vector<2x32xf32>
    %809 = math.exp %808 : vector<2x32xf32>
    %cst_130 = arith.constant 1.000000e+00 : f32
    %810 = vector.broadcast %cst_130 : f32 to vector<2x32xf32>
    %811 = arith.addf %810, %809 : vector<2x32xf32>
    %812 = arith.divf %810, %811 : vector<2x32xf32>
    %813 = vector.extract_strided_slice %801 {offsets = [0, 32], sizes = [2, 32], strides = [1, 1]} : vector<2x96xf32> to vector<2x32xf32>
    %814 = vector.extract_strided_slice %804 {offsets = [0, 32], sizes = [2, 32], strides = [1, 1]} : vector<2x96xf32> to vector<2x32xf32>
    %815 = arith.addf %813, %814 : vector<2x32xf32>
    %816 = arith.negf %815 : vector<2x32xf32>
    %817 = math.exp %816 : vector<2x32xf32>
    %cst_131 = arith.constant 1.000000e+00 : f32
    %818 = vector.broadcast %cst_131 : f32 to vector<2x32xf32>
    %819 = arith.addf %818, %817 : vector<2x32xf32>
    %820 = arith.divf %818, %819 : vector<2x32xf32>
    %821 = vector.extract_strided_slice %801 {offsets = [0, 64], sizes = [2, 32], strides = [1, 1]} : vector<2x96xf32> to vector<2x32xf32>
    %822 = vector.extract_strided_slice %804 {offsets = [0, 64], sizes = [2, 32], strides = [1, 1]} : vector<2x96xf32> to vector<2x32xf32>
    %823 = arith.mulf %812, %822 : vector<2x32xf32>
    %824 = arith.addf %821, %823 : vector<2x32xf32>
    %825 = math.tanh %824 : vector<2x32xf32>
    %cst_132 = arith.constant 1.000000e+00 : f32
    %826 = vector.broadcast %cst_132 : f32 to vector<2x32xf32>
    %827 = arith.subf %826, %820 : vector<2x32xf32>
    %828 = arith.mulf %827, %825 : vector<2x32xf32>
    %829 = arith.mulf %820, %776 : vector<2x32xf32>
    %830 = arith.addf %828, %829 : vector<2x32xf32>
    %831 = arith.truncf %830 : vector<2x32xf32> to vector<2x32xbf16>
    %cst_133 = arith.constant dense<0.000000e+00> : vector<2x32xf32>
    %832 = tpu.matmul %831, %9, %cst_133 {dimension_numbers = #tpu.dot_dimension_numbers<[1], [0], [0], [1], [0, 0, 1, 1], [], []>} : vector<2x32xbf16>, vector<32x32xbf16>, vector<2x32xf32> -> vector<2x32xf32>
    %833 = vector.shape_cast %831 : vector<2x32xbf16> to vector<2x1x32xbf16>
    "tpu.trace_start"() <{level = 10 : i32, message = "bqk,bsk->bqs"}> : () -> ()
    %cst_134 = arith.constant dense<0.000000e+00> : vector<2x1x8xf32>
    %834 = tpu.matmul %833, %524, %cst_134 {dimension_numbers = #tpu.dot_dimension_numbers<[2], [2], [1], [1], [0, 0, 0, 1, 1, 1], [0], [0]>} : vector<2x1x32xbf16>, vector<2x8x32xbf16>, vector<2x1x8xf32> -> vector<2x1x8xf32>
    "tpu.trace_stop"() : () -> ()
    %835 = vector.shape_cast %834 : vector<2x1x8xf32> to vector<2x8xf32>
    %836 = arith.addf %835, %36 : vector<2x8xf32>
    %cst_135 = arith.constant dense<0xFF800000> : vector<2xf32>
    %837 = vector.multi_reduction <maximumf>, %836, %cst_135 [1] : vector<2x8xf32> to vector<2xf32>
    %838 = vector.shape_cast %837 : vector<2xf32> to vector<2x1xf32>
    %839 = vector.broadcast %838 : vector<2x1xf32> to vector<2x8xf32>
    %840 = arith.subf %836, %839 : vector<2x8xf32>
    %841 = math.exp %840 : vector<2x8xf32>
    %cst_136 = arith.constant dense<0.000000e+00> : vector<2xf32>
    %842 = vector.multi_reduction <add>, %841, %cst_136 [1] : vector<2x8xf32> to vector<2xf32>
    %843 = vector.shape_cast %842 : vector<2xf32> to vector<2x1xf32>
    %844 = tpu.reciprocal %843 : vector<2x1xf32> -> vector<2x1xf32>
    %845 = vector.broadcast %844 : vector<2x1xf32> to vector<2x8xf32>
    %846 = arith.mulf %841, %845 : vector<2x8xf32>
    %847 = vector.shape_cast %846 : vector<2x8xf32> to vector<2x1x8xf32>
    %848 = arith.truncf %847 : vector<2x1x8xf32> to vector<2x1x8xbf16>
    "tpu.trace_start"() <{level = 10 : i32, message = "bqs,bsk->bqk"}> : () -> ()
    %cst_137 = arith.constant dense<0.000000e+00> : vector<2x1x32xf32>
    %849 = tpu.matmul %848, %528, %cst_137 {dimension_numbers = #tpu.dot_dimension_numbers<[2], [1], [1], [2], [0, 0, 0, 1, 1, 2], [0], [0]>} : vector<2x1x8xbf16>, vector<2x8x32xbf16>, vector<2x1x32xf32> -> vector<2x1x32xf32>
    "tpu.trace_stop"() : () -> ()
    %850 = vector.shape_cast %849 : vector<2x1x32xf32> to vector<2x32xf32>
    %851 = arith.addf %850, %832 : vector<2x32xf32>
    %852 = arith.addf %851, %25 : vector<2x32xf32>
    %853 = math.tanh %852 : vector<2x32xf32>
    %854 = vector.extract_strided_slice %51 {offsets = [6, 0, 0], sizes = [1, 2, 96], strides = [1, 1, 1]} : vector<8x2x96xf32> to vector<1x2x96xf32>
    %855 = vector.shape_cast %854 : vector<1x2x96xf32> to vector<2x96xf32>
    %856 = arith.truncf %830 : vector<2x32xf32> to vector<2x32xbf16>
    %cst_138 = arith.constant dense<0.000000e+00> : vector<2x96xf32>
    %857 = tpu.matmul %856, %5, %cst_138 {dimension_numbers = #tpu.dot_dimension_numbers<[1], [0], [0], [1], [0, 0, 1, 1], [], []>} : vector<2x32xbf16>, vector<32x96xbf16>, vector<2x96xf32> -> vector<2x96xf32>
    %858 = arith.addf %857, %22 : vector<2x96xf32>
    %859 = vector.extract_strided_slice %855 {offsets = [0, 0], sizes = [2, 32], strides = [1, 1]} : vector<2x96xf32> to vector<2x32xf32>
    %860 = vector.extract_strided_slice %858 {offsets = [0, 0], sizes = [2, 32], strides = [1, 1]} : vector<2x96xf32> to vector<2x32xf32>
    %861 = arith.addf %859, %860 : vector<2x32xf32>
    %862 = arith.negf %861 : vector<2x32xf32>
    %863 = math.exp %862 : vector<2x32xf32>
    %cst_139 = arith.constant 1.000000e+00 : f32
    %864 = vector.broadcast %cst_139 : f32 to vector<2x32xf32>
    %865 = arith.addf %864, %863 : vector<2x32xf32>
    %866 = arith.divf %864, %865 : vector<2x32xf32>
    %867 = vector.extract_strided_slice %855 {offsets = [0, 32], sizes = [2, 32], strides = [1, 1]} : vector<2x96xf32> to vector<2x32xf32>
    %868 = vector.extract_strided_slice %858 {offsets = [0, 32], sizes = [2, 32], strides = [1, 1]} : vector<2x96xf32> to vector<2x32xf32>
    %869 = arith.addf %867, %868 : vector<2x32xf32>
    %870 = arith.negf %869 : vector<2x32xf32>
    %871 = math.exp %870 : vector<2x32xf32>
    %cst_140 = arith.constant 1.000000e+00 : f32
    %872 = vector.broadcast %cst_140 : f32 to vector<2x32xf32>
    %873 = arith.addf %872, %871 : vector<2x32xf32>
    %874 = arith.divf %872, %873 : vector<2x32xf32>
    %875 = vector.extract_strided_slice %855 {offsets = [0, 64], sizes = [2, 32], strides = [1, 1]} : vector<2x96xf32> to vector<2x32xf32>
    %876 = vector.extract_strided_slice %858 {offsets = [0, 64], sizes = [2, 32], strides = [1, 1]} : vector<2x96xf32> to vector<2x32xf32>
    %877 = arith.mulf %866, %876 : vector<2x32xf32>
    %878 = arith.addf %875, %877 : vector<2x32xf32>
    %879 = math.tanh %878 : vector<2x32xf32>
    %cst_141 = arith.constant 1.000000e+00 : f32
    %880 = vector.broadcast %cst_141 : f32 to vector<2x32xf32>
    %881 = arith.subf %880, %874 : vector<2x32xf32>
    %882 = arith.mulf %881, %879 : vector<2x32xf32>
    %883 = arith.mulf %874, %830 : vector<2x32xf32>
    %884 = arith.addf %882, %883 : vector<2x32xf32>
    %885 = arith.truncf %884 : vector<2x32xf32> to vector<2x32xbf16>
    %cst_142 = arith.constant dense<0.000000e+00> : vector<2x32xf32>
    %886 = tpu.matmul %885, %9, %cst_142 {dimension_numbers = #tpu.dot_dimension_numbers<[1], [0], [0], [1], [0, 0, 1, 1], [], []>} : vector<2x32xbf16>, vector<32x32xbf16>, vector<2x32xf32> -> vector<2x32xf32>
    %887 = vector.shape_cast %885 : vector<2x32xbf16> to vector<2x1x32xbf16>
    "tpu.trace_start"() <{level = 10 : i32, message = "bqk,bsk->bqs"}> : () -> ()
    %cst_143 = arith.constant dense<0.000000e+00> : vector<2x1x8xf32>
    %888 = tpu.matmul %887, %524, %cst_143 {dimension_numbers = #tpu.dot_dimension_numbers<[2], [2], [1], [1], [0, 0, 0, 1, 1, 1], [0], [0]>} : vector<2x1x32xbf16>, vector<2x8x32xbf16>, vector<2x1x8xf32> -> vector<2x1x8xf32>
    "tpu.trace_stop"() : () -> ()
    %889 = vector.shape_cast %888 : vector<2x1x8xf32> to vector<2x8xf32>
    %890 = arith.addf %889, %36 : vector<2x8xf32>
    %cst_144 = arith.constant dense<0xFF800000> : vector<2xf32>
    %891 = vector.multi_reduction <maximumf>, %890, %cst_144 [1] : vector<2x8xf32> to vector<2xf32>
    %892 = vector.shape_cast %891 : vector<2xf32> to vector<2x1xf32>
    %893 = vector.broadcast %892 : vector<2x1xf32> to vector<2x8xf32>
    %894 = arith.subf %890, %893 : vector<2x8xf32>
    %895 = math.exp %894 : vector<2x8xf32>
    %cst_145 = arith.constant dense<0.000000e+00> : vector<2xf32>
    %896 = vector.multi_reduction <add>, %895, %cst_145 [1] : vector<2x8xf32> to vector<2xf32>
    %897 = vector.shape_cast %896 : vector<2xf32> to vector<2x1xf32>
    %898 = tpu.reciprocal %897 : vector<2x1xf32> -> vector<2x1xf32>
    %899 = vector.broadcast %898 : vector<2x1xf32> to vector<2x8xf32>
    %900 = arith.mulf %895, %899 : vector<2x8xf32>
    %901 = vector.shape_cast %900 : vector<2x8xf32> to vector<2x1x8xf32>
    %902 = arith.truncf %901 : vector<2x1x8xf32> to vector<2x1x8xbf16>
    "tpu.trace_start"() <{level = 10 : i32, message = "bqs,bsk->bqk"}> : () -> ()
    %cst_146 = arith.constant dense<0.000000e+00> : vector<2x1x32xf32>
    %903 = tpu.matmul %902, %528, %cst_146 {dimension_numbers = #tpu.dot_dimension_numbers<[2], [1], [1], [2], [0, 0, 0, 1, 1, 2], [0], [0]>} : vector<2x1x8xbf16>, vector<2x8x32xbf16>, vector<2x1x32xf32> -> vector<2x1x32xf32>
    "tpu.trace_stop"() : () -> ()
    %904 = vector.shape_cast %903 : vector<2x1x32xf32> to vector<2x32xf32>
    %905 = arith.addf %904, %886 : vector<2x32xf32>
    %906 = arith.addf %905, %25 : vector<2x32xf32>
    %907 = math.tanh %906 : vector<2x32xf32>
    %908 = vector.extract_strided_slice %51 {offsets = [7, 0, 0], sizes = [1, 2, 96], strides = [1, 1, 1]} : vector<8x2x96xf32> to vector<1x2x96xf32>
    %909 = vector.shape_cast %908 : vector<1x2x96xf32> to vector<2x96xf32>
    %910 = arith.truncf %884 : vector<2x32xf32> to vector<2x32xbf16>
    %cst_147 = arith.constant dense<0.000000e+00> : vector<2x96xf32>
    %911 = tpu.matmul %910, %5, %cst_147 {dimension_numbers = #tpu.dot_dimension_numbers<[1], [0], [0], [1], [0, 0, 1, 1], [], []>} : vector<2x32xbf16>, vector<32x96xbf16>, vector<2x96xf32> -> vector<2x96xf32>
    %912 = arith.addf %911, %22 : vector<2x96xf32>
    %913 = vector.extract_strided_slice %909 {offsets = [0, 0], sizes = [2, 32], strides = [1, 1]} : vector<2x96xf32> to vector<2x32xf32>
    %914 = vector.extract_strided_slice %912 {offsets = [0, 0], sizes = [2, 32], strides = [1, 1]} : vector<2x96xf32> to vector<2x32xf32>
    %915 = arith.addf %913, %914 : vector<2x32xf32>
    %916 = arith.negf %915 : vector<2x32xf32>
    %917 = math.exp %916 : vector<2x32xf32>
    %cst_148 = arith.constant 1.000000e+00 : f32
    %918 = vector.broadcast %cst_148 : f32 to vector<2x32xf32>
    %919 = arith.addf %918, %917 : vector<2x32xf32>
    %920 = arith.divf %918, %919 : vector<2x32xf32>
    %921 = vector.extract_strided_slice %909 {offsets = [0, 32], sizes = [2, 32], strides = [1, 1]} : vector<2x96xf32> to vector<2x32xf32>
    %922 = vector.extract_strided_slice %912 {offsets = [0, 32], sizes = [2, 32], strides = [1, 1]} : vector<2x96xf32> to vector<2x32xf32>
    %923 = arith.addf %921, %922 : vector<2x32xf32>
    %924 = arith.negf %923 : vector<2x32xf32>
    %925 = math.exp %924 : vector<2x32xf32>
    %cst_149 = arith.constant 1.000000e+00 : f32
    %926 = vector.broadcast %cst_149 : f32 to vector<2x32xf32>
    %927 = arith.addf %926, %925 : vector<2x32xf32>
    %928 = arith.divf %926, %927 : vector<2x32xf32>
    %929 = vector.extract_strided_slice %909 {offsets = [0, 64], sizes = [2, 32], strides = [1, 1]} : vector<2x96xf32> to vector<2x32xf32>
    %930 = vector.extract_strided_slice %912 {offsets = [0, 64], sizes = [2, 32], strides = [1, 1]} : vector<2x96xf32> to vector<2x32xf32>
    %931 = arith.mulf %920, %930 : vector<2x32xf32>
    %932 = arith.addf %929, %931 : vector<2x32xf32>
    %933 = math.tanh %932 : vector<2x32xf32>
    %cst_150 = arith.constant 1.000000e+00 : f32
    %934 = vector.broadcast %cst_150 : f32 to vector<2x32xf32>
    %935 = arith.subf %934, %928 : vector<2x32xf32>
    %936 = arith.mulf %935, %933 : vector<2x32xf32>
    %937 = arith.mulf %928, %884 : vector<2x32xf32>
    %938 = arith.addf %936, %937 : vector<2x32xf32>
    %939 = arith.truncf %938 : vector<2x32xf32> to vector<2x32xbf16>
    %cst_151 = arith.constant dense<0.000000e+00> : vector<2x32xf32>
    %940 = tpu.matmul %939, %9, %cst_151 {dimension_numbers = #tpu.dot_dimension_numbers<[1], [0], [0], [1], [0, 0, 1, 1], [], []>} : vector<2x32xbf16>, vector<32x32xbf16>, vector<2x32xf32> -> vector<2x32xf32>
    %941 = vector.shape_cast %939 : vector<2x32xbf16> to vector<2x1x32xbf16>
    "tpu.trace_start"() <{level = 10 : i32, message = "bqk,bsk->bqs"}> : () -> ()
    %cst_152 = arith.constant dense<0.000000e+00> : vector<2x1x8xf32>
    %942 = tpu.matmul %941, %524, %cst_152 {dimension_numbers = #tpu.dot_dimension_numbers<[2], [2], [1], [1], [0, 0, 0, 1, 1, 1], [0], [0]>} : vector<2x1x32xbf16>, vector<2x8x32xbf16>, vector<2x1x8xf32> -> vector<2x1x8xf32>
    "tpu.trace_stop"() : () -> ()
    %943 = vector.shape_cast %942 : vector<2x1x8xf32> to vector<2x8xf32>
    %944 = arith.addf %943, %36 : vector<2x8xf32>
    %cst_153 = arith.constant dense<0xFF800000> : vector<2xf32>
    %945 = vector.multi_reduction <maximumf>, %944, %cst_153 [1] : vector<2x8xf32> to vector<2xf32>
    %946 = vector.shape_cast %945 : vector<2xf32> to vector<2x1xf32>
    %947 = vector.broadcast %946 : vector<2x1xf32> to vector<2x8xf32>
    %948 = arith.subf %944, %947 : vector<2x8xf32>
    %949 = math.exp %948 : vector<2x8xf32>
    %cst_154 = arith.constant dense<0.000000e+00> : vector<2xf32>
    %950 = vector.multi_reduction <add>, %949, %cst_154 [1] : vector<2x8xf32> to vector<2xf32>
    %951 = vector.shape_cast %950 : vector<2xf32> to vector<2x1xf32>
    %952 = tpu.reciprocal %951 : vector<2x1xf32> -> vector<2x1xf32>
    %953 = vector.broadcast %952 : vector<2x1xf32> to vector<2x8xf32>
    %954 = arith.mulf %949, %953 : vector<2x8xf32>
    %955 = vector.shape_cast %954 : vector<2x8xf32> to vector<2x1x8xf32>
    %956 = arith.truncf %955 : vector<2x1x8xf32> to vector<2x1x8xbf16>
    "tpu.trace_start"() <{level = 10 : i32, message = "bqs,bsk->bqk"}> : () -> ()
    %cst_155 = arith.constant dense<0.000000e+00> : vector<2x1x32xf32>
    %957 = tpu.matmul %956, %528, %cst_155 {dimension_numbers = #tpu.dot_dimension_numbers<[2], [1], [1], [2], [0, 0, 0, 1, 1, 2], [0], [0]>} : vector<2x1x8xbf16>, vector<2x8x32xbf16>, vector<2x1x32xf32> -> vector<2x1x32xf32>
    "tpu.trace_stop"() : () -> ()
    %958 = vector.shape_cast %957 : vector<2x1x32xf32> to vector<2x32xf32>
    %959 = arith.addf %958, %940 : vector<2x32xf32>
    %960 = arith.addf %959, %25 : vector<2x32xf32>
    %961 = math.tanh %960 : vector<2x32xf32>
    %962 = vector.shape_cast %583 : vector<2x32xf32> to vector<1x2x32xf32>
    %963 = vector.shape_cast %637 : vector<2x32xf32> to vector<1x2x32xf32>
    %964 = vector.shape_cast %691 : vector<2x32xf32> to vector<1x2x32xf32>
    %965 = vector.shape_cast %745 : vector<2x32xf32> to vector<1x2x32xf32>
    %966 = vector.shape_cast %799 : vector<2x32xf32> to vector<1x2x32xf32>
    %967 = vector.shape_cast %853 : vector<2x32xf32> to vector<1x2x32xf32>
    %968 = vector.shape_cast %907 : vector<2x32xf32> to vector<1x2x32xf32>
    %969 = vector.shape_cast %961 : vector<2x32xf32> to vector<1x2x32xf32>
    %970 = tpu.concatenate %962, %963, %964, %965, %966, %967, %968, %969 in 0 : vector<1x2x32xf32>, vector<1x2x32xf32>, vector<1x2x32xf32>, vector<1x2x32xf32>, vector<1x2x32xf32>, vector<1x2x32xf32>, vector<1x2x32xf32>, vector<1x2x32xf32> -> vector<8x2x32xf32>
    %c0_156 = arith.constant 0 : index
    %c0_157 = arith.constant 0 : index
    %c0_158 = arith.constant 0 : index
    %971 = vector.load %arg6[%c0_156, %c0_157, %c0_158] : memref<8x2x32xf32, #tpu.memory_space<vmem>>, vector<8x2x32xf32>
    tpu.vector_store %arg6[%c0_156, %c0_157, %c0_158], %970 {strides = array<i32>} : memref<8x2x32xf32, #tpu.memory_space<vmem>>, vector<8x2x32xf32>,
    %972 = vector.shape_cast %576 : vector<2x8xf32> to vector<1x2x8xf32>
    %973 = vector.shape_cast %630 : vector<2x8xf32> to vector<1x2x8xf32>
    %974 = vector.shape_cast %684 : vector<2x8xf32> to vector<1x2x8xf32>
    %975 = vector.shape_cast %738 : vector<2x8xf32> to vector<1x2x8xf32>
    %976 = vector.shape_cast %792 : vector<2x8xf32> to vector<1x2x8xf32>
    %977 = vector.shape_cast %846 : vector<2x8xf32> to vector<1x2x8xf32>
    %978 = vector.shape_cast %900 : vector<2x8xf32> to vector<1x2x8xf32>
    %979 = vector.shape_cast %954 : vector<2x8xf32> to vector<1x2x8xf32>
    %980 = tpu.concatenate %972, %973, %974, %975, %976, %977, %978, %979 in 0 : vector<1x2x8xf32>, vector<1x2x8xf32>, vector<1x2x8xf32>, vector<1x2x8xf32>, vector<1x2x8xf32>, vector<1x2x8xf32>, vector<1x2x8xf32>, vector<1x2x8xf32> -> vector<8x2x8xf32>
    %c0_159 = arith.constant 0 : index
    %c0_160 = arith.constant 0 : index
    %c0_161 = arith.constant 0 : index
    %981 = vector.load %arg7[%c0_159, %c0_160, %c0_161] : memref<8x2x8xf32, #tpu.memory_space<vmem>>, vector<8x2x8xf32>
    tpu.vector_store %arg7[%c0_159, %c0_160, %c0_161], %980 {strides = array<i32>} : memref<8x2x8xf32, #tpu.memory_space<vmem>>, vector<8x2x8xf32>,
    %982 = vector.shape_cast %938 : vector<2x32xf32> to vector<1x2x32xf32>
    %c0_162 = arith.constant 0 : index
    %c0_163 = arith.constant 0 : index
    %c0_164 = arith.constant 0 : index
    %983 = vector.load %arg8[%c0_162, %c0_163, %c0_164] : memref<1x2x32xf32, #tpu.memory_space<vmem>>, vector<1x2x32xf32>
    tpu.vector_store %arg8[%c0_162, %c0_163, %c0_164], %982 {strides = array<i32>} : memref<1x2x32xf32, #tpu.memory_space<vmem>>, vector<1x2x32xf32>,
    return
  }
}

</mosaic_0001>

<bundles_post_ra>
// kernel: nmt_forward.1
= control target key start
LH: loop header
LB: loop body
LE: loop exit
PB: predicated region body
PF: predicated region fallthrough
CT: control target
= control target key end

     0   :  { %14 = vsyncpa [#allocation3], 0  ;;  %v6488_v1 = vmov 0.0   ;;  %vm6489_vm0 = vmmov 0   ;;  %vm125_vm1 = vcmask 261120   ;;  %s7836_s0 = inlined_call_operand.vmem [shape: f32[64,32], index: 0, kind: input, shape index: {}]   ;;  %s7837_s1 = inlined_call_operand.vmem [shape: f32[13,2,1], index: 1, kind: input, shape index: {}]   ;;  %s7838_s2 = inlined_call_operand.vmem [shape: bf16[192,96], index: 2, kind: input, shape index: {}]   ;;  %s7839_s3 = inlined_call_operand.vmem [shape: bf16[128,32], index: 3, kind: input, shape index: {}]   ;;  %s7840_s4 = inlined_call_operand.vmem [shape: f32[8,96], index: 4, kind: input, shape index: {}]   ;;  %s7841_s5 = inlined_call_operand.vmem [shape: f32[2,1], index: 5, kind: output, shape index: {0}]   ;;  %s7842_s6 = inlined_call_operand.hbm [shape: f32[8,2,32], index: 6, kind: output, shape index: {1}]   ;;  %s7843_s7 = inlined_call_operand.hbm [shape: f32[8,2,8], index: 7, kind: output, shape index: {2}]   ;;  %s7844_s8 = inlined_call_operand.hbm [shape: f32[1,2,32], index: 8, kind: output, shape index: {3}]  }
   0x1   :  { %v6185_v0 = vld [vmem:[%s7838_s2 + $0x20] sm:$0xff]   ;;  %5699 = vmatprep.subr.bf16.mxu1 %v6488_v1  ;;  %v6186_v2 = vld [vmem:[%s7838_s2 + $0x28] sm:$0xff]   ;;  %5691 = vmatprep.subr.bf16.mxu0 %v6488_v1  ;;  %v87_v4 = vld [vmem:[%s7836_s0 + $0x10] sm:$0xff] }
   0x2   :  { %5700 = vmatpush3.bf16.msra.mxu1 %v6185_v0  ;;  %5703 = vmatprep.mubr.msk.bf16.mxu1 %vm6489_vm0, %v6488_v1  ;;  %v86_v3 = vld [vmem:[%s7836_s0 + $0x8] sm:$0xff]  ;;  %v6189_v6 = vld [vmem:[%s7838_s2] sm:$0xff]   ;;  %v93_v9 = vld [vmem:[%s7836_s0 + $0x30] sm:$0x3] }
   0x3   :  { %5701 = vmatprep.subr.bf16.mxu1 %v6488_v1  ;;  %5695 = vmatprep.mubr.msk.bf16.mxu0 %vm6489_vm0, %v6488_v1  ;;  %v88_v5 = vpack.c.bf16 %v87_v4, %v86_v3  ;;  %v6187_v7 = vld [vmem:[%s7839_s3] sm:$0xff]   ;;  %v6188_v8 = vld [vmem:[%s7839_s3 + $0x8] sm:$0xff]   ;;  %v94_v10 = vpack.c.bf16 %v93_v9, %v93_v9 }
   0x4   :  { %5692 = vmatpush3.bf16.msra.mxu0 %v6189_v6 }
   0x5   :  { %5693 = vmatprep.subr.bf16.mxu0 %v6488_v1 }
   0x6   :  { %5702 = vmatpush3.bf16.msra.mxu1 %v6186_v2 }
   0x7   :  { %5715 = vmatprep.subr.bf16.mxu1 %v6488_v1 }
   0x9   :  { %5704 = vmatmul.mubr.msk.bf16.vlgmr.msra.gmra.mrb[0].mxu1 %vm125_vm1, %v88_v5 }
   0xa   :  { %5716 = vmatpush3.bf16.msra.mxu1 %v6187_v7  ;;  %5719 = vmatprep.mubr.msk.bf16.mxu1 %vm6489_vm0, %v6488_v1 }
   0xb   :  { %5717 = vmatprep.subr.bf16.mxu1 %v6488_v1 }
   0xe   :  { %5718 = vmatpush3.bf16.msra.mxu1 %v6188_v8 }
   0xf   :  { %5731 = vmatprep.subr.bf16.mxu1 %v6488_v1 }
  0x10   :  { %15 = vsyncpa [#allocation5], 0  ;;  %v6190_v11 = vld [vmem:[%s7838_s2 + $0x8] sm:$0xff]   ;;  %v84_v12 = vld [vmem:[%s7836_s0] sm:$0xff]  ;;  %v68_v21 = vlaneseq  ;;  %v6490_v50 = vmov 1983009808  }
  0x11   :  { %5720 = vmatmul.mubr.msk.bf16.vlgmr.msra.gmra.mrb[4].mxu1 %vm125_vm1, %v94_v10  ;;  %5694 = vmatpush3.bf16.msra.mxu0 %v6190_v11  ;;  %v85_v13 = vpack.c.bf16 %v84_v12, %v84_v12  ;;  %v6191_v14 = vld [vmem:[%s7838_s2 + $0x40] sm:$0xff]   ;;  %v6192_v15 = vld [vmem:[%s7838_s2 + $0x48] sm:$0xff]   ;;  %v89_v16 = vld [vmem:[%s7836_s0 + $0x18] sm:$0xff]  ;;  %v172_v51 = vunpack.c.l.s4 %v6490_v50  ;;  %s6491_s19 = smov 64   ;;  %v6492_v11 = vmov 0   ;;  %s6493_s22 = smov 96  }
  0x12   :  { %5735 = vmatprep.mubr.msk.bf16.mxu1 %vm6489_vm0, %v6488_v1  ;;  %5707 = vmatprep.subr.bf16.mxu0 %v6488_v1  ;;  %v90_v17 = vld [vmem:[%s7836_s0 + $0x20] sm:$0xff]  ;;  %v6613_v19 = vld [vmem:[%s7838_s2 + $0x10] sm:$0xff]   ;;  %v6621_v20 = vld [vmem:[%s7838_s2 + $0x18] sm:$0xff]   ;;  %v6631_v22 = vshrl.u32 %v68_v21, 7  ;;  %s6494_s23 = smov 32   ;;  %vm2018_vm2 = vcmask 1040384  }
  0x13   :  { %v91_v18 = vpack.c.bf16 %v90_v17, %v89_v16  ;;  %5732 = vmatpush3.bf16.msra.mxu1 %v6613_v19  ;;  %v6637_v24 = vld [vmem:[%s7840_s4] sm:$0xff]  ;;  %v92_v31 = vld [vmem:[%s7836_s0 + $0x28] sm:$0x3]  ;;  %v173_v53 = vunpack.c.0.s8 %v172_v51  ;;  %6183 = vset.pattern.permute.xlu0 %v6492_v11  ;;  %vm2021_vm3 = vcmask 1041408   ;;  %vm2024_vm4 = vcmask 1042432   ;;  %s6496_s20 = smov [#allocation4]  }
  0x14   :  { %5696 = vmatmul.mubr.msk.bf16.vlgmr.msra.gmra.mrb[0].mxu0 %vm125_vm1, %v85_v13  ;;  %5733 = vmatprep.subr.bf16.mxu1 %v6488_v1  ;;  %v193_v23 = vsub.s32 2, %v6631_v22  ;;  %v297_v43 = vsub.s32 4, %v6631_v22  ;;  %v70_v52 = vsub.s32 1, %v6631_v22  ;;  %v6681_v62 = vsub.s32 0, %v6631_v22  ;;  %v96_v10 = vld [vmem:[%s7837_s1] sm:$0x3] }
  0x15   :  { %5708 = vmatpush3.bf16.msra.mxu0 %v6191_v14  ;;  %5711 = vmatprep.mubr.msk.bf16.mxu0 %vm6489_vm0, %v6488_v1  ;;  %v6675_v56 = vsub.s32 %v173_v53, %v6631_v22  ;;  %vm2027_vm5 = vcmask 1043456   ;;  %vm2030_vm6 = vcmask 1044480   ;;  %vm2033_vm7 = vcmask 1045504   ;;  %s5373_s21 = sshll.u32 %s6496_s20, 4  ;;  %s5374_s21 = int_to_ptr.vmem [resolvable:$true] %s5373_s21 }
  0x16   :  { %5709 = vmatprep.subr.bf16.mxu0 %v6488_v1  ;;  %v6642_v26 = vrot.slane %v6637_v24, %v193_v23  ;;  %v6663_v44 = vrot.slane %v6637_v24, %v297_v43  ;;  %v6672_v54 = vrot.slane %v6637_v24, %v70_v52  ;;  %v112_v63 = vrot.slane %v6637_v24, %v6681_v62  ;;  %s6418_s24 = scalar_lea.vmem %s5374_s21, 256  ;;  %p6423_p1 = scmp.lt.s32.totalorder %s5374_s21, %s5374_s21 }
  0x17   :  { %5734 = vmatpush3.bf16.msra.mxu1 %v6621_v20  ;;  %6184 = vset.pattern.permute.xlu1 %v6492_v11  ;;  %vm2036_vm8 = vcmask 1046528   ;;  %vm2526_vm9 = vcmask 1041409   ;;  %vm2529_vm10 = vcmask 58368   ;;  %vm2560_vm11 = vcmask 64512   ;;  %p6419_p0 = scmp.ne.s32.totalorder %s5374_s21, %s6418_s24  ;;  %p6424_p2 = scmp.lt.s32.totalorder %s6418_s24, %s6418_s24 }
  0x18   :  { %5747 = vmatprep.subr.bf16.mxu1 %v6488_v1  ;;  %vm901_vm12 = vcmask 254976   ;;  %vm912_vm13 = vcmask 1024  }
  0x19   :  { %5710 = vmatpush3.bf16.msra.mxu0 %v6192_v15  ;;  %p6425_p3 = por %p6424_p2, %p6423_p1 }
  0x1a   :  { %5723 = vmatprep.subr.bf16.mxu0 %v6488_v1 }
  0x1b   :  { %p6426_p4 = pnand %p6425_p3, %p6419_p0 }
  0x1c   :  { %5712 = vmatmul.mubr.msk.bf16.vlgmr.msra.gmra.mrb[4].mxu0 %vm125_vm1, %v91_v18 }
  0x1d   :  { %5724 = vmatpush3.bf16.msra.mxu0 %v6613_v19  ;;  %5727 = vmatprep.mubr.msk.bf16.mxu0 %vm6489_vm0, %v6488_v1 }
  0x1e   :  { %5725 = vmatprep.subr.bf16.mxu0 %v6488_v1 }
  0x21   :  { %5726 = vmatpush3.bf16.msra.mxu0 %v6621_v20 }
  0x22   :  { %5739 = vmatprep.subr.bf16.mxu0 %v6488_v1 }
  0xdc   :  { %v6639_v25 = vpop.f32.mrb[0].mxu1 }
  0xdd   :  { %v5705_v27 = vpop.f32.mrb[1].mxu1 }
  0xde   :  { %v247_v28 = vpop.f32.mrb[2].mxu1 }
  0xdf   :  { %v6645_v29 = vadd.f32 %v247_v28, %v6642_v26  ;;  %v5706_v30 = vpop.f32.mrb[3].mxu1 }
  0xe4   :  { %v448_v32 = vpop.f32.mrb[4].mxu1 }
  0xe5   :  { %v454_v33 = vadd.f32 %v448_v32, %v92_v31  ;;  %v5721_v34 = vpop.f32.mrb[5].mxu1 }
  0xe6   :  { %v451_v35 = vpop.f32.mrb[6].mxu1 }
  0xe7   :  { %6205 = vtanh.f32 %v454_v33  ;;  %v5722_v36 = vpop.f32.mrb[7].mxu1  ;;  %v163_v39 = vpop.f32.mrb[0].mxu0 }
  0xe8   :  { %v5697_v40 = vpop.f32.mrb[1].mxu0  ;;  %v6685_v0 = vadd.f32 %v163_v39, %v112_v63 }
  0xe9   :  { %v166_v41 = vpop.f32.mrb[2].mxu0 }
  0xea   :  { %v5698_v42 = vpop.f32.mrb[3].mxu0  ;;  %v177_v2 = vrot.slane %v6685_v0, %v6675_v56 }
  0xef   :  { %v6665_v45 = vpop.f32.mrb[4].mxu0 }
  0xf0   :  { %v5713_v46 = vpop.f32.mrb[5].mxu0 }
  0xf1   :  { %v6650_v37 = vpop.eup %6205  ;;  %v351_v47 = vpop.f32.mrb[6].mxu0 }
  0xf2   :  { %v456_v38 = vpack.c.bf16 %v6650_v37, %v6650_v37  ;;  %v6668_v48 = vadd.f32 %v351_v47, %v6663_v44  ;;  %v5714_v49 = vpop.f32.mrb[7].mxu0  ;;  %v550_v15 = vrot.slane %v6650_v37, %v6675_v56 }
  0xf4   :  { %5728 = vmatmul.mubr.msk.bf16.vlgmr.msra.gmra.mrb[8].mxu0 %vm125_vm1, %v456_v38 }
  0xf5   :  { %5740 = vmatpush3.bf16.msra.mxu0 %v6613_v19  ;;  %5743 = vmatprep.mubr.msk.bf16.mxu0 %vm6489_vm0, %v6488_v1 }
  0xf6   :  { %5741 = vmatprep.subr.bf16.mxu0 %v6488_v1 }
  0xf9   :  { %5742 = vmatpush3.bf16.msra.mxu0 %v6621_v20 }
  0xfa   :  { %5755 = vmatprep.subr.bf16.mxu0 %v6488_v1 }
 0x1c7   :  { %v506_v55 = vpop.f32.mrb[8].mxu0 }
 0x1c8   :  { %v507_v57 = vadd.f32 %v506_v55, %v6672_v54  ;;  %v5729_v58 = vpop.f32.mrb[9].mxu0 }
 0x1c9   :  { %v509_v59 = vpop.f32.mrb[10].mxu0 }
 0x1ca   :  { %v5730_v60 = vpop.f32.mrb[11].mxu0  ;;  %v526_v61 = vrot.slane %v507_v57, %v6675_v56  ;;  %v512_v3 = vadd.f32 %v507_v57, %v177_v2  ;;  %v97_v57 = vld [vmem:[%s7837_s1 + $0x2] sm:$0x3] }
 0x1cc   :  { %527 = vrot.lane.b32.xlu0 %v526_v61, %s6491_s19  ;;  %v5418_v4 = vmul.f32 -1.442695, %v512_v3 }
 0x1ce   :  { %6207 = vpow2.f32 %v5418_v4 }
 0x1d8   :  { %v6208_v5 = vpop.eup %6207 }
 0x1d9   :  { %v516_v6 = vadd.f32 1.0, %v6208_v5 }
 0x1db   :  { %6209 = vrcp.f32 %v516_v6 }
 0x1e5   :  { %v6210_v7 = vpop.eup %6209 }
 0x1e6   :  { %v537_v17 = vsub.f32 1.0, %v6210_v7 }
 0x23e   :  { %v528_v8 = vpop.permute.xlu0 %527 }
 0x23f   :  { %v530_v9 = vmul.f32 %v6210_v7, %v528_v8 }
 0x241   :  { %532 = vrot.lane.b32.xlu0 %v530_v9, %s6491_s19  ;;  %v6726_v9 = vld [vmem:[%s7838_s2 + $0x30] sm:$0xff]  }
 0x245   :  { %559 = vperm.xlu0 %6183, %v96_v10  }
 0x2b3   :  { %v533_v12 = vpop.permute.xlu0 %532 }
 0x2b4   :  { %v535_v13 = vadd.f32 %v533_v12, %v177_v2  ;;  %v6735_v12 = vld [vmem:[%s7838_s2 + $0x38] sm:$0xff]  }
 0x2b6   :  { %6211 = vtanh.f32 %v535_v13 }
 0x2c0   :  { %v6212_v14 = vpop.eup %6211 }
 0x2c1   :  { %539 = vrot.lane.b32.xlu1 %v6212_v14, %s6493_s22 }
 0x2c4   :  { %v560_v31 = vpop.permute.xlu0 %559 }
 0x2c5   :  { %551 = vrot.lane.b32.xlu1 %v550_v15, %s6494_s23 }
 0x333   :  { %v540_v16 = vpop.permute.xlu1 %539 }
 0x334   :  { %v542_v21 = vmul.f32 %v540_v16, %v537_v17  ;;  %v74_v16 = vsub.s32 3, %v6631_v22 }
 0x337   :  { %v552_v18 = vpop.permute.xlu1 %551 }
 0x338   :  { %v554_v23 = vmul.f32 %v6210_v7, %v552_v18 }
 0x33a   :  { %v555_v27 = vadd.f32 %v554_v23, %v542_v21  ;;  %v6754_v21 = vrot.slane %v6637_v24, %v74_v16  ;;  %v6767_v24 = vadd.f32 %v6639_v25, %v6642_v26 }
 0x33c   :  { %v556_v28 = vsub.f32 %v555_v27, %v552_v18 }
 0x33e   :  { %v569_v30 = vrot.slane %v556_v28, %v6675_v56 }
 0x340   :  { %570 = vrot.lane.b32.xlu1 %v569_v30, %s6493_s22 }
 0x3b2   :  { %v571_v32 = vpop.permute.xlu1 %570 }
 0x3b3   :  { %v573_v33 = vmul.f32 %v571_v32, %v560_v31 }
 0x3b5   :  { %v574_v34 = vadd.f32 %v6650_v37, %v573_v33  ;;  %v170_v33 = vcombine.high %v6685_v0, %v6685_v0 }
 0x3b7   :  { %v575_v35 = vpack.c.bf16 %v574_v34, %v574_v34  ;;  %v657_v51 = vrot.slane %v574_v34, %v6675_v56 }
 0x3b9   :  { %5736 = vmatmul.mubr.msk.bf16.vlgmr.msra.gmra.mrb[8].mxu1 %vm125_vm1, %v575_v35 }
 0x3ba   :  { %5748 = vmatpush3.bf16.msra.mxu1 %v6613_v19  ;;  %5751 = vmatprep.mubr.msk.bf16.mxu1 %vm6489_vm0, %v6488_v1  ;;  %v185_v19 = vcombine.high %v177_v2, %v177_v2 }
 0x3bb   :  { %5749 = vmatprep.subr.bf16.mxu1 %v6488_v1 }
 0x3be   :  { %5750 = vmatpush3.bf16.msra.mxu1 %v6621_v20 }
 0x3bf   :  { %5763 = vmatprep.subr.bf16.mxu1 %v6488_v1 }
 0x48c   :  { %v613_v36 = vpop.f32.mrb[8].mxu1 }
 0x48d   :  { %v614_v38 = vadd.f32 %v613_v36, %v6672_v54  ;;  %v5737_v39 = vpop.f32.mrb[9].mxu1 }
 0x48e   :  { %v616_v40 = vpop.f32.mrb[10].mxu1 }
 0x48f   :  { %v633_v37 = vrot.slane %v614_v38, %v6675_v56  ;;  %v5738_v41 = vpop.f32.mrb[11].mxu1  ;;  %v619_v42 = vadd.f32 %v614_v38, %v185_v19  ;;  %v6771_v38 = vrot.slane %v6767_v24, %v6675_v56 }
 0x491   :  { %634 = vrot.lane.b32.xlu1 %v633_v37, %s6491_s19  ;;  %v5420_v43 = vmul.f32 -1.442695, %v619_v42 }
 0x493   :  { %6213 = vpow2.f32 %v5420_v43 }
 0x49d   :  { %v6214_v46 = vpop.eup %6213 }
 0x49e   :  { %v623_v47 = vadd.f32 1.0, %v6214_v46 }
 0x4a0   :  { %6215 = vrcp.f32 %v623_v47 }
 0x4aa   :  { %v6216_v20 = vpop.eup %6215 }
 0x4ab   :  { %v644_v59 = vsub.f32 1.0, %v6216_v20 }
 0x503   :  { %v635_v49 = vpop.permute.xlu1 %634 }
 0x504   :  { %v637_v50 = vmul.f32 %v6216_v20, %v635_v49  ;;  %v98_v49 = vld [vmem:[%s7837_s1 + $0x4] sm:$0x3] }
 0x506   :  { %639 = vrot.lane.b32.xlu0 %v637_v50, %s6491_s19  ;;  %v100_v50 = vld [vmem:[%s7837_s1 + $0x8] sm:$0x3] }
 0x50a   :  { %658 = vrot.lane.b32.xlu0 %v657_v51, %s6494_s23 }
 0x578   :  { %v640_v52 = vpop.permute.xlu0 %639 }
 0x579   :  { %v642_v53 = vadd.f32 %v640_v52, %v185_v19 }
 0x57b   :  { %6217 = vtanh.f32 %v642_v53 }
 0x57c   :  { %v659_v58 = vpop.permute.xlu0 %658 }
 0x57d   :  { %v661_v61 = vmul.f32 %v6216_v20, %v659_v58 }
 0x585   :  { %v6218_v55 = vpop.eup %6217 }
 0x586   :  { %646 = vrot.lane.b32.xlu1 %v6218_v55, %s6493_s22 }
 0x58a   :  { %666 = vperm.xlu1 %6184, %v97_v57  }
 0x5f8   :  { %v647_v60 = vpop.permute.xlu1 %646 }
 0x5f9   :  { %v649_v63 = vmul.f32 %v647_v60, %v644_v59 }
 0x5fb   :  { %v662_v2 = vadd.f32 %v661_v61, %v649_v63 }
 0x5fd   :  { %v663_v3 = vsub.f32 %v662_v2, %v659_v58 }
 0x5ff   :  { %v676_v4 = vrot.slane %v663_v3, %v6675_v56 }
 0x601   :  { %677 = vrot.lane.b32.xlu0 %v676_v4, %s6493_s22 }
 0x609   :  { %v667_v5 = vpop.permute.xlu1 %666 }
 0x673   :  { %v678_v6 = vpop.permute.xlu0 %677 }
 0x674   :  { %v680_v7 = vmul.f32 %v678_v6, %v667_v5 }
 0x676   :  { %v6721_v8 = vadd.f32 %v680_v7, %v574_v34  ;;  %v6762_v34 = vrot.slane %v170_v33, %v6675_v56 }
 0x678   :  { %v682_v10 = vpack.c.bf16 %v6721_v8, %v6721_v8  ;;  %v764_v20 = vrot.slane %v6721_v8, %v6675_v56 }
 0x67a   :  { %5744 = vmatmul.mubr.msk.bf16.vlgmr.msra.gmra.mrb[12].mxu0 %vm125_vm1, %v682_v10 }
 0x67b   :  { %5756 = vmatpush3.bf16.msra.mxu0 %v6726_v9  ;;  %5759 = vmatprep.mubr.msk.bf16.mxu0 %vm6489_vm0, %v6488_v1 }
 0x67c   :  { %5757 = vmatprep.subr.bf16.mxu0 %v6488_v1 }
 0x67f   :  { %5758 = vmatpush3.bf16.msra.mxu0 %v6735_v12 }
 0x680   :  { %5771 = vmatprep.subr.bf16.mxu0 %v6488_v1 }
 0x682   :  { %5760 = vmatmul.mubr.bf16.vlgmr.msra.gmra.mrb[16].mxu0 %v6492_v11 }
 0x683   :  { %5772 = vmatpush3.bf16.msra.mxu0 %v6726_v9  ;;  %5775 = vmatprep.mubr.msk.bf16.mxu0 %vm6489_vm0, %v6488_v1 }
 0x684   :  { %5773 = vmatprep.subr.bf16.mxu0 %v6488_v1 }
 0x687   :  { %5774 = vmatpush3.bf16.msra.mxu0 %v6735_v12 }
 0x688   :  { %5787 = vmatprep.subr.bf16.mxu0 %v6488_v1 }
 0x74d   :  { %v720_v13 = vpop.f32.mrb[12].mxu0 }
 0x74e   :  { %v721_v14 = vadd.f32 %v720_v13, %v6672_v54  ;;  %v5745_v15 = vpop.f32.mrb[13].mxu0 }
 0x74f   :  { %v723_v17 = vpop.f32.mrb[14].mxu0 }
 0x750   :  { %v740_v11 = vrot.slane %v721_v14, %v6675_v56  ;;  %v5746_v18 = vpop.f32.mrb[15].mxu0  ;;  %v726_v35 = vadd.f32 %v721_v14, %v6762_v34 }
 0x752   :  { %741 = vrot.lane.b32.xlu1 %v740_v11, %s6491_s19  ;;  %v5422_v36 = vmul.f32 -1.442695, %v726_v35 }
 0x754   :  { %6219 = vpow2.f32 %v5422_v36 }
 0x755   :  { %v963_v23 = vpop.f32.mrb[16].mxu0 }
 0x756   :  { %v964_v27 = vadd.f32 %v963_v23, %v6754_v21  ;;  %v5761_v28 = vpop.f32.mrb[17].mxu0 }
 0x757   :  { %v966_v30 = vpop.f32.mrb[18].mxu0 }
 0x758   :  { %v983_v31 = vrot.slane %v964_v27, %v6675_v56  ;;  %v5762_v32 = vpop.f32.mrb[19].mxu0  ;;  %v969_v39 = vadd.f32 %v964_v27, %v6771_v38 }
 0x75a   :  { %984 = vrot.lane.b32.xlu0 %v983_v31, %s6491_s19  ;;  %v5428_v40 = vmul.f32 -1.442695, %v969_v39 }
 0x75c   :  { %6221 = vpow2.f32 %v5428_v40 }
 0x75e   :  { %v6220_v0 = vpop.eup %6219 }
 0x75f   :  { %v730_v37 = vadd.f32 1.0, %v6220_v0 }
 0x761   :  { %6223 = vrcp.f32 %v730_v37 }
 0x766   :  { %v6222_v41 = vpop.eup %6221 }
 0x767   :  { %v973_v19 = vadd.f32 1.0, %v6222_v41 }
 0x769   :  { %6225 = vrcp.f32 %v973_v19  ;;  %v268_v19 = vcombine.high %v6771_v38, %v6771_v38 }
 0x76b   :  { %v6224_v42 = vpop.eup %6223 }
 0x76c   :  { %v751_v60 = vsub.f32 1.0, %v6224_v42 }
 0x773   :  { %v6226_v26 = vpop.eup %6225 }
 0x774   :  { %v994_v5 = vsub.f32 1.0, %v6226_v26  ;;  %v1000_v10 = vmul.f32 0.0, %v6226_v26 }
 0x7c4   :  { %v742_v43 = vpop.permute.xlu1 %741 }
 0x7c5   :  { %v744_v25 = vmul.f32 %v6224_v42, %v742_v43 }
 0x7c7   :  { %746 = vrot.lane.b32.xlu1 %v744_v25, %s6491_s19 }
 0x7cc   :  { %v985_v46 = vpop.permute.xlu0 %984 }
 0x7cd   :  { %v987_v47 = vmul.f32 %v6226_v26, %v985_v46 }
 0x7cf   :  { %989 = vrot.lane.b32.xlu0 %v987_v47, %s6491_s19 }
 0x7d3   :  { %765 = vrot.lane.b32.xlu0 %v764_v20, %s6494_s23 }
 0x7d7   :  { %773 = vperm.xlu0 %6183, %v98_v49  }
 0x7db   :  { %1004 = vperm.xlu0 %6183, %v100_v50  }
 0x839   :  { %v747_v51 = vpop.permute.xlu1 %746 }
 0x83a   :  { %v749_v52 = vadd.f32 %v747_v51, %v6762_v34 }
 0x83c   :  { %6227 = vtanh.f32 %v749_v52  ;;  %v101_v52 = vld [vmem:[%s7837_s1 + $0xa] sm:$0x3] }
 0x841   :  { %v990_v53 = vpop.permute.xlu0 %989 }
 0x842   :  { %v992_v55 = vadd.f32 %v990_v53, %v6771_v38 }
 0x844   :  { %6229 = vtanh.f32 %v992_v55 }
 0x845   :  { %v766_v59 = vpop.permute.xlu0 %765 }
 0x846   :  { %v6228_v57 = vpop.eup %6227  ;;  %v768_v63 = vmul.f32 %v6224_v42, %v766_v59 }
 0x847   :  { %753 = vrot.lane.b32.xlu1 %v6228_v57, %s6493_s22 }
 0x84e   :  { %v6230_v58 = vpop.eup %6229 }
 0x84f   :  { %996 = vrot.lane.b32.xlu1 %v6230_v58, %s6493_s22 }
 0x856   :  { %v774_v16 = vpop.permute.xlu0 %773 }
 0x85a   :  { %v1005_v28 = vpop.permute.xlu0 %1004 }
 0x8b9   :  { %v754_v61 = vpop.permute.xlu1 %753 }
 0x8ba   :  { %v756_v2 = vmul.f32 %v754_v61, %v751_v60 }
 0x8bc   :  { %v769_v3 = vadd.f32 %v768_v63, %v756_v2 }
 0x8be   :  { %v770_v4 = vsub.f32 %v769_v3, %v766_v59 }
 0x8c0   :  { %v783_v6 = vrot.slane %v770_v4, %v6675_v56 }
 0x8c1   :  { %v997_v7 = vpop.permute.xlu1 %996 }
 0x8c2   :  { %v999_v13 = vmul.f32 %v997_v7, %v994_v5  ;;  %784 = vrot.lane.b32.xlu1 %v783_v6, %s6493_s22 }
 0x8c4   :  { %v1001_v14 = vadd.f32 %v1000_v10, %v999_v13 }
 0x8c6   :  { %v1014_v15 = vrot.slane %v1001_v14, %v6675_v56 }
 0x8c8   :  { %1015 = vrot.lane.b32.xlu1 %v1014_v15, %s6493_s22 }
 0x934   :  { %v785_v17 = vpop.permute.xlu1 %784 }
 0x935   :  { %v787_v11 = vmul.f32 %v785_v17, %v774_v16  ;;  %v253_v17 = vcombine.high %v6767_v24, %v6767_v24 }
 0x937   :  { %v6794_v18 = vadd.f32 %v787_v11, %v6721_v8  ;;  %v267_v11 = vrot.slane %v253_v17, %v6675_v56 }
 0x939   :  { %v789_v23 = vpack.c.bf16 %v6794_v18, %v6794_v18 }
 0x93a   :  { %v1016_v27 = vpop.permute.xlu1 %1015 }
 0x93b   :  { %5752 = vmatmul.mubr.msk.bf16.vlgmr.msra.gmra.mrb[12].mxu1 %vm125_vm1, %v789_v23  ;;  %v6802_v30 = vmul.f32 %v1016_v27, %v1005_v28 }
 0x93c   :  { %5764 = vmatpush3.bf16.msra.mxu1 %v6726_v9  ;;  %5767 = vmatprep.mubr.msk.bf16.mxu1 %vm6489_vm0, %v6488_v1 }
 0x93d   :  { %5765 = vmatprep.subr.bf16.mxu1 %v6488_v1  ;;  %v1020_v8 = vpack.c.bf16 %v6802_v30, %v6802_v30  ;;  %v1102_v49 = vrot.slane %v6802_v30, %v6675_v56 }
 0x940   :  { %5766 = vmatpush3.bf16.msra.mxu1 %v6735_v12 }
 0x941   :  { %5779 = vmatprep.subr.bf16.mxu1 %v6488_v1 }
 0x943   :  { %5768 = vmatmul.mubr.msk.bf16.vlgmr.msra.gmra.mrb[16].mxu1 %vm125_vm1, %v1020_v8 }
 0x944   :  { %5780 = vmatpush3.bf16.msra.mxu1 %v6726_v9  ;;  %5783 = vmatprep.mubr.msk.bf16.mxu1 %vm6489_vm0, %v6488_v1 }
 0x945   :  { %5781 = vmatprep.subr.bf16.mxu1 %v6488_v1 }
 0x948   :  { %5782 = vmatpush3.bf16.msra.mxu1 %v6735_v12 }
 0x949   :  { %5795 = vmatprep.subr.bf16.mxu1 %v6488_v1 }
 0xa0e   :  { %v6816_v31 = vpop.f32.mrb[12].mxu1 }
 0xa0f   :  { %v5753_v32 = vpop.f32.mrb[13].mxu1 }
 0xa10   :  { %v830_v33 = vpop.f32.mrb[14].mxu1 }
 0xa11   :  { %v5754_v35 = vpop.f32.mrb[15].mxu1 }
 0xa16   :  { %v1058_v36 = vpop.f32.mrb[16].mxu1 }
 0xa17   :  { %v1059_v39 = vadd.f32 %v1058_v36, %v6754_v21  ;;  %v5769_v40 = vpop.f32.mrb[17].mxu1 }
 0xa18   :  { %v1061_v0 = vpop.f32.mrb[18].mxu1 }
 0xa19   :  { %v1078_v37 = vrot.slane %v1059_v39, %v6675_v56  ;;  %v5770_v41 = vpop.f32.mrb[19].mxu1  ;;  %v1064_v42 = vadd.f32 %v1059_v39, %v268_v19  ;;  %v102_v0 = vld [vmem:[%s7837_s1 + $0xc] sm:$0x3] }
 0xa1b   :  { %1079 = vrot.lane.b32.xlu0 %v1078_v37, %s6491_s19  ;;  %v5430_v43 = vmul.f32 -1.442695, %v1064_v42 }
 0xa1d   :  { %6231 = vpow2.f32 %v5430_v43 }
 0xa27   :  { %v6232_v25 = vpop.eup %6231 }
 0xa28   :  { %v1068_v26 = vadd.f32 1.0, %v6232_v25 }
 0xa2a   :  { %6233 = vrcp.f32 %v1068_v26 }
 0xa34   :  { %v6234_v46 = vpop.eup %6233 }
 0xa35   :  { %v1089_v55 = vsub.f32 1.0, %v6234_v46 }
 0xa8d   :  { %v1080_v47 = vpop.permute.xlu0 %1079 }
 0xa8e   :  { %v1082_v20 = vmul.f32 %v6234_v46, %v1080_v47 }
 0xa90   :  { %1084 = vrot.lane.b32.xlu1 %v1082_v20, %s6491_s19 }
 0xa94   :  { %1103 = vrot.lane.b32.xlu1 %v1102_v49, %s6494_s23 }
 0xb02   :  { %v1085_v50 = vpop.permute.xlu1 %1084 }
 0xb03   :  { %v1087_v51 = vadd.f32 %v1085_v50, %v268_v19 }
 0xb05   :  { %6235 = vtanh.f32 %v1087_v51 }
 0xb06   :  { %v1104_v53 = vpop.permute.xlu1 %1103 }
 0xb07   :  { %v1106_v58 = vmul.f32 %v6234_v46, %v1104_v53 }
 0xb0f   :  { %v6236_v38 = vpop.eup %6235 }
 0xb10   :  { %1091 = vrot.lane.b32.xlu0 %v6236_v38, %s6493_s22 }
 0xb14   :  { %1111 = vperm.xlu0 %6183, %v101_v52  }
 0xb82   :  { %v1092_v57 = vpop.permute.xlu0 %1091 }
 0xb83   :  { %v1094_v59 = vmul.f32 %v1092_v57, %v1089_v55 }
 0xb85   :  { %v1107_v60 = vadd.f32 %v1106_v58, %v1094_v59  ;;  %v269_v59 = vcombine.high %v267_v11, %v267_v11 }
 0xb87   :  { %v1108_v61 = vsub.f32 %v1107_v60, %v1104_v53 }
 0xb89   :  { %v1121_v63 = vrot.slane %v1108_v61, %v6675_v56 }
 0xb8b   :  { %1122 = vrot.lane.b32.xlu1 %v1121_v63, %s6493_s22 }
 0xb93   :  { %v1112_v2 = vpop.permute.xlu0 %1111 }
 0xbfd   :  { %v1123_v3 = vpop.permute.xlu1 %1122 }
 0xbfe   :  { %v1125_v4 = vmul.f32 %v1123_v3, %v1112_v2 }
 0xc00   :  { %v6834_v5 = vadd.f32 %v1125_v4, %v6802_v30 }
 0xc02   :  { %v1127_v6 = vpack.c.bf16 %v6834_v5, %v6834_v5  ;;  %v1209_v36 = vrot.slane %v6834_v5, %v6675_v56 }
 0xc04   :  { %5776 = vmatmul.mubr.msk.bf16.vlgmr.msra.gmra.mrb[20].mxu0 %vm125_vm1, %v1127_v6 }
 0xc05   :  { %5788 = vmatpush3.bf16.msra.mxu0 %v6726_v9  ;;  %5791 = vmatprep.mubr.msk.bf16.mxu0 %vm6489_vm0, %v6488_v1 }
 0xc06   :  { %5789 = vmatprep.subr.bf16.mxu0 %v6488_v1 }
 0xc09   :  { %5790 = vmatpush3.bf16.msra.mxu0 %v6735_v12 }
 0xc0a   :  { %5803 = vmatprep.subr.bf16.mxu0 %v6488_v1 }
 0xcd7   :  { %v1165_v7 = vpop.f32.mrb[20].mxu0 }
 0xcd8   :  { %v1166_v10 = vadd.f32 %v1165_v7, %v6754_v21  ;;  %v5777_v13 = vpop.f32.mrb[21].mxu0 }
 0xcd9   :  { %v1168_v14 = vpop.f32.mrb[22].mxu0 }
 0xcda   :  { %v1185_v15 = vrot.slane %v1166_v10, %v6675_v56  ;;  %v5778_v16 = vpop.f32.mrb[23].mxu0  ;;  %v1171_v23 = vadd.f32 %v1166_v10, %v267_v11 }
 0xcdc   :  { %1186 = vrot.lane.b32.xlu0 %v1185_v15, %s6491_s19  ;;  %v5432_v27 = vmul.f32 -1.442695, %v1171_v23  ;;  %v103_v15 = vld [vmem:[%s7837_s1 + $0xe] sm:$0x3] }
 0xcde   :  { %6237 = vpow2.f32 %v5432_v27 }
 0xce8   :  { %v6238_v28 = vpop.eup %6237 }
 0xce9   :  { %v1175_v8 = vadd.f32 1.0, %v6238_v28 }
 0xceb   :  { %6239 = vrcp.f32 %v1175_v8 }
 0xcf5   :  { %v6240_v32 = vpop.eup %6239 }
 0xcf6   :  { %v1196_v41 = vsub.f32 1.0, %v6240_v32 }
 0xd4e   :  { %v1187_v33 = vpop.permute.xlu0 %1186 }
 0xd4f   :  { %v1189_v35 = vmul.f32 %v6240_v32, %v1187_v33 }
 0xd51   :  { %1191 = vrot.lane.b32.xlu1 %v1189_v35, %s6491_s19 }
 0xd55   :  { %1210 = vrot.lane.b32.xlu1 %v1209_v36, %s6494_s23 }
 0xdc3   :  { %v1192_v39 = vpop.permute.xlu1 %1191 }
 0xdc4   :  { %v1194_v24 = vadd.f32 %v1192_v39, %v267_v11 }
 0xdc6   :  { %6241 = vtanh.f32 %v1194_v24 }
 0xdc7   :  { %v1211_v37 = vpop.permute.xlu1 %1210 }
 0xdc8   :  { %v1213_v42 = vmul.f32 %v6240_v32, %v1211_v37 }
 0xdd0   :  { %v6242_v40 = vpop.eup %6241 }
 0xdd1   :  { %1198 = vrot.lane.b32.xlu0 %v6242_v40, %s6493_s22 }
 0xdd5   :  { %1218 = vperm.xlu0 %6183, %v102_v0  }
 0xe43   :  { %v1199_v19 = vpop.permute.xlu0 %1198 }
 0xe44   :  { %v1201_v43 = vmul.f32 %v1199_v19, %v1196_v41 }
 0xe46   :  { %v1214_v25 = vadd.f32 %v1213_v42, %v1201_v43  ;;  %v277_v43 = vrot.slane %v6645_v29, %v6675_v56 }
 0xe48   :  { %v1215_v26 = vsub.f32 %v1214_v25, %v1211_v37 }
 0xe4a   :  { %v1228_v46 = vrot.slane %v1215_v26, %v6675_v56 }
 0xe4c   :  { %1229 = vrot.lane.b32.xlu1 %v1228_v46, %s6493_s22 }
 0xe54   :  { %v1219_v47 = vpop.permute.xlu0 %1218 }
 0xebe   :  { %v1230_v20 = vpop.permute.xlu1 %1229 }
 0xebf   :  { %v1232_v49 = vmul.f32 %v1230_v20, %v1219_v47 }
 0xec1   :  { %v6862_v50 = vadd.f32 %v1232_v49, %v6834_v5 }
 0xec3   :  { %v1234_v51 = vpack.c.bf16 %v6862_v50, %v6862_v50  ;;  %v1316_v7 = vrot.slane %v6862_v50, %v6675_v56 }
 0xec5   :  { %5784 = vmatmul.mubr.msk.bf16.vlgmr.msra.gmra.mrb[20].mxu1 %vm125_vm1, %v1234_v51 }
 0xec6   :  { %5796 = vmatpush3.bf16.msra.mxu1 %v6726_v9  ;;  %5799 = vmatprep.mubr.msk.bf16.mxu1 %vm6489_vm0, %v6488_v1 }
 0xec7   :  { %5797 = vmatprep.subr.bf16.mxu1 %v6488_v1 }
 0xeca   :  { %5798 = vmatpush3.bf16.msra.mxu1 %v6735_v12 }
 0xecb   :  { %5811 = vmatprep.subr.bf16.mxu1 %v6488_v1 }
 0xf98   :  { %v1272_v38 = vpop.f32.mrb[20].mxu1 }
 0xf99   :  { %v1273_v52 = vadd.f32 %v1272_v38, %v6754_v21  ;;  %v5785_v53 = vpop.f32.mrb[21].mxu1 }
 0xf9a   :  { %v1275_v55 = vpop.f32.mrb[22].mxu1 }
 0xf9b   :  { %v1292_v57 = vrot.slane %v1273_v52, %v6675_v56  ;;  %v5786_v58 = vpop.f32.mrb[23].mxu1  ;;  %v1278_v60 = vadd.f32 %v1273_v52, %v269_v59 }
 0xf9d   :  { %1293 = vrot.lane.b32.xlu0 %v1292_v57, %s6491_s19  ;;  %v5434_v61 = vmul.f32 -1.442695, %v1278_v60  ;;  %v104_v57 = vld [vmem:[%s7837_s1 + $0x10] sm:$0x3] }
 0xf9f   :  { %6243 = vpow2.f32 %v5434_v61 }
 0xfa9   :  { %v6244_v63 = vpop.eup %6243 }
 0xfaa   :  { %v1282_v2 = vadd.f32 1.0, %v6244_v63 }
 0xfac   :  { %6245 = vrcp.f32 %v1282_v2 }
 0xfb6   :  { %v6246_v3 = vpop.eup %6245 }
 0xfb7   :  { %v1303_v17 = vsub.f32 1.0, %v6246_v3 }
0x100f   :  { %v1294_v4 = vpop.permute.xlu0 %1293 }
0x1010   :  { %v1296_v6 = vmul.f32 %v6246_v3, %v1294_v4 }
0x1012   :  { %1298 = vrot.lane.b32.xlu1 %v1296_v6, %s6491_s19 }
0x1016   :  { %1317 = vrot.lane.b32.xlu1 %v1316_v7, %s6494_s23 }
0x1084   :  { %v1299_v10 = vpop.permute.xlu1 %1298 }
0x1085   :  { %v1301_v13 = vadd.f32 %v1299_v10, %v269_v59 }
0x1087   :  { %6247 = vtanh.f32 %v1301_v13 }
0x1088   :  { %v1318_v16 = vpop.permute.xlu1 %1317 }
0x1089   :  { %v1320_v23 = vmul.f32 %v6246_v3, %v1318_v16 }
0x1091   :  { %v6248_v14 = vpop.eup %6247 }
0x1092   :  { %1305 = vrot.lane.b32.xlu0 %v6248_v14, %s6493_s22 }
0x1096   :  { %1325 = vperm.xlu0 %6183, %v103_v15  }
0x1104   :  { %v1306_v11 = vpop.permute.xlu0 %1305 }
0x1105   :  { %v1308_v27 = vmul.f32 %v1306_v11, %v1303_v17 }
0x1107   :  { %v1321_v28 = vadd.f32 %v1320_v23, %v1308_v27 }
0x1109   :  { %v1322_v8 = vsub.f32 %v1321_v28, %v1318_v16 }
0x110b   :  { %v1335_v32 = vrot.slane %v1322_v8, %v6675_v56 }
0x110d   :  { %1336 = vrot.lane.b32.xlu1 %v1335_v32, %s6493_s22 }
0x1115   :  { %v1326_v33 = vpop.permute.xlu0 %1325 }
0x117f   :  { %v1337_v35 = vpop.permute.xlu1 %1336 }
0x1180   :  { %v1339_v36 = vmul.f32 %v1337_v35, %v1326_v33 }
0x1182   :  { %v6887_v39 = vadd.f32 %v1339_v36, %v6862_v50 }
0x1184   :  { %v1341_v24 = vpack.c.bf16 %v6887_v39, %v6887_v39  ;;  %v1423_v38 = vrot.slane %v6887_v39, %v6675_v56 }
0x1186   :  { %5792 = vmatmul.mubr.msk.bf16.vlgmr.msra.gmra.mrb[24].mxu0 %vm125_vm1, %v1341_v24 }
0x1187   :  { %5804 = vmatpush3.bf16.msra.mxu0 %v6726_v9  ;;  %5807 = vmatprep.mubr.msk.bf16.mxu0 %vm6489_vm0, %v6488_v1 }
0x1188   :  { %5805 = vmatprep.subr.bf16.mxu0 %v6488_v1 }
0x118b   :  { %5806 = vmatpush3.bf16.msra.mxu0 %v6735_v12 }
0x118c   :  { %5819 = vmatprep.subr.bf16.mxu0 %v6488_v1 }
0x1259   :  { %v1379_v40 = vpop.f32.mrb[24].mxu0 }
0x125a   :  { %v1380_v0 = vadd.f32 %v1379_v40, %v6754_v21  ;;  %v5793_v37 = vpop.f32.mrb[25].mxu0 }
0x125b   :  { %v1382_v41 = vpop.f32.mrb[26].mxu0 }
0x125c   :  { %v1399_v19 = vrot.slane %v1380_v0, %v6675_v56  ;;  %v5794_v42 = vpop.f32.mrb[27].mxu0  ;;  %v1385_v25 = vadd.f32 %v1380_v0, %v277_v43  ;;  %v105_v41 = vld [vmem:[%s7837_s1 + $0x12] sm:$0x3] }
0x125e   :  { %1400 = vrot.lane.b32.xlu0 %v1399_v19, %s6491_s19  ;;  %v5436_v26 = vmul.f32 -1.442695, %v1385_v25 }
0x1260   :  { %6249 = vpow2.f32 %v5436_v26 }
0x126a   :  { %v6250_v46 = vpop.eup %6249 }
0x126b   :  { %v1389_v47 = vadd.f32 1.0, %v6250_v46 }
0x126d   :  { %6251 = vrcp.f32 %v1389_v47 }
0x1277   :  { %v6252_v20 = vpop.eup %6251 }
0x1278   :  { %v1410_v59 = vsub.f32 1.0, %v6252_v20 }
0x12d0   :  { %v1401_v49 = vpop.permute.xlu0 %1400 }
0x12d1   :  { %v1403_v51 = vmul.f32 %v6252_v20, %v1401_v49 }
0x12d3   :  { %1405 = vrot.lane.b32.xlu1 %v1403_v51, %s6491_s19 }
0x12d7   :  { %1424 = vrot.lane.b32.xlu1 %v1423_v38, %s6494_s23 }
0x1345   :  { %v1406_v52 = vpop.permute.xlu1 %1405 }
0x1346   :  { %v1408_v53 = vadd.f32 %v1406_v52, %v277_v43 }
0x1348   :  { %6253 = vtanh.f32 %v1408_v53 }
0x1349   :  { %v1425_v58 = vpop.permute.xlu1 %1424 }
0x134a   :  { %v1427_v61 = vmul.f32 %v6252_v20, %v1425_v58 }
0x1352   :  { %v6254_v55 = vpop.eup %6253 }
0x1353   :  { %1412 = vrot.lane.b32.xlu0 %v6254_v55, %s6493_s22 }
0x1357   :  { %1432 = vperm.xlu0 %6183, %v104_v57  }
0x13c5   :  { %v1413_v60 = vpop.permute.xlu0 %1412 }
0x13c6   :  { %v1415_v63 = vmul.f32 %v1413_v60, %v1410_v59 }
0x13c8   :  { %v1428_v2 = vadd.f32 %v1427_v61, %v1415_v63  ;;  %v270_v63 = vcombine.high %v6645_v29, %v6645_v29 }
0x13ca   :  { %v1429_v3 = vsub.f32 %v1428_v2, %v1425_v58  ;;  %v284_v2 = vrot.slane %v270_v63, %v6675_v56 }
0x13cc   :  { %v1442_v4 = vrot.slane %v1429_v3, %v6675_v56 }
0x13ce   :  { %1443 = vrot.lane.b32.xlu1 %v1442_v4, %s6493_s22 }
0x13d6   :  { %v1433_v6 = vpop.permute.xlu0 %1432 }
0x1440   :  { %v1444_v7 = vpop.permute.xlu1 %1443 }
0x1441   :  { %v1446_v10 = vmul.f32 %v1444_v7, %v1433_v6 }
0x1443   :  { %v6914_v13 = vadd.f32 %v1446_v10, %v6887_v39 }
0x1445   :  { %v1448_v14 = vpack.c.bf16 %v6914_v13, %v6914_v13  ;;  %v1530_v24 = vrot.slane %v6914_v13, %v6675_v56 }
0x1447   :  { %5800 = vmatmul.mubr.msk.bf16.vlgmr.msra.gmra.mrb[24].mxu1 %vm125_vm1, %v1448_v14 }
0x1448   :  { %5812 = vmatpush3.bf16.msra.mxu1 %v6726_v9  ;;  %5815 = vmatprep.mubr.msk.bf16.mxu1 %vm6489_vm0, %v6488_v1  ;;  %v285_v9 = vcombine.high %v277_v43, %v277_v43 }
0x1449   :  { %5813 = vmatprep.subr.bf16.mxu1 %v6488_v1 }
0x144c   :  { %5814 = vmatpush3.bf16.msra.mxu1 %v6735_v12 }
0x144d   :  { %5827 = vmatprep.subr.bf16.mxu1 %v6488_v1 }
0x151a   :  { %v1486_v15 = vpop.f32.mrb[24].mxu1 }
0x151b   :  { %v1487_v16 = vadd.f32 %v1486_v15, %v6754_v21  ;;  %v5801_v17 = vpop.f32.mrb[25].mxu1 }
0x151c   :  { %v1489_v11 = vpop.f32.mrb[26].mxu1 }
0x151d   :  { %v1506_v23 = vrot.slane %v1487_v16, %v6675_v56  ;;  %v5802_v27 = vpop.f32.mrb[27].mxu1  ;;  %v1492_v28 = vadd.f32 %v1487_v16, %v285_v9 }
0x151f   :  { %1507 = vrot.lane.b32.xlu0 %v1506_v23, %s6491_s19  ;;  %v5438_v8 = vmul.f32 -1.442695, %v1492_v28  ;;  %v106_v23 = vld [vmem:[%s7837_s1 + $0x14] sm:$0x3] }
0x1521   :  { %6255 = vpow2.f32 %v5438_v8 }
0x152b   :  { %v6256_v32 = vpop.eup %6255 }
0x152c   :  { %v1496_v33 = vadd.f32 1.0, %v6256_v32 }
0x152e   :  { %6257 = vrcp.f32 %v1496_v33 }
0x1538   :  { %v6258_v12 = vpop.eup %6257 }
0x1539   :  { %v1517_v42 = vsub.f32 1.0, %v6258_v12 }
0x1591   :  { %v1508_v35 = vpop.permute.xlu0 %1507 }
0x1592   :  { %v1510_v36 = vmul.f32 %v6258_v12, %v1508_v35  ;;  %v828_v35 = vadd.f32 %v6816_v31, %v6672_v54 }
0x1594   :  { %1512 = vrot.lane.b32.xlu1 %v1510_v36, %s6491_s19 }
0x1598   :  { %1531 = vrot.lane.b32.xlu1 %v1530_v24, %s6494_s23  ;;  %v847_v24 = vrot.slane %v828_v35, %v6675_v56 }
0x1606   :  { %v1513_v40 = vpop.permute.xlu1 %1512 }
0x1607   :  { %v1515_v0 = vadd.f32 %v1513_v40, %v285_v9  ;;  %v186_v40 = vcombine.high %v6762_v34, %v6762_v34 }
0x1609   :  { %6259 = vtanh.f32 %v1515_v0  ;;  %v833_v0 = vadd.f32 %v828_v35, %v186_v40  ;;  %v6198_v35 = vld [vmem:[%s7839_s3 + $0x18] sm:$0xff]  }
0x160a   :  { %v1532_v19 = vpop.permute.xlu1 %1531 }
0x160b   :  { %v1534_v25 = vmul.f32 %v6258_v12, %v1532_v19 }
0x1613   :  { %v6260_v37 = vpop.eup %6259 }
0x1614   :  { %1519 = vrot.lane.b32.xlu0 %v6260_v37, %s6493_s22  ;;  %v5424_v37 = vmul.f32 -1.442695, %v833_v0 }
0x1618   :  { %1539 = vperm.xlu0 %6183, %v105_v41  }
0x1686   :  { %v1520_v43 = vpop.permute.xlu0 %1519 }
0x1687   :  { %v1522_v26 = vmul.f32 %v1520_v43, %v1517_v42 }
0x1689   :  { %v1535_v46 = vadd.f32 %v1534_v25, %v1522_v26 }
0x168b   :  { %v1536_v47 = vsub.f32 %v1535_v46, %v1532_v19 }
0x168d   :  { %v1549_v20 = vrot.slane %v1536_v47, %v6675_v56 }
0x168f   :  { %1550 = vrot.lane.b32.xlu1 %v1549_v20, %s6493_s22  ;;  %v871_v20 = vrot.slane %v6794_v18, %v6675_v56 }
0x1697   :  { %v1540_v49 = vpop.permute.xlu0 %1539 }
0x1701   :  { %v1551_v51 = vpop.permute.xlu1 %1550 }
0x1702   :  { %v1553_v38 = vmul.f32 %v1551_v51, %v1540_v49 }
0x1704   :  { %v6939_v52 = vadd.f32 %v1553_v38, %v6914_v13 }
0x1706   :  { %v1555_v53 = vpack.c.bf16 %v6939_v52, %v6939_v52  ;;  %v1637_v16 = vrot.slane %v6939_v52, %v6675_v56 }
0x1708   :  { %5808 = vmatmul.mubr.msk.bf16.vlgmr.msra.gmra.mrb[28].mxu0 %vm125_vm1, %v1555_v53 }
0x1709   :  { %5823 = vmatprep.mubr.msk.bf16.mxu0 %vm6489_vm0, %v6488_v1 }
0x17db   :  { %v1593_v55 = vpop.f32.mrb[28].mxu0 }
0x17dc   :  { %v1594_v57 = vadd.f32 %v1593_v55, %v6754_v21  ;;  %v5809_v58 = vpop.f32.mrb[29].mxu0 }
0x17dd   :  { %v1596_v59 = vpop.f32.mrb[30].mxu0  ;;  %v286_v58 = vcombine.high %v284_v2, %v284_v2 }
0x17de   :  { %v1613_v60 = vrot.slane %v1594_v57, %v6675_v56  ;;  %v5810_v61 = vpop.f32.mrb[31].mxu0  ;;  %v1599_v3 = vadd.f32 %v1594_v57, %v284_v2 }
0x17e0   :  { %1614 = vrot.lane.b32.xlu0 %v1613_v60, %s6491_s19  ;;  %v5440_v4 = vmul.f32 -1.442695, %v1599_v3 }
0x17e2   :  { %6261 = vpow2.f32 %v5440_v4 }
0x17ec   :  { %v6262_v6 = vpop.eup %6261 }
0x17ed   :  { %v1603_v7 = vadd.f32 1.0, %v6262_v6 }
0x17ef   :  { %6263 = vrcp.f32 %v1603_v7 }
0x17f9   :  { %v6264_v10 = vpop.eup %6263 }
0x17fa   :  { %v1624_v9 = vsub.f32 1.0, %v6264_v10 }
0x1852   :  { %v1615_v14 = vpop.permute.xlu0 %1614 }
0x1853   :  { %v1617_v15 = vmul.f32 %v6264_v10, %v1615_v14 }
0x1855   :  { %1619 = vrot.lane.b32.xlu1 %v1617_v15, %s6491_s19 }
0x1859   :  { %1638 = vrot.lane.b32.xlu1 %v1637_v16, %s6494_s23  ;;  %v107_v16 = vld [vmem:[%s7837_s1 + $0x16] sm:$0x3] }
0x18c7   :  { %v1620_v17 = vpop.permute.xlu1 %1619 }
0x18c8   :  { %v1622_v29 = vadd.f32 %v1620_v17, %v284_v2  ;;  %v99_v17 = vld [vmem:[%s7837_s1 + $0x6] sm:$0x3] }
0x18ca   :  { %6265 = vtanh.f32 %v1622_v29 }
0x18cb   :  { %v1639_v27 = vpop.permute.xlu1 %1638  ;;  %6267 = vpow2.f32 %v5424_v37 }
0x18cc   :  { %v1641_v8 = vmul.f32 %v6264_v10, %v1639_v27 }
0x18d4   :  { %v6266_v11 = vpop.eup %6265 }
0x18d5   :  { %1626 = vrot.lane.b32.xlu0 %v6266_v11, %s6493_s22  ;;  %v6268_v41 = vpop.eup %6267 }
0x18d6   :  { %v837_v19 = vadd.f32 1.0, %v6268_v41 }
0x18d8   :  { %6269 = vrcp.f32 %v837_v19 }
0x18d9   :  { %1646 = vperm.xlu0 %6183, %v106_v23  }
0x18e2   :  { %v6270_v25 = vpop.eup %6269 }
0x1947   :  { %v1627_v28 = vpop.permute.xlu0 %1626 }
0x1948   :  { %v1629_v32 = vmul.f32 %v1627_v28, %v1624_v9 }
0x194a   :  { %v1642_v33 = vadd.f32 %v1641_v8, %v1629_v32 }
0x194c   :  { %v1643_v12 = vsub.f32 %v1642_v33, %v1639_v27  ;;  %v6197_v27 = vld [vmem:[%s7839_s3 + $0x10] sm:$0xff]   ;;  %v858_v33 = vsub.f32 1.0, %v6270_v25 }
0x194d   :  { %5820 = vmatpush3.bf16.msra.mxu0 %v6197_v27 }
0x194e   :  { %v1656_v36 = vrot.slane %v1643_v12, %v6675_v56  ;;  %5821 = vmatprep.subr.bf16.mxu0 %v6488_v1 }
0x1950   :  { %1657 = vrot.lane.b32.xlu1 %v1656_v36, %s6493_s22 }
0x1951   :  { %5822 = vmatpush3.bf16.msra.mxu0 %v6198_v35 }
0x1952   :  { %5835 = vmatprep.subr.bf16.mxu0 %v6488_v1 }
0x1954   :  { %848 = vrot.lane.b32.xlu1 %v847_v24, %s6491_s19 }
0x1958   :  { %v1647_v42 = vpop.permute.xlu0 %1646 }
0x19c2   :  { %v1658_v43 = vpop.permute.xlu1 %1657 }
0x19c3   :  { %v1660_v54 = vmul.f32 %v1658_v43, %v1647_v42  ;;  %v6495_v42 = vmov 1966171168  }
0x19c4   :  { %v1770_v43 = vunpack.c.l.s4 %v6495_v42 }
0x19c5   :  { %v6969_v31 = vadd.f32 %v1660_v54, %v6939_v52 }
0x19c6   :  { %v849_v26 = vpop.permute.xlu1 %848  ;;  %v1771_v54 = vunpack.c.0.s8 %v1770_v43 }
0x19c7   :  { %v1662_v46 = vpack.c.bf16 %v6969_v31, %v6969_v31  ;;  %v851_v47 = vmul.f32 %v6270_v25, %v849_v26  ;;  %v1744_v34 = vrot.slane %v6969_v31, %v6675_v56 }
0x19c9   :  { %5816 = vmatmul.mubr.msk.bf16.vlgmr.msra.gmra.mrb[28].mxu1 %vm125_vm1, %v1662_v46  ;;  %853 = vrot.lane.b32.xlu1 %v851_v47, %s6491_s19 }
0x19ca   :  { %5831 = vmatprep.mubr.msk.bf16.mxu1 %vm6489_vm0, %v6488_v1  ;;  %5828 = vmatpush3.bf16.msra.mxu1 %v6197_v27 }
0x19cb   :  { %5829 = vmatprep.subr.bf16.mxu1 %v6488_v1 }
0x19cd   :  { %1745 = vrot.lane.b32.xlu1 %v1744_v34, %s6494_s23 }
0x19ce   :  { %5830 = vmatpush3.bf16.msra.mxu1 %v6198_v35 }
0x19cf   :  { %5843 = vmatprep.subr.bf16.mxu1 %v6488_v1 }
0x19d1   :  { %872 = vrot.lane.b32.xlu1 %v871_v20, %s6494_s23 }
0x1a9c   :  { %v1700_v49 = vpop.f32.mrb[28].mxu1 }
0x1a9d   :  { %v1701_v51 = vadd.f32 %v1700_v49, %v6754_v21  ;;  %v5817_v38 = vpop.f32.mrb[29].mxu1  ;;  %v854_v21 = vpop.permute.xlu1 %853 }
0x1a9e   :  { %v1703_v53 = vpop.f32.mrb[30].mxu1  ;;  %v856_v14 = vadd.f32 %v854_v21, %v186_v40 }
0x1a9f   :  { %v1720_v55 = vrot.slane %v1701_v51, %v6675_v56  ;;  %v5818_v57 = vpop.f32.mrb[31].mxu1  ;;  %v1706_v59 = vadd.f32 %v1701_v51, %v286_v58 }
0x1aa1   :  { %1721 = vrot.lane.b32.xlu0 %v1720_v55, %s6491_s19  ;;  %v5442_v60 = vmul.f32 -1.442695, %v1706_v59  ;;  %v1746_v29 = vpop.permute.xlu1 %1745 }
0x1aa3   :  { %6271 = vpow2.f32 %v5442_v60 }
0x1aa5   :  { %v873_v8 = vpop.permute.xlu1 %872 }
0x1aa6   :  { %v875_v36 = vmul.f32 %v6270_v25, %v873_v8  ;;  %v7010_v25 = vsub.s32 %v1771_v54, %v6631_v22 }
0x1aa8   :  { %v1799_v26 = vrot.slane %v6834_v5, %v7010_v25  ;;  %v1775_v46 = vrot.slane %v6802_v30, %v7010_v25  ;;  %v1821_v34 = vrot.slane %v6862_v50, %v7010_v25  ;;  %v1843_v20 = vrot.slane %v6887_v39, %v7010_v25 }
0x1aa9   :  { %v1865_v51 = vrot.slane %v6914_v13, %v7010_v25  ;;  %v1887_v5 = vrot.slane %v6939_v52, %v7010_v25  ;;  %v1909_v50 = vrot.slane %v6969_v31, %v7010_v25 }
0x1aaa   :  { %v1800_v47 = vcombine.high %v1799_v26, %v1799_v26  ;;  %v1807_v49 = vrot.slane %v1799_v26, %v7010_v25  ;;  %v1776_v38 = vcombine.high %v1775_v46, %v1775_v46  ;;  %v1822_v55 = vcombine.high %v1821_v34, %v1821_v34 }
0x1aab   :  { %v1829_v30 = vrot.slane %v1821_v34, %v7010_v25  ;;  %v1844_v57 = vcombine.high %v1843_v20, %v1843_v20  ;;  %v1783_v39 = vrot.slane %v1775_v46, %v7010_v25  ;;  %v1851_v59 = vrot.slane %v1843_v20, %v7010_v25 }
0x1aac   :  { %v1814_v53 = vrot.slane %v1800_v47, %v7010_v25  ;;  %v1866_v13 = vcombine.high %v1865_v51, %v1865_v51  ;;  %v1790_v60 = vrot.slane %v1776_v38, %v7010_v25  ;;  %v1888_v52 = vcombine.high %v1887_v5, %v1887_v5 }
0x1aad   :  { %v6272_v61 = vpop.eup %6271 }
0x1aae   :  { %v1710_v63 = vadd.f32 1.0, %v6272_v61  ;;  %v1955_v61 = vrot.slane %v1814_v53, %v6681_v62 }
0x1ab0   :  { %6273 = vrcp.f32 %v1710_v63  ;;  %v1836_v63 = vrot.slane %v1822_v55, %v7010_v25 }
0x1aba   :  { %v6274_v3 = vpop.eup %6273 }
0x1abb   :  { %v1731_v11 = vsub.f32 1.0, %v6274_v3  ;;  %v1748_v28 = vmul.f32 %v6274_v3, %v1746_v29 }
0x1b13   :  { %v1722_v4 = vpop.permute.xlu0 %1721 }
0x1b14   :  { %v1724_v6 = vmul.f32 %v6274_v3, %v1722_v4  ;;  %v1961_v3 = vrot.slane %v1829_v30, %v6681_v62  ;;  %v1873_v4 = vrot.slane %v1865_v51, %v7010_v25  ;;  %v6199_v51 = vld [vmem:[%s7839_s3 + $0x20] sm:$0xff]  }
0x1b16   :  { %1726 = vrot.lane.b32.xlu0 %v1724_v6, %s6491_s19  ;;  %v1910_v6 = vcombine.high %v1909_v50, %v1909_v50 }
0x1b88   :  { %v1727_v7 = vpop.permute.xlu0 %1726 }
0x1b89   :  { %v1729_v10 = vadd.f32 %v1727_v7, %v286_v58  ;;  %v1951_v58 = vrot.slane %v1807_v49, %v6681_v62 }
0x1b8b   :  { %6275 = vtanh.f32 %v1729_v10  ;;  %v1858_v10 = vrot.slane %v1844_v57, %v7010_v25 }
0x1b8c   :  { %6277 = vtanh.f32 %v856_v14  ;;  %v1895_v14 = vrot.slane %v1887_v5, %v7010_v25 }
0x1b95   :  { %v6276_v15 = vpop.eup %6275 }
0x1b96   :  { %1733 = vrot.lane.b32.xlu0 %v6276_v15, %s6493_s22  ;;  %v6278_v2 = vpop.eup %6277 }
0x1b9a   :  { %860 = vrot.lane.b32.xlu0 %v6278_v2, %s6493_s22  ;;  %v2019_v2 = vsel %vm2018_vm2, %v1783_v39, %v1951_v58  ;;  %v6200_v39 = vld [vmem:[%s7839_s3 + $0x28] sm:$0xff]  }
0x1b9e   :  { %1753 = vperm.xlu0 %6183, %v107_v16   ;;  %v1971_v16 = vrot.slane %v1851_v59, %v6681_v62  ;;  %v7087_v59 = vld [vmem:[%s7838_s2 + $0x50] sm:$0xff]  }
0x1ba2   :  { %880 = vperm.xlu0 %6183, %v99_v17   ;;  %v1880_v17 = vrot.slane %v1866_v13, %v7010_v25 }
0x1c08   :  { %v1734_v23 = vpop.permute.xlu0 %1733 }
0x1c09   :  { %v1736_v9 = vmul.f32 %v1734_v23, %v1731_v11  ;;  %v2020_v11 = vsel %vm2018_vm2, %v1790_v60, %v1955_v61  ;;  %v1902_v23 = vrot.slane %v1888_v52, %v7010_v25  ;;  %v7099_v60 = vld [vmem:[%s7838_s2 + $0x58] sm:$0xff]  }
0x1c0b   :  { %v1749_v32 = vadd.f32 %v1748_v28, %v1736_v9  ;;  %v1965_v9 = vrot.slane %v1836_v63, %v6681_v62  ;;  %v2022_v28 = vsel %vm2021_vm3, %v2019_v2, %v1961_v3 }
0x1c0c   :  { %v861_v12 = vpop.permute.xlu0 %860 }
0x1c0d   :  { %v1750_v24 = vsub.f32 %v1749_v32, %v1746_v29  ;;  %v863_v40 = vmul.f32 %v861_v12, %v858_v33  ;;  %v1917_v29 = vrot.slane %v1909_v50, %v7010_v25  ;;  %v1924_v32 = vrot.slane %v1910_v6, %v7010_v25 }
0x1c0e   :  { %v1975_v33 = vrot.slane %v1858_v10, %v6681_v62  ;;  %v1991_v12 = vrot.slane %v1895_v14, %v6681_v62 }
0x1c0f   :  { %v876_v0 = vadd.f32 %v875_v36, %v863_v40  ;;  %v1763_v37 = vrot.slane %v1750_v24, %v6675_v56  ;;  %v2025_v36 = vsel %vm2024_vm4, %v2022_v28, %v1971_v16  ;;  %v1985_v24 = vrot.slane %v1880_v17, %v6681_v62 }
0x1c10   :  { %v1995_v40 = vrot.slane %v1902_v23, %v6681_v62  ;;  %v78_v17 = vsub.s32 5, %v6631_v22 }
0x1c11   :  { %v877_v41 = vsub.f32 %v876_v0, %v873_v8  ;;  %1764 = vrot.lane.b32.xlu1 %v1763_v37, %s6493_s22  ;;  %v1981_v8 = vrot.slane %v1873_v4, %v6681_v62 }
0x1c13   :  { %v890_v19 = vrot.slane %v877_v41, %v6675_v56  ;;  %v2023_v41 = vsel %vm2021_vm3, %v2020_v11, %v1965_v9  ;;  %v2028_v42 = vsel %vm2027_vm5, %v2025_v36, %v1981_v8  ;;  %v7128_v8 = vld [vmem:[%s7840_s4] sm:$0xff] }
0x1c14   :  { %v2026_v43 = vsel %vm2024_vm4, %v2023_v41, %v1975_v33  ;;  %v2031_v46 = vsel %vm2030_vm6, %v2028_v42, %v1991_v12 }
0x1c15   :  { %891 = vrot.lane.b32.xlu1 %v890_v19, %s6493_s22  ;;  %v2005_v19 = vrot.slane %v1924_v32, %v6681_v62  ;;  %v2029_v34 = vsel %vm2027_vm5, %v2026_v43, %v1985_v24  ;;  %v7131_v32 = vrot.slane %v7128_v8, %v78_v17 }
0x1c16   :  { %v2032_v38 = vsel %vm2030_vm6, %v2029_v34, %v1995_v40  ;;  %v7138_v40 = vadd.f32 %v6665_v45, %v6663_v44  ;;  %v7153_v34 = vld [vmem:[%s7839_s3 + $0x30] sm:$0xff]  }
0x1c17   :  { %v2035_v5 = vsel %vm2033_vm7, %v2032_v38, %v2005_v19 }
0x1c1d   :  { %v1754_v21 = vpop.permute.xlu0 %1753 }
0x1c21   :  { %v881_v57 = vpop.permute.xlu0 %880 }
0x1c83   :  { %v1765_v7 = vpop.permute.xlu1 %1764 }
0x1c84   :  { %v1767_v15 = vmul.f32 %v1765_v7, %v1754_v21 }
0x1c86   :  { %v1768_v27 = vadd.f32 %v1767_v15, %v6969_v31  ;;  %v2001_v31 = vrot.slane %v1917_v29, %v6681_v62 }
0x1c87   :  { %v892_v55 = vpop.permute.xlu1 %891 }
0x1c88   :  { %v1932_v35 = vrot.slane %v1768_v27, %v7010_v25  ;;  %v2034_v47 = vsel %vm2033_vm7, %v2031_v46, %v2001_v31  ;;  %v894_v58 = vmul.f32 %v892_v55, %v881_v57 }
0x1c8a   :  { %v1933_v0 = vcombine.high %v1932_v35, %v1932_v35  ;;  %v1940_v37 = vrot.slane %v1932_v35, %v7010_v25  ;;  %v7090_v13 = vadd.f32 %v894_v58, %v6794_v18 }
0x1c8c   :  { %v1947_v54 = vrot.slane %v1933_v0, %v7010_v25  ;;  %v2011_v26 = vrot.slane %v1940_v37, %v6681_v62  ;;  %v2235_v18 = vadd.f32 %v1768_v27, %v7090_v13  ;;  %v7142_v0 = vrot.slane %v7138_v40, %v6675_v56 }
0x1c8e   :  { %v2015_v20 = vrot.slane %v1947_v54, %v6681_v62  ;;  %v2037_v49 = vsel %vm2036_vm8, %v2034_v47, %v2011_v26  ;;  %v2236_v61 = vpack.c.bf16 %v2235_v18, %v2235_v18  ;;  %v2330_v46 = vrot.slane %v2235_v18, %v6675_v56 }
0x1c8f   :  { %v2039_v53 = vpack.c.bf16 %v2037_v49, %v2037_v49 }
0x1c90   :  { %v2038_v30 = vsel %vm2036_vm8, %v2035_v5, %v2015_v20  ;;  %v7159_v20 = vld [vmem:[%s7839_s3 + $0x38] sm:$0xff]  }
0x1c91   :  { %5824 = vmatmul.mubr.msk.bf16.vlgmr.msra.gmra.mrb[32].mxu0 %vm125_vm1, %v2039_v53  ;;  %v2040_v50 = vpack.c.bf16 %v2038_v30, %v2038_v30 }
0x1c92   :  { %5836 = vmatpush3.bf16.msra.mxu0 %v6199_v51  ;;  %5839 = vmatprep.mubr.msk.bf16.mxu0 %vm6489_vm0, %v6488_v1 }
0x1c93   :  { %5832 = vmatmul.mubr.msk.bf16.vlgmr.msra.gmra.mrb[32].mxu1 %vm125_vm1, %v2040_v50  ;;  %5837 = vmatprep.subr.bf16.mxu0 %v6488_v1 }
0x1c94   :  { %5844 = vmatpush3.bf16.msra.mxu1 %v6199_v51  ;;  %5847 = vmatprep.mubr.msk.bf16.mxu1 %vm6489_vm0, %v6488_v1 }
0x1c95   :  { %5845 = vmatprep.subr.bf16.mxu1 %v6488_v1 }
0x1c96   :  { %5838 = vmatpush3.bf16.msra.mxu0 %v6200_v39 }
0x1c97   :  { %5851 = vmatprep.subr.bf16.mxu0 %v6488_v1 }
0x1c98   :  { %5846 = vmatpush3.bf16.msra.mxu1 %v6200_v39 }
0x1c99   :  { %5840 = vmatmul.mubr.msk.bf16.vlgmr.msra.gmra.mrb[36].mxu0 %vm125_vm1, %v2039_v53  ;;  %5859 = vmatprep.subr.bf16.mxu1 %v6488_v1 }
0x1c9a   :  { %5852 = vmatpush3.bf16.msra.mxu0 %v7087_v59  ;;  %5855 = vmatprep.mubr.msk.bf16.mxu0 %vm6489_vm0, %v6488_v1 }
0x1c9b   :  { %5848 = vmatmul.mubr.msk.bf16.vlgmr.msra.gmra.mrb[36].mxu1 %vm125_vm1, %v2040_v50  ;;  %5853 = vmatprep.subr.bf16.mxu0 %v6488_v1 }
0x1c9c   :  { %5863 = vmatprep.mubr.msk.bf16.mxu1 %vm6489_vm0, %v6488_v1  ;;  %5860 = vmatpush3.bf16.msra.mxu1 %v7153_v34 }
0x1c9d   :  { %5861 = vmatprep.subr.bf16.mxu1 %v6488_v1 }
0x1c9e   :  { %5854 = vmatpush3.bf16.msra.mxu0 %v7099_v60 }
0x1c9f   :  { %5867 = vmatprep.subr.bf16.mxu0 %v6488_v1 }
0x1ca0   :  { %5862 = vmatpush3.bf16.msra.mxu1 %v7159_v20 }
0x1ca1   :  { %5856 = vmatmul.mubr.msk.bf16.vlgmr.msra.gmra.mrb[40].mxu0 %vm125_vm1, %v2236_v61  ;;  %5873 = vmatprep.subr.bf16.mxu1 %v6488_v1 }
0x1ca2   :  { %5869 = vmatprep.mubr.msk.bf16.mxu0 %vm6489_vm0, %v6488_v1 }
0x1d64   :  { %v2090_v52 = vpop.f32.mrb[32].mxu0 }
0x1d65   :  { %v2139_v63 = vpack.c.bf16 %v2090_v52, %v2090_v52  ;;  %v5825_v3 = vpop.f32.mrb[33].mxu0 }
0x1d66   :  { %v2093_v4 = vpop.f32.mrb[34].mxu0  ;;  %v7113_v6 = vpop.f32.mrb[32].mxu1 }
0x1d67   :  { %v7116_v21 = vsel %vm125_vm1, %v2139_v63, 0  ;;  %v5826_v7 = vpop.f32.mrb[35].mxu0  ;;  %v5833_v10 = vpop.f32.mrb[33].mxu1  ;;  %v2140_v63 = vpack.c.bf16 %v7113_v6, %v7113_v6 }
0x1d68   :  { %v2136_v14 = vpop.f32.mrb[34].mxu1  ;;  %5868 = vmatpush3.bf16.xpose.msra.mxu0 %v7116_v21 }
0x1d69   :  { %v5834_v15 = vpop.f32.mrb[35].mxu1  ;;  %5879 = vmatprep.subr.bf16.mxu0 %v6488_v1  ;;  %v7180_v4 = vsel %vm125_vm1, %v2140_v63, 0 }
0x1d6c   :  { %v7120_v2 = vpop.f32.mrb[36].mxu0 }
0x1d6d   :  { %v5841_v16 = vpop.f32.mrb[37].mxu0  ;;  %v2233_v7 = vpack.c.bf16 %v7120_v2, %v7120_v2 }
0x1d6e   :  { %v2190_v29 = vpop.f32.mrb[38].mxu0  ;;  %v7123_v11 = vpop.f32.mrb[36].mxu1 }
0x1d6f   :  { %v5842_v23 = vpop.f32.mrb[39].mxu0  ;;  %v5849_v27 = vpop.f32.mrb[37].mxu1  ;;  %v2234_v6 = vpack.c.bf16 %v7123_v11, %v7123_v11  ;;  %v7193_v14 = vsel %vm2027_vm5, %v2233_v7, 0  ;;  %v82_v7 = vsub.s32 6, %v6631_v22 }
0x1d70   :  { %v2230_v9 = vpop.f32.mrb[38].mxu1  ;;  %v7213_v23 = vld [vmem:[%s7836_s0 + $0x38] sm:$0x3] }
0x1d71   :  { %v5850_v28 = vpop.f32.mrb[39].mxu1  ;;  %v7200_v16 = vsel %vm2027_vm5, %v2234_v6, 0  ;;  %v7216_v27 = vrot.slane %v7213_v23, 1 }
0x1d74   :  { %v2286_v33 = vpop.f32.mrb[40].mxu0 }
0x1d75   :  { %v2287_v12 = vadd.f32 %v2286_v33, %v7131_v32  ;;  %v5857_v35 = vpop.f32.mrb[41].mxu0 }
0x1d76   :  { %v2289_v36 = vpop.f32.mrb[42].mxu0 }
0x1d77   :  { %v2306_v24 = vrot.slane %v2287_v12, %v6675_v56  ;;  %v5858_v31 = vpop.f32.mrb[43].mxu0  ;;  %v2292_v37 = vadd.f32 %v2287_v12, %v7142_v0 }
0x1d79   :  { %2307 = vrot.lane.b32.xlu0 %v2306_v24, %s6491_s19  ;;  %v5454_v41 = vmul.f32 -1.442695, %v2292_v37 }
0x1d7b   :  { %6279 = vpow2.f32 %v5454_v41 }
0x1d85   :  { %v6280_v19 = vpop.eup %6279 }
0x1d86   :  { %v2296_v42 = vadd.f32 1.0, %v6280_v19 }
0x1d88   :  { %6281 = vrcp.f32 %v2296_v42 }
0x1d92   :  { %v6282_v43 = vpop.eup %6281 }
0x1d93   :  { %v2317_v51 = vsub.f32 1.0, %v6282_v43 }
0x1deb   :  { %v2308_v54 = vpop.permute.xlu0 %2307 }
0x1dec   :  { %v2310_v26 = vmul.f32 %v6282_v43, %v2308_v54 }
0x1dee   :  { %2312 = vrot.lane.b32.xlu1 %v2310_v26, %s6491_s19 }
0x1df2   :  { %2331 = vrot.lane.b32.xlu1 %v2330_v46, %s6494_s23 }
0x1e60   :  { %v2313_v44 = vpop.permute.xlu1 %2312 }
0x1e61   :  { %v2315_v45 = vadd.f32 %v2313_v44, %v7142_v0 }
0x1e63   :  { %6283 = vtanh.f32 %v2315_v45 }
0x1e64   :  { %v2332_v49 = vpop.permute.xlu1 %2331 }
0x1e65   :  { %v2334_v53 = vmul.f32 %v6282_v43, %v2332_v49 }
0x1e6d   :  { %v6284_v47 = vpop.eup %6283 }
0x1e6e   :  { %2319 = vrot.lane.b32.xlu0 %v6284_v47, %s6493_s22 }
0x1ee0   :  { %v2320_v38 = vpop.permute.xlu0 %2319 }
0x1ee1   :  { %v2322_v5 = vmul.f32 %v2320_v38, %v2317_v51 }
0x1ee3   :  { %v7164_v55 = vadd.f32 %v2334_v53, %v2322_v5 }
0x1ee5   :  { %v2336_v30 = vpack.c.bf16 %v7164_v55, %v7164_v55 }
0x1ee7   :  { %2338 = vrot.lane.b32.xlu0 %v2336_v30, %s6493_s22  ;;  %v2401_v50 = vrot.slane %v2336_v30, %v7010_v25 }
0x1ee9   :  { %v2408_v57 = vrot.slane %v2401_v50, %v7010_v25 }
0x1eeb   :  { %v5458_v39 = vpack.i.b16 %v2408_v57, %v2408_v57  ;;  %v2410_v58 = vunpack.i.h.s16 %v2408_v57 }
0x1eed   :  { %v2415_v18 = vrot.slane %v5458_v39, %v6681_v62  ;;  %v2464_v61 = vpack.i.b16 %v2410_v58, %v2410_v58 }
0x1eef   :  { %2416 = vrot.lane.b32.xlu0 %v2415_v18, %s6493_s22  ;;  %v2468_v52 = vrot.slane %v2464_v61, %v6681_v62 }
0x1ef1   :  { %2469 = vrot.lane.b32.xlu1 %v2468_v52, %s6493_s22 }
0x1f59   :  { %v7177_v3 = vpop.permute.xlu0 %2338 }
0x1f5a   :  { %5864 = vmatmul.mubr.msk.bf16.vlgmr.msra.gmra.mrb[40].mxu1 %vm125_vm1, %v7177_v3 }
0x1f5b   :  { %5874 = vmatpush3.bf16.xpose.msra.mxu1 %v7180_v4  ;;  %5875 = vmatprep.mubr.msk.bf16.mxu1 %vm6489_vm0, %v6488_v1 }
0x1f5c   :  { %5885 = vmatprep.subr.bf16.mxu1 %v6488_v1 }
0x1f61   :  { %v2417_v10 = vpop.permute.xlu0 %2416 }
0x1f62   :  { %5870 = vmatmul.mubr.msk.bf16.vlgmr.msra.gmra.mrb[44].mxu0 %vm125_vm1, %v2417_v10 }
0x1f63   :  { %5880 = vmatpush3.bf16.msra.mxu0 %v7193_v14  ;;  %v2470_v15 = vpop.permute.xlu1 %2469  ;;  %5881 = vmatprep.mubr.msk.bf16.mxu0 %vm6489_vm0, %v6488_v1 }
0x1f64   :  { %5876 = vmatmul.mubr.msk.bf16.vlgmr.msra.gmra.mrb[44].mxu1 %vm125_vm1, %v2470_v15  ;;  %5891 = vmatprep.subr.bf16.mxu0 %v6488_v1  ;;  %v7249_v15 = vrot.slane %v7128_v8, %v82_v7 }
0x1f65   :  { %5886 = vmatpush3.bf16.msra.mxu1 %v7200_v16  ;;  %5887 = vmatprep.mubr.msk.bf16.mxu1 %vm6489_vm0, %v6488_v1 }
0x1f66   :  { %5899 = vmatprep.subr.bf16.mxu1 %v6488_v1 }
0x202d   :  { %v7208_v2 = vpop.f32.mrb[40].mxu1 }
0x202e   :  { %v5865_v17 = vpop.f32.mrb[41].mxu1  ;;  %v2654_v10 = vrot.slane %v7208_v2, 1 }
0x202f   :  { %v2392_v29 = vpop.f32.mrb[42].mxu1 }
0x2030   :  { %v5866_v11 = vpop.f32.mrb[43].mxu1 }
0x2035   :  { %v2458_v9 = vpop.f32.mrb[44].mxu0 }
0x2036   :  { %v5871_v28 = vpop.f32.mrb[45].mxu0  ;;  %v2521_v37 = vadd.f32 %v2458_v9, %v7213_v23 }
0x2037   :  { %v2461_v33 = vpop.f32.mrb[46].mxu0  ;;  %v2511_v12 = vpop.f32.mrb[44].mxu1 }
0x2038   :  { %v2522_v35 = vadd.f32 %v7216_v27, %v2511_v12  ;;  %v5872_v36 = vpop.f32.mrb[47].mxu0  ;;  %v5877_v24 = vpop.f32.mrb[45].mxu1 }
0x2039   :  { %v2514_v31 = vpop.f32.mrb[46].mxu1 }
0x203a   :  { %v2525_v41 = vrot.slane %v2522_v35, 7  ;;  %v5878_v19 = vpop.f32.mrb[47].mxu1 }
0x203c   :  { %v2527_v42 = vsel %vm2526_vm9, %v2525_v41, %v2521_v37 }
0x203d   :  { %v2530_v43 = vsel %vm2529_vm10, %v2527_v42, -inf }
0x203e   :  { %2531 = vmax.xlane.f32.xlu1 %v2530_v43 }
0x20cb   :  { %v2532_v54 = vpop.xlane.xlu1 %2531 }
0x20cc   :  { %v2534_v26 = vrot.slane %v2532_v54, 1  ;;  %v2537_v46 = vsub.f32 %v2521_v37, %v2532_v54 }
0x20ce   :  { %v2538_v44 = vsub.f32 %v2522_v35, %v2534_v26  ;;  %v2539_v45 = vmul.f32 1.442695, %v2537_v46  ;;  %v372_v46 = vcombine.high %v7142_v0, %v7142_v0 }
0x20d0   :  { %v2541_v47 = vmul.f32 1.442695, %v2538_v44 }
0x20d2   :  { %6285 = vpow2.f32 %v2541_v47 }
0x20d3   :  { %6287 = vpow2.f32 %v2539_v45 }
0x20dc   :  { %v6286_v49 = vpop.eup %6285 }
0x20dd   :  { %v2545_v51 = vrot.slane %v6286_v49, 7  ;;  %v6288_v38 = vpop.eup %6287 }
0x20df   :  { %v2546_v53 = vsel %vm2526_vm9, %v2545_v51, %v6288_v38 }
0x20e0   :  { %v2548_v5 = vsel %vm2529_vm10, %v2546_v53, 0.0 }
0x20e1   :  { %2549 = vadd.xlane.f32.xlu0 %v2548_v5 }
0x216e   :  { %v2550_v30 = vpop.xlane.xlu0 %2549 }
0x216f   :  { %6289 = vrcp.f32 %v2550_v30 }
0x2179   :  { %v6290_v50 = vpop.eup %6289 }
0x217a   :  { %v2553_v57 = vrot.slane %v6290_v50, 1  ;;  %v2556_v39 = vmul.f32 %v6290_v50, %v6288_v38 }
0x217c   :  { %v2557_v58 = vmul.f32 %v6286_v49, %v2553_v57  ;;  %v2558_v18 = vpack.c.bf16 %v2556_v39, %v2556_v39 }
0x217e   :  { %v5310_v61 = vrot.slane %v2557_v58, 7  ;;  %5882 = vmatmul.mubr.msk.bf16.vlgmr.msra.gmra.mrb[48].mxu0 %vm2560_vm11, %v2558_v18  ;;  %v2559_v52 = vpack.c.bf16 %v2557_v58, %v2557_v58 }
0x217f   :  { %5892 = vmatpush3.bf16.msra.mxu0 %v7087_v59  ;;  %5895 = vmatprep.mubr.msk.bf16.mxu0 %vm6489_vm0, %v6488_v1 }
0x2180   :  { %v5311_v63 = vsel %vm2526_vm9, %v5310_v61, %v2556_v39  ;;  %5888 = vmatmul.mubr.msk.bf16.vlgmr.msra.gmra.mrb[48].mxu1 %vm2560_vm11, %v2559_v52  ;;  %5893 = vmatprep.subr.bf16.mxu0 %v6488_v1 }
0x2181   :  { %5334 = vst.msk [vmem:[#allocation4] sm:$0x3] %vm2529_vm10, %v5311_v63  ;;  %5900 = vmatpush3.bf16.msra.mxu1 %v7153_v34  ;;  %5903 = vmatprep.mubr.msk.bf16.mxu1 %vm6489_vm0, %v6488_v1 }
0x2182   :  { %5901 = vmatprep.subr.bf16.mxu1 %v6488_v1 }
0x2183   :  { %5894 = vmatpush3.bf16.msra.mxu0 %v7099_v60 }
0x2184   :  { %5907 = vmatprep.subr.bf16.mxu0 %v6488_v1 }
0x2185   :  { %5902 = vmatpush3.bf16.msra.mxu1 %v7159_v20 }
0x2186   :  { %5896 = vmatmul.mubr.msk.bf16.vlgmr.msra.gmra.mrb[52].mxu0 %vm125_vm1, %v7177_v3  ;;  %5913 = vmatprep.subr.bf16.mxu1 %v6488_v1 }
0x2187   :  { %5909 = vmatprep.mubr.msk.bf16.mxu0 %vm6489_vm0, %v6488_v1 }
0x218c   :  { %5908 = vmatpush3.bf16.xpose.msra.mxu0 %v7116_v21 }
0x218d   :  { %5919 = vmatprep.subr.bf16.mxu0 %v6488_v1 }
0x2251   :  { %v2601_v6 = vpop.f32.mrb[48].mxu0 }
0x2252   :  { %v2657_v17 = vadd.f32 %v2601_v6, %v7208_v2  ;;  %v5883_v3 = vpop.f32.mrb[49].mxu0 }
0x2253   :  { %v2604_v29 = vpop.f32.mrb[50].mxu0  ;;  %v2647_v11 = vpop.f32.mrb[48].mxu1 }
0x2254   :  { %v2658_v9 = vadd.f32 %v2654_v10, %v2647_v11  ;;  %v5884_v28 = vpop.f32.mrb[51].mxu0  ;;  %v5889_v33 = vpop.f32.mrb[49].mxu1  ;;  %v2659_v35 = vadd.f32 %v2657_v17, %v7249_v15 }
0x2255   :  { %v2650_v12 = vpop.f32.mrb[50].mxu1 }
0x2256   :  { %v2660_v36 = vadd.f32 %v2658_v9, %v7249_v15  ;;  %v5890_v24 = vpop.f32.mrb[51].mxu1 }
0x2258   :  { %6291 = vtanh.f32 %v2660_v36 }
0x2259   :  { %v2697_v31 = vpop.f32.mrb[52].mxu0  ;;  %6293 = vtanh.f32 %v2659_v35 }
0x225a   :  { %v2698_v8 = vadd.f32 %v2697_v31, %v7131_v32  ;;  %v5897_v37 = vpop.f32.mrb[53].mxu0 }
0x225b   :  { %v2700_v41 = vpop.f32.mrb[54].mxu0 }
0x225c   :  { %v2717_v2 = vrot.slane %v2698_v8, %v6675_v56  ;;  %v5898_v19 = vpop.f32.mrb[55].mxu0  ;;  %v2703_v44 = vadd.f32 %v2698_v8, %v372_v46 }
0x225e   :  { %2718 = vrot.lane.b32.xlu0 %v2717_v2, %s6491_s19  ;;  %v5464_v45 = vmul.f32 -1.442695, %v2703_v44 }
0x2260   :  { %6295 = vpow2.f32 %v5464_v45 }
0x2262   :  { %v6292_v42 = vpop.eup %6291 }
0x2263   :  { %v5262_v43 = vrot.slane %v6292_v42, 7  ;;  %v6294_v54 = vpop.eup %6293 }
0x2265   :  { %v5263_v26 = vsel %vm2526_vm9, %v5262_v43, %v6294_v54 }
0x2266   :  { %5286 = vst.msk [vmem:[#allocation2] sm:$0x3] %vm901_vm12, %v5263_v26 }
0x226a   :  { %v6296_v47 = vpop.eup %6295 }
0x226b   :  { %v2707_v49 = vadd.f32 1.0, %v6296_v47 }
0x226d   :  { %6297 = vrcp.f32 %v2707_v49 }
0x2277   :  { %v6298_v51 = vpop.eup %6297 }
0x2278   :  { %v2728_v57 = vsub.f32 1.0, %v6298_v51  ;;  %v2734_v0 = vmul.f32 %v6298_v51, %v7164_v55 }
0x22d0   :  { %v2719_v38 = vpop.permute.xlu0 %2718 }
0x22d1   :  { %v2721_v53 = vmul.f32 %v6298_v51, %v2719_v38 }
0x22d3   :  { %2723 = vrot.lane.b32.xlu1 %v2721_v53, %s6491_s19 }
0x2345   :  { %v2724_v5 = vpop.permute.xlu1 %2723 }
0x2346   :  { %v2726_v30 = vadd.f32 %v2724_v5, %v372_v46 }
0x2348   :  { %6299 = vtanh.f32 %v2726_v30 }
0x2352   :  { %v6300_v50 = vpop.eup %6299 }
0x2353   :  { %2730 = vrot.lane.b32.xlu1 %v6300_v50, %s6493_s22 }
0x23c5   :  { %v2731_v39 = vpop.permute.xlu1 %2730 }
0x23c6   :  { %v2733_v58 = vmul.f32 %v2731_v39, %v2728_v57 }
0x23c8   :  { %v7264_v18 = vadd.f32 %v2734_v0, %v2733_v58 }
0x23ca   :  { %v2736_v61 = vpack.c.bf16 %v7264_v18, %v7264_v18 }
0x23cc   :  { %2738 = vrot.lane.b32.xlu0 %v2736_v61, %s6493_s22  ;;  %v2789_v52 = vrot.slane %v2736_v61, %v7010_v25 }
0x23ce   :  { %v2796_v63 = vrot.slane %v2789_v52, %v7010_v25 }
0x23d0   :  { %v5466_v7 = vpack.i.b16 %v2796_v63, %v2796_v63  ;;  %v2798_v6 = vunpack.i.h.s16 %v2796_v63 }
0x23d2   :  { %v2803_v10 = vrot.slane %v5466_v7, %v6681_v62  ;;  %v2849_v17 = vpack.i.b16 %v2798_v6, %v2798_v6 }
0x23d4   :  { %2804 = vrot.lane.b32.xlu0 %v2803_v10, %s6493_s22  ;;  %v2853_v55 = vrot.slane %v2849_v17, %v6681_v62 }
0x23d6   :  { %2854 = vrot.lane.b32.xlu1 %v2853_v55, %s6493_s22 }
0x243e   :  { %v7275_v3 = vpop.permute.xlu0 %2738 }
0x243f   :  { %5904 = vmatmul.mubr.msk.bf16.vlgmr.msra.gmra.mrb[52].mxu1 %vm125_vm1, %v7275_v3 }
0x2440   :  { %5914 = vmatpush3.bf16.xpose.msra.mxu1 %v7180_v4  ;;  %5915 = vmatprep.mubr.msk.bf16.mxu1 %vm6489_vm0, %v6488_v1 }
0x2441   :  { %5925 = vmatprep.subr.bf16.mxu1 %v6488_v1 }
0x2446   :  { %v2805_v29 = vpop.permute.xlu0 %2804 }
0x2447   :  { %5910 = vmatmul.mubr.msk.bf16.vlgmr.msra.gmra.mrb[56].mxu0 %vm125_vm1, %v2805_v29 }
0x2448   :  { %5920 = vmatpush3.bf16.msra.mxu0 %v7193_v14  ;;  %v2855_v11 = vpop.permute.xlu1 %2854  ;;  %5921 = vmatprep.mubr.msk.bf16.mxu0 %vm6489_vm0, %v6488_v1 }
0x2449   :  { %5916 = vmatmul.mubr.msk.bf16.vlgmr.msra.gmra.mrb[56].mxu1 %vm125_vm1, %v2855_v11  ;;  %5931 = vmatprep.subr.bf16.mxu0 %v6488_v1 }
0x244a   :  { %5926 = vmatpush3.bf16.msra.mxu1 %v7200_v16  ;;  %5927 = vmatprep.mubr.msk.bf16.mxu1 %vm6489_vm0, %v6488_v1 }
0x244b   :  { %5939 = vmatprep.subr.bf16.mxu1 %v6488_v1 }
0x2512   :  { %v7293_v9 = vpop.f32.mrb[52].mxu1 }
0x2513   :  { %v5905_v28 = vpop.f32.mrb[53].mxu1  ;;  %v3023_v17 = vrot.slane %v7293_v9, 1 }
0x2514   :  { %v2780_v33 = vpop.f32.mrb[54].mxu1 }
0x2515   :  { %v5906_v12 = vpop.f32.mrb[55].mxu1 }
0x251a   :  { %v2843_v35 = vpop.f32.mrb[56].mxu0 }
0x251b   :  { %v5911_v36 = vpop.f32.mrb[57].mxu0  ;;  %v2899_v19 = vadd.f32 %v2843_v35, %v7213_v23 }
0x251c   :  { %v2846_v24 = vpop.f32.mrb[58].mxu0  ;;  %v2893_v31 = vpop.f32.mrb[56].mxu1 }
0x251d   :  { %v2900_v8 = vadd.f32 %v2893_v31, %v7216_v27  ;;  %v5912_v37 = vpop.f32.mrb[59].mxu0  ;;  %v5917_v41 = vpop.f32.mrb[57].mxu1 }
0x251e   :  { %v2896_v2 = vpop.f32.mrb[58].mxu1 }
0x251f   :  { %v2903_v42 = vrot.slane %v2900_v8, 7  ;;  %v5918_v43 = vpop.f32.mrb[59].mxu1 }
0x2521   :  { %v2904_v54 = vsel %vm2526_vm9, %v2903_v42, %v2899_v19 }
0x2522   :  { %v2906_v26 = vsel %vm2529_vm10, %v2904_v54, -inf }
0x2523   :  { %2907 = vmax.xlane.f32.xlu1 %v2906_v26 }
0x25b0   :  { %v2908_v46 = vpop.xlane.xlu1 %2907 }
0x25b1   :  { %v2910_v44 = vrot.slane %v2908_v46, 1  ;;  %v2913_v45 = vsub.f32 %v2899_v19, %v2908_v46  ;;  %v357_v46 = vcombine.high %v7138_v40, %v7138_v40 }
0x25b3   :  { %v2914_v47 = vsub.f32 %v2900_v8, %v2910_v44  ;;  %v2915_v49 = vmul.f32 1.442695, %v2913_v45  ;;  %v7335_v44 = vrot.slane %v357_v46, %v6675_v56 }
0x25b5   :  { %v2917_v51 = vmul.f32 1.442695, %v2914_v47 }
0x25b7   :  { %6301 = vpow2.f32 %v2917_v51 }
0x25b8   :  { %6303 = vpow2.f32 %v2915_v49 }
0x25c1   :  { %v6302_v38 = vpop.eup %6301 }
0x25c2   :  { %v2921_v53 = vrot.slane %v6302_v38, 7  ;;  %v6304_v5 = vpop.eup %6303 }
0x25c4   :  { %v2922_v30 = vsel %vm2526_vm9, %v2921_v53, %v6304_v5 }
0x25c5   :  { %v2924_v50 = vsel %vm2529_vm10, %v2922_v30, 0.0 }
0x25c6   :  { %2925 = vadd.xlane.f32.xlu0 %v2924_v50 }
0x2653   :  { %v2926_v57 = vpop.xlane.xlu0 %2925 }
0x2654   :  { %6305 = vrcp.f32 %v2926_v57 }
0x265e   :  { %v6306_v39 = vpop.eup %6305 }
0x265f   :  { %v2929_v0 = vrot.slane %v6306_v39, 1  ;;  %v2932_v58 = vmul.f32 %v6306_v39, %v6304_v5 }
0x2661   :  { %v2933_v61 = vmul.f32 %v6302_v38, %v2929_v0  ;;  %v2934_v52 = vpack.c.bf16 %v2932_v58, %v2932_v58 }
0x2663   :  { %v5312_v63 = vrot.slane %v2933_v61, 7  ;;  %5922 = vmatmul.mubr.msk.bf16.vlgmr.msra.gmra.mrb[60].mxu0 %vm2560_vm11, %v2934_v52  ;;  %v2935_v7 = vpack.c.bf16 %v2933_v61, %v2933_v61 }
0x2664   :  { %5932 = vmatpush3.bf16.msra.mxu0 %v7087_v59  ;;  %5935 = vmatprep.mubr.msk.bf16.mxu0 %vm6489_vm0, %v6488_v1 }
0x2665   :  { %v5313_v6 = vsel %vm2526_vm9, %v5312_v63, %v2932_v58  ;;  %5928 = vmatmul.mubr.msk.bf16.vlgmr.msra.gmra.mrb[60].mxu1 %vm2560_vm11, %v2935_v7  ;;  %5933 = vmatprep.subr.bf16.mxu0 %v6488_v1 }
0x2666   :  { %5335 = vst.msk [vmem:[#allocation4 + $0x2] sm:$0x3] %vm2529_vm10, %v5313_v6  ;;  %5940 = vmatpush3.bf16.msra.mxu1 %v7153_v34  ;;  %5943 = vmatprep.mubr.msk.bf16.mxu1 %vm6489_vm0, %v6488_v1 }
0x2667   :  { %5941 = vmatprep.subr.bf16.mxu1 %v6488_v1 }
0x2668   :  { %5934 = vmatpush3.bf16.msra.mxu0 %v7099_v60 }
0x2669   :  { %5947 = vmatprep.subr.bf16.mxu0 %v6488_v1 }
0x266a   :  { %5942 = vmatpush3.bf16.msra.mxu1 %v7159_v20 }
0x266b   :  { %5936 = vmatmul.mubr.msk.bf16.vlgmr.msra.gmra.mrb[64].mxu0 %vm125_vm1, %v7275_v3  ;;  %5953 = vmatprep.subr.bf16.mxu1 %v6488_v1 }
0x266c   :  { %5949 = vmatprep.mubr.msk.bf16.mxu0 %vm6489_vm0, %v6488_v1 }
0x2671   :  { %5948 = vmatpush3.bf16.xpose.msra.mxu0 %v7116_v21 }
0x2672   :  { %5959 = vmatprep.subr.bf16.mxu0 %v6488_v1 }
0x2736   :  { %v2973_v10 = vpop.f32.mrb[60].mxu0 }
0x2737   :  { %v3026_v55 = vadd.f32 %v2973_v10, %v7293_v9  ;;  %v5923_v29 = vpop.f32.mrb[61].mxu0 }
0x2738   :  { %v2976_v11 = vpop.f32.mrb[62].mxu0  ;;  %v3016_v28 = vpop.f32.mrb[60].mxu1 }
0x2739   :  { %v3027_v33 = vadd.f32 %v3023_v17, %v3016_v28  ;;  %v5924_v12 = vpop.f32.mrb[63].mxu0  ;;  %v5929_v3 = vpop.f32.mrb[61].mxu1  ;;  %v3028_v36 = vadd.f32 %v3026_v55, %v7249_v15 }
0x273a   :  { %v3019_v35 = vpop.f32.mrb[62].mxu1 }
0x273b   :  { %v3029_v24 = vadd.f32 %v3027_v33, %v7249_v15  ;;  %v5930_v31 = vpop.f32.mrb[63].mxu1 }
0x273d   :  { %6307 = vtanh.f32 %v3029_v24 }
0x273e   :  { %v3066_v8 = vpop.f32.mrb[64].mxu0  ;;  %6309 = vtanh.f32 %v3028_v36 }
0x273f   :  { %v3067_v37 = vadd.f32 %v3066_v8, %v7131_v32  ;;  %v5937_v41 = vpop.f32.mrb[65].mxu0 }
0x2740   :  { %v3069_v2 = vpop.f32.mrb[66].mxu0 }
0x2741   :  { %v3086_v9 = vrot.slane %v3067_v37, %v6675_v56  ;;  %v5938_v19 = vpop.f32.mrb[67].mxu0  ;;  %v3072_v45 = vadd.f32 %v3067_v37, %v7335_v44 }
0x2743   :  { %3087 = vrot.lane.b32.xlu0 %v3086_v9, %s6491_s19  ;;  %v5472_v47 = vmul.f32 -1.442695, %v3072_v45 }
0x2745   :  { %6311 = vpow2.f32 %v5472_v47 }
0x2747   :  { %v6308_v42 = vpop.eup %6307 }
0x2748   :  { %v5264_v43 = vrot.slane %v6308_v42, 7  ;;  %v6310_v54 = vpop.eup %6309 }
0x274a   :  { %v5265_v26 = vsel %vm2526_vm9, %v5264_v43, %v6310_v54 }
0x274b   :  { %5287 = vst.msk [vmem:[#allocation2 + $0x2] sm:$0x3] %vm901_vm12, %v5265_v26 }
0x274f   :  { %v6312_v49 = vpop.eup %6311 }
0x2750   :  { %v3076_v51 = vadd.f32 1.0, %v6312_v49 }
0x2752   :  { %6313 = vrcp.f32 %v3076_v51 }
0x275c   :  { %v6314_v38 = vpop.eup %6313 }
0x275d   :  { %v3097_v57 = vsub.f32 1.0, %v6314_v38  ;;  %v3103_v0 = vmul.f32 %v6314_v38, %v7264_v18 }
0x27b5   :  { %v3088_v53 = vpop.permute.xlu0 %3087 }
0x27b6   :  { %v3090_v5 = vmul.f32 %v6314_v38, %v3088_v53 }
0x27b8   :  { %3092 = vrot.lane.b32.xlu1 %v3090_v5, %s6491_s19 }
0x282a   :  { %v3093_v30 = vpop.permute.xlu1 %3092 }
0x282b   :  { %v3095_v50 = vadd.f32 %v3093_v30, %v7335_v44 }
0x282d   :  { %6315 = vtanh.f32 %v3095_v50 }
0x2837   :  { %v6316_v40 = vpop.eup %6315 }
0x2838   :  { %3099 = vrot.lane.b32.xlu1 %v6316_v40, %s6493_s22 }
0x28aa   :  { %v3100_v39 = vpop.permute.xlu1 %3099 }
0x28ab   :  { %v3102_v58 = vmul.f32 %v3100_v39, %v3097_v57 }
0x28ad   :  { %v7342_v61 = vadd.f32 %v3103_v0, %v3102_v58 }
0x28af   :  { %v3105_v52 = vpack.c.bf16 %v7342_v61, %v7342_v61 }
0x28b1   :  { %3107 = vrot.lane.b32.xlu0 %v3105_v52, %s6493_s22  ;;  %v3158_v63 = vrot.slane %v3105_v52, %v7010_v25 }
0x28b3   :  { %v3165_v7 = vrot.slane %v3158_v63, %v7010_v25 }
0x28b5   :  { %v5474_v6 = vpack.i.b16 %v3165_v7, %v3165_v7  ;;  %v3167_v10 = vunpack.i.h.s16 %v3165_v7 }
0x28b7   :  { %v3172_v17 = vrot.slane %v5474_v6, %v6681_v62  ;;  %v3218_v55 = vpack.i.b16 %v3167_v10, %v3167_v10 }
0x28b9   :  { %3173 = vrot.lane.b32.xlu0 %v3172_v17, %s6493_s22  ;;  %v3222_v18 = vrot.slane %v3218_v55, %v6681_v62 }
0x28bb   :  { %3223 = vrot.lane.b32.xlu1 %v3222_v18, %s6493_s22 }
0x2923   :  { %v7353_v29 = vpop.permute.xlu0 %3107 }
0x2924   :  { %5944 = vmatmul.mubr.msk.bf16.vlgmr.msra.gmra.mrb[64].mxu1 %vm125_vm1, %v7353_v29 }
0x2925   :  { %5954 = vmatpush3.bf16.xpose.msra.mxu1 %v7180_v4  ;;  %5955 = vmatprep.mubr.msk.bf16.mxu1 %vm6489_vm0, %v6488_v1 }
0x2926   :  { %5965 = vmatprep.subr.bf16.mxu1 %v6488_v1 }
0x292b   :  { %v3174_v11 = vpop.permute.xlu0 %3173 }
0x292c   :  { %5950 = vmatmul.mubr.msk.bf16.vlgmr.msra.gmra.mrb[68].mxu0 %vm125_vm1, %v3174_v11 }
0x292d   :  { %5960 = vmatpush3.bf16.msra.mxu0 %v7193_v14  ;;  %v3224_v28 = vpop.permute.xlu1 %3223  ;;  %5961 = vmatprep.mubr.msk.bf16.mxu0 %vm6489_vm0, %v6488_v1 }
0x292e   :  { %5956 = vmatmul.mubr.msk.bf16.vlgmr.msra.gmra.mrb[68].mxu1 %vm125_vm1, %v3224_v28  ;;  %5971 = vmatprep.subr.bf16.mxu0 %v6488_v1 }
0x292f   :  { %5966 = vmatpush3.bf16.msra.mxu1 %v7200_v16  ;;  %5967 = vmatprep.mubr.msk.bf16.mxu1 %vm6489_vm0, %v6488_v1 }
0x2930   :  { %5979 = vmatprep.subr.bf16.mxu1 %v6488_v1 }
0x29f7   :  { %v7371_v33 = vpop.f32.mrb[64].mxu1 }
0x29f8   :  { %v5945_v12 = vpop.f32.mrb[65].mxu1  ;;  %v3392_v17 = vrot.slane %v7371_v33, 1 }
0x29f9   :  { %v3149_v3 = vpop.f32.mrb[66].mxu1 }
0x29fa   :  { %v5946_v35 = vpop.f32.mrb[67].mxu1 }
0x29ff   :  { %v3212_v36 = vpop.f32.mrb[68].mxu0 }
0x2a00   :  { %v5951_v24 = vpop.f32.mrb[69].mxu0  ;;  %v3268_v19 = vadd.f32 %v3212_v36, %v7213_v23 }
0x2a01   :  { %v3215_v31 = vpop.f32.mrb[70].mxu0  ;;  %v3262_v8 = vpop.f32.mrb[68].mxu1 }
0x2a02   :  { %v3269_v37 = vadd.f32 %v3262_v8, %v7216_v27  ;;  %v5952_v41 = vpop.f32.mrb[71].mxu0  ;;  %v5957_v2 = vpop.f32.mrb[69].mxu1 }
0x2a03   :  { %v3265_v9 = vpop.f32.mrb[70].mxu1 }
0x2a04   :  { %v3272_v42 = vrot.slane %v3269_v37, 7  ;;  %v5958_v43 = vpop.f32.mrb[71].mxu1 }
0x2a06   :  { %v3273_v54 = vsel %vm2526_vm9, %v3272_v42, %v3268_v19 }
0x2a07   :  { %v3275_v26 = vsel %vm2529_vm10, %v3273_v54, -inf  ;;  %v373_v54 = vcombine.high %v7335_v44, %v7335_v44 }
0x2a08   :  { %3276 = vmax.xlane.f32.xlu1 %v3275_v26 }
0x2a95   :  { %v3277_v46 = vpop.xlane.xlu1 %3276 }
0x2a96   :  { %v3279_v45 = vrot.slane %v3277_v46, 1  ;;  %v3282_v47 = vsub.f32 %v3268_v19, %v3277_v46 }
0x2a98   :  { %v3283_v49 = vsub.f32 %v3269_v37, %v3279_v45  ;;  %v3284_v51 = vmul.f32 1.442695, %v3282_v47 }
0x2a9a   :  { %v3286_v38 = vmul.f32 1.442695, %v3283_v49 }
0x2a9c   :  { %6317 = vpow2.f32 %v3286_v38 }
0x2a9d   :  { %6319 = vpow2.f32 %v3284_v51 }
0x2aa6   :  { %v6318_v53 = vpop.eup %6317 }
0x2aa7   :  { %v3290_v5 = vrot.slane %v6318_v53, 7  ;;  %v6320_v30 = vpop.eup %6319 }
0x2aa9   :  { %v3291_v50 = vsel %vm2526_vm9, %v3290_v5, %v6320_v30 }
0x2aaa   :  { %v3293_v40 = vsel %vm2529_vm10, %v3291_v50, 0.0 }
0x2aab   :  { %3294 = vadd.xlane.f32.xlu0 %v3293_v40 }
0x2b38   :  { %v3295_v57 = vpop.xlane.xlu0 %3294 }
0x2b39   :  { %6321 = vrcp.f32 %v3295_v57 }
0x2b43   :  { %v6322_v39 = vpop.eup %6321 }
0x2b44   :  { %v3298_v0 = vrot.slane %v6322_v39, 1  ;;  %v3301_v58 = vmul.f32 %v6322_v39, %v6320_v30 }
0x2b46   :  { %v3302_v52 = vmul.f32 %v6318_v53, %v3298_v0  ;;  %v3303_v63 = vpack.c.bf16 %v3301_v58, %v3301_v58 }
0x2b48   :  { %v5314_v7 = vrot.slane %v3302_v52, 7  ;;  %5962 = vmatmul.mubr.msk.bf16.vlgmr.msra.gmra.mrb[72].mxu0 %vm2560_vm11, %v3303_v63  ;;  %v3304_v6 = vpack.c.bf16 %v3302_v52, %v3302_v52 }
0x2b49   :  { %5972 = vmatpush3.bf16.msra.mxu0 %v7087_v59  ;;  %5975 = vmatprep.mubr.msk.bf16.mxu0 %vm6489_vm0, %v6488_v1 }
0x2b4a   :  { %v5315_v10 = vsel %vm2526_vm9, %v5314_v7, %v3301_v58  ;;  %5968 = vmatmul.mubr.msk.bf16.vlgmr.msra.gmra.mrb[72].mxu1 %vm2560_vm11, %v3304_v6  ;;  %5973 = vmatprep.subr.bf16.mxu0 %v6488_v1 }
0x2b4b   :  { %5336 = vst.msk [vmem:[#allocation4 + $0x4] sm:$0x3] %vm2529_vm10, %v5315_v10  ;;  %5980 = vmatpush3.bf16.msra.mxu1 %v7153_v34  ;;  %5983 = vmatprep.mubr.msk.bf16.mxu1 %vm6489_vm0, %v6488_v1 }
0x2b4c   :  { %5981 = vmatprep.subr.bf16.mxu1 %v6488_v1 }
0x2b4d   :  { %5974 = vmatpush3.bf16.msra.mxu0 %v7099_v60 }
0x2b4e   :  { %5987 = vmatprep.subr.bf16.mxu0 %v6488_v1 }
0x2b4f   :  { %5982 = vmatpush3.bf16.msra.mxu1 %v7159_v20 }
0x2b50   :  { %5976 = vmatmul.mubr.msk.bf16.vlgmr.msra.gmra.mrb[76].mxu0 %vm125_vm1, %v7353_v29  ;;  %5993 = vmatprep.subr.bf16.mxu1 %v6488_v1 }
0x2b51   :  { %5989 = vmatprep.mubr.msk.bf16.mxu0 %vm6489_vm0, %v6488_v1 }
0x2b56   :  { %5988 = vmatpush3.bf16.xpose.msra.mxu0 %v7116_v21 }
0x2b57   :  { %5999 = vmatprep.subr.bf16.mxu0 %v6488_v1 }
0x2c1b   :  { %v3342_v59 = vpop.f32.mrb[72].mxu0 }
0x2c1c   :  { %v3395_v60 = vadd.f32 %v3342_v59, %v7371_v33  ;;  %v5963_v55 = vpop.f32.mrb[73].mxu0 }
0x2c1d   :  { %v3345_v18 = vpop.f32.mrb[74].mxu0  ;;  %v3385_v11 = vpop.f32.mrb[72].mxu1 }
0x2c1e   :  { %v3396_v28 = vadd.f32 %v3392_v17, %v3385_v11  ;;  %v5964_v12 = vpop.f32.mrb[75].mxu0  ;;  %v5969_v29 = vpop.f32.mrb[73].mxu1  ;;  %v3397_v35 = vadd.f32 %v3395_v60, %v7249_v15 }
0x2c1f   :  { %v3388_v3 = vpop.f32.mrb[74].mxu1 }
0x2c20   :  { %v3398_v36 = vadd.f32 %v3396_v28, %v7249_v15  ;;  %v5970_v24 = vpop.f32.mrb[75].mxu1 }
0x2c22   :  { %6323 = vtanh.f32 %v3398_v36 }
0x2c23   :  { %v3435_v31 = vpop.f32.mrb[76].mxu0  ;;  %6325 = vtanh.f32 %v3397_v35 }
0x2c24   :  { %v3436_v8 = vadd.f32 %v3435_v31, %v7131_v32  ;;  %v5977_v37 = vpop.f32.mrb[77].mxu0 }
0x2c25   :  { %v3438_v41 = vpop.f32.mrb[78].mxu0 }
0x2c26   :  { %v3455_v33 = vrot.slane %v3436_v8, %v6675_v56  ;;  %v5978_v2 = vpop.f32.mrb[79].mxu0  ;;  %v3441_v26 = vadd.f32 %v3436_v8, %v373_v54 }
0x2c28   :  { %3456 = vrot.lane.b32.xlu0 %v3455_v33, %s6491_s19  ;;  %v5480_v46 = vmul.f32 -1.442695, %v3441_v26 }
0x2c2a   :  { %6327 = vpow2.f32 %v5480_v46 }
0x2c2c   :  { %v6324_v9 = vpop.eup %6323 }
0x2c2d   :  { %v5266_v19 = vrot.slane %v6324_v9, 7  ;;  %v6326_v42 = vpop.eup %6325 }
0x2c2f   :  { %v5267_v43 = vsel %vm2526_vm9, %v5266_v19, %v6326_v42 }
0x2c30   :  { %5288 = vst.msk [vmem:[#allocation2 + $0x4] sm:$0x3] %vm901_vm12, %v5267_v43 }
0x2c34   :  { %v6328_v45 = vpop.eup %6327 }
0x2c35   :  { %v3445_v47 = vadd.f32 1.0, %v6328_v45 }
0x2c37   :  { %6329 = vrcp.f32 %v3445_v47 }
0x2c41   :  { %v6330_v49 = vpop.eup %6329 }
0x2c42   :  { %v3466_v50 = vsub.f32 1.0, %v6330_v49  ;;  %v3472_v44 = vmul.f32 %v6330_v49, %v7342_v61 }
0x2c9a   :  { %v3457_v51 = vpop.permute.xlu0 %3456 }
0x2c9b   :  { %v3459_v38 = vmul.f32 %v6330_v49, %v3457_v51 }
0x2c9d   :  { %3461 = vrot.lane.b32.xlu1 %v3459_v38, %s6491_s19 }
0x2d0f   :  { %v3462_v53 = vpop.permute.xlu1 %3461 }
0x2d10   :  { %v3464_v5 = vadd.f32 %v3462_v53, %v373_v54 }
0x2d12   :  { %6331 = vtanh.f32 %v3464_v5 }
0x2d1c   :  { %v6332_v30 = vpop.eup %6331 }
0x2d1d   :  { %3468 = vrot.lane.b32.xlu1 %v6332_v30, %s6493_s22 }
0x2d8f   :  { %v3469_v40 = vpop.permute.xlu1 %3468 }
0x2d90   :  { %v3471_v57 = vmul.f32 %v3469_v40, %v3466_v50 }
0x2d92   :  { %v7415_v39 = vadd.f32 %v3472_v44, %v3471_v57 }
0x2d94   :  { %v3474_v0 = vpack.c.bf16 %v7415_v39, %v7415_v39 }
0x2d96   :  { %v3527_v58 = vrot.slane %v3474_v0, %v7010_v25  ;;  %3476 = vrot.lane.b32.xlu0 %v3474_v0, %s6493_s22  ;;  %v7456_v0 = vld [vmem:[%s7838_s2 + $0x50] sm:$0xff]  }
0x2d98   :  { %v3534_v52 = vrot.slane %v3527_v58, %v7010_v25 }
0x2d9a   :  { %v5482_v63 = vpack.i.b16 %v3534_v52, %v3534_v52  ;;  %v3536_v7 = vunpack.i.h.s16 %v3534_v52  ;;  %v7472_v52 = vld [vmem:[%s7838_s2 + $0x58] sm:$0xff]  }
0x2d9c   :  { %v3541_v6 = vrot.slane %v5482_v63, %v6681_v62  ;;  %v3587_v10 = vpack.i.b16 %v3536_v7, %v3536_v7 }
0x2d9e   :  { %3542 = vrot.lane.b32.xlu0 %v3541_v6, %s6493_s22  ;;  %v3591_v61 = vrot.slane %v3587_v10, %v6681_v62 }
0x2da0   :  { %3592 = vrot.lane.b32.xlu1 %v3591_v61, %s6493_s22 }
0x2e08   :  { %v7426_v59 = vpop.permute.xlu0 %3476 }
0x2e09   :  { %5984 = vmatmul.mubr.msk.bf16.vlgmr.msra.gmra.mrb[76].mxu1 %vm125_vm1, %v7426_v59 }
0x2e0a   :  { %5994 = vmatpush3.bf16.xpose.msra.mxu1 %v7180_v4  ;;  %5995 = vmatprep.mubr.msk.bf16.mxu1 %vm6489_vm0, %v6488_v1 }
0x2e0b   :  { %6005 = vmatprep.subr.bf16.mxu1 %v6488_v1 }
0x2e10   :  { %v3543_v17 = vpop.permute.xlu0 %3542 }
0x2e11   :  { %5990 = vmatmul.mubr.msk.bf16.vlgmr.msra.gmra.mrb[80].mxu0 %vm125_vm1, %v3543_v17 }
0x2e12   :  { %6000 = vmatpush3.bf16.msra.mxu0 %v7193_v14  ;;  %v3593_v60 = vpop.permute.xlu1 %3592  ;;  %6001 = vmatprep.mubr.msk.bf16.mxu0 %vm6489_vm0, %v6488_v1 }
0x2e13   :  { %5996 = vmatmul.mubr.msk.bf16.vlgmr.msra.gmra.mrb[80].mxu1 %vm125_vm1, %v3593_v60  ;;  %6011 = vmatprep.subr.bf16.mxu0 %v6488_v1 }
0x2e14   :  { %6006 = vmatpush3.bf16.msra.mxu1 %v7200_v16  ;;  %6007 = vmatprep.mubr.msk.bf16.mxu1 %vm6489_vm0, %v6488_v1 }
0x2e15   :  { %6019 = vmatprep.subr.bf16.mxu1 %v6488_v1 }
0x2edc   :  { %v7444_v55 = vpop.f32.mrb[76].mxu1 }
0x2edd   :  { %v5985_v18 = vpop.f32.mrb[77].mxu1  ;;  %v3761_v63 = vrot.slane %v7444_v55, 1 }
0x2ede   :  { %v3518_v11 = vpop.f32.mrb[78].mxu1 }
0x2edf   :  { %v5986_v28 = vpop.f32.mrb[79].mxu1 }
0x2ee4   :  { %v3581_v12 = vpop.f32.mrb[80].mxu0 }
0x2ee5   :  { %v5991_v29 = vpop.f32.mrb[81].mxu0  ;;  %v3637_v37 = vadd.f32 %v3581_v12, %v7213_v23 }
0x2ee6   :  { %v3584_v3 = vpop.f32.mrb[82].mxu0  ;;  %v3631_v35 = vpop.f32.mrb[80].mxu1 }
0x2ee7   :  { %v3638_v36 = vadd.f32 %v3631_v35, %v7216_v27  ;;  %v5992_v24 = vpop.f32.mrb[83].mxu0  ;;  %v5997_v31 = vpop.f32.mrb[81].mxu1 }
0x2ee8   :  { %v3634_v8 = vpop.f32.mrb[82].mxu1 }
0x2ee9   :  { %v3641_v41 = vrot.slane %v3638_v36, 7  ;;  %v5998_v33 = vpop.f32.mrb[83].mxu1 }
0x2eeb   :  { %v3642_v2 = vsel %vm2526_vm9, %v3641_v41, %v3637_v37  ;;  %v7495_v41 = vrot.slane %v6668_v48, %v6675_v56 }
0x2eec   :  { %v3644_v9 = vsel %vm2529_vm10, %v3642_v2, -inf }
0x2eed   :  { %3645 = vmax.xlane.f32.xlu1 %v3644_v9 }
0x2f7a   :  { %v3646_v19 = vpop.xlane.xlu1 %3645 }
0x2f7b   :  { %v3648_v42 = vrot.slane %v3646_v19, 1  ;;  %v3651_v43 = vsub.f32 %v3637_v37, %v3646_v19 }
0x2f7d   :  { %v3652_v54 = vsub.f32 %v3638_v36, %v3648_v42  ;;  %v3653_v26 = vmul.f32 1.442695, %v3651_v43 }
0x2f7f   :  { %v3655_v46 = vmul.f32 1.442695, %v3652_v54 }
0x2f81   :  { %6333 = vpow2.f32 %v3655_v46 }
0x2f82   :  { %6335 = vpow2.f32 %v3653_v26 }
0x2f8b   :  { %v6334_v45 = vpop.eup %6333 }
0x2f8c   :  { %v3659_v47 = vrot.slane %v6334_v45, 7  ;;  %v6336_v49 = vpop.eup %6335 }
0x2f8e   :  { %v3660_v23 = vsel %vm2526_vm9, %v3659_v47, %v6336_v49 }
0x2f8f   :  { %v3662_v51 = vsel %vm2529_vm10, %v3660_v23, 0.0 }
0x2f90   :  { %3663 = vadd.xlane.f32.xlu0 %v3662_v51 }
0x301d   :  { %v3664_v38 = vpop.xlane.xlu0 %3663 }
0x301e   :  { %6337 = vrcp.f32 %v3664_v38 }
0x3028   :  { %v6338_v53 = vpop.eup %6337 }
0x3029   :  { %v3667_v5 = vrot.slane %v6338_v53, 1  ;;  %v3670_v30 = vmul.f32 %v6338_v53, %v6336_v49 }
0x302b   :  { %v3671_v50 = vmul.f32 %v6334_v45, %v3667_v5  ;;  %v3672_v40 = vpack.c.bf16 %v3670_v30, %v3670_v30 }
0x302d   :  { %v5316_v44 = vrot.slane %v3671_v50, 7  ;;  %6002 = vmatmul.mubr.msk.bf16.vlgmr.msra.gmra.mrb[84].mxu0 %vm2560_vm11, %v3672_v40  ;;  %v3673_v57 = vpack.c.bf16 %v3671_v50, %v3671_v50 }
0x302e   :  { %6012 = vmatpush3.bf16.msra.mxu0 %v7456_v0  ;;  %6015 = vmatprep.mubr.msk.bf16.mxu0 %vm6489_vm0, %v6488_v1 }
0x302f   :  { %v5317_v58 = vsel %vm2526_vm9, %v5316_v44, %v3670_v30  ;;  %6008 = vmatmul.mubr.msk.bf16.vlgmr.msra.gmra.mrb[84].mxu1 %vm2560_vm11, %v3673_v57  ;;  %6013 = vmatprep.subr.bf16.mxu0 %v6488_v1 }
0x3030   :  { %5337 = vst.msk [vmem:[#allocation4 + $0x6] sm:$0x3] %vm2529_vm10, %v5317_v58  ;;  %6020 = vmatpush3.bf16.msra.mxu1 %v7153_v34  ;;  %6023 = vmatprep.mubr.msk.bf16.mxu1 %vm6489_vm0, %v6488_v1 }
0x3031   :  { %6021 = vmatprep.subr.bf16.mxu1 %v6488_v1 }
0x3032   :  { %6014 = vmatpush3.bf16.msra.mxu0 %v7472_v52 }
0x3033   :  { %6027 = vmatprep.subr.bf16.mxu0 %v6488_v1 }
0x3034   :  { %6022 = vmatpush3.bf16.msra.mxu1 %v7159_v20 }
0x3035   :  { %6016 = vmatmul.mubr.msk.bf16.vlgmr.msra.gmra.mrb[88].mxu0 %vm125_vm1, %v7426_v59  ;;  %6033 = vmatprep.subr.bf16.mxu1 %v6488_v1 }
0x3036   :  { %6029 = vmatprep.mubr.msk.bf16.mxu0 %vm6489_vm0, %v6488_v1 }
0x303b   :  { %6028 = vmatpush3.bf16.xpose.msra.mxu0 %v7116_v21 }
0x303c   :  { %6039 = vmatprep.subr.bf16.mxu0 %v6488_v1 }
0x3100   :  { %v3711_v34 = vpop.f32.mrb[84].mxu0 }
0x3101   :  { %v3764_v7 = vadd.f32 %v3711_v34, %v7444_v55  ;;  %v6003_v6 = vpop.f32.mrb[85].mxu0 }
0x3102   :  { %v3714_v10 = vpop.f32.mrb[86].mxu0  ;;  %v3754_v20 = vpop.f32.mrb[84].mxu1 }
0x3103   :  { %v3765_v61 = vadd.f32 %v3761_v63, %v3754_v20  ;;  %v6004_v17 = vpop.f32.mrb[87].mxu0  ;;  %v6009_v59 = vpop.f32.mrb[85].mxu1  ;;  %v3766_v18 = vadd.f32 %v3764_v7, %v7249_v15 }
0x3104   :  { %v3757_v60 = vpop.f32.mrb[86].mxu1 }
0x3105   :  { %v3767_v11 = vadd.f32 %v3765_v61, %v7249_v15  ;;  %v6010_v28 = vpop.f32.mrb[87].mxu1 }
0x3107   :  { %6339 = vtanh.f32 %v3767_v11 }
0x3108   :  { %v3804_v12 = vpop.f32.mrb[88].mxu0  ;;  %6341 = vtanh.f32 %v3766_v18 }
0x3109   :  { %v3805_v29 = vadd.f32 %v3804_v12, %v7131_v32  ;;  %v6017_v3 = vpop.f32.mrb[89].mxu0 }
0x310a   :  { %v3807_v35 = vpop.f32.mrb[90].mxu0 }
0x310b   :  { %v3824_v55 = vrot.slane %v3805_v29, %v6675_v56  ;;  %v6018_v36 = vpop.f32.mrb[91].mxu0  ;;  %v3810_v33 = vadd.f32 %v3805_v29, %v7495_v41  ;;  %v7537_v29 = vld [vmem:[%s7836_s0 + $0x38] sm:$0x3] }
0x310d   :  { %3825 = vrot.lane.b32.xlu0 %v3824_v55, %s6491_s19  ;;  %v5488_v2 = vmul.f32 -1.442695, %v3810_v33 }
0x310f   :  { %6343 = vpow2.f32 %v5488_v2 }
0x3111   :  { %v6340_v24 = vpop.eup %6339 }
0x3112   :  { %v5268_v31 = vrot.slane %v6340_v24, 7  ;;  %v6342_v8 = vpop.eup %6341 }
0x3114   :  { %v5269_v37 = vsel %vm2526_vm9, %v5268_v31, %v6342_v8 }
0x3115   :  { %5289 = vst.msk [vmem:[#allocation2 + $0x6] sm:$0x3] %vm901_vm12, %v5269_v37 }
0x3119   :  { %v6344_v9 = vpop.eup %6343 }
0x311a   :  { %v3814_v19 = vadd.f32 1.0, %v6344_v9 }
0x311c   :  { %6345 = vrcp.f32 %v3814_v19 }
0x3126   :  { %v6346_v42 = vpop.eup %6345 }
0x3127   :  { %v3835_v47 = vsub.f32 1.0, %v6346_v42  ;;  %v3841_v23 = vmul.f32 %v6346_v42, %v7415_v39 }
0x317f   :  { %v3826_v43 = vpop.permute.xlu0 %3825 }
0x3180   :  { %v3828_v54 = vmul.f32 %v6346_v42, %v3826_v43 }
0x3182   :  { %3830 = vrot.lane.b32.xlu1 %v3828_v54, %s6491_s19 }
0x31f4   :  { %v3831_v26 = vpop.permute.xlu1 %3830 }
0x31f5   :  { %v3833_v46 = vadd.f32 %v3831_v26, %v7495_v41 }
0x31f7   :  { %6347 = vtanh.f32 %v3833_v46 }
0x3201   :  { %v6348_v45 = vpop.eup %6347 }
0x3202   :  { %3837 = vrot.lane.b32.xlu1 %v6348_v45, %s6493_s22 }
0x3274   :  { %v3838_v49 = vpop.permute.xlu1 %3837 }
0x3275   :  { %v3840_v51 = vmul.f32 %v3838_v49, %v3835_v47 }
0x3277   :  { %v7502_v38 = vadd.f32 %v3841_v23, %v3840_v51 }
0x3279   :  { %v3843_v53 = vpack.c.bf16 %v7502_v38, %v7502_v38 }
0x327b   :  { %v3896_v5 = vrot.slane %v3843_v53, %v7010_v25  ;;  %3845 = vrot.lane.b32.xlu0 %v3843_v53, %s6493_s22 }
0x327d   :  { %v3903_v30 = vrot.slane %v3896_v5, %v7010_v25 }
0x327f   :  { %v5490_v50 = vpack.i.b16 %v3903_v30, %v3903_v30  ;;  %v3905_v40 = vunpack.i.h.s16 %v3903_v30 }
0x3281   :  { %v3910_v44 = vrot.slane %v5490_v50, %v6681_v62  ;;  %v3956_v57 = vpack.i.b16 %v3905_v40, %v3905_v40  ;;  %v7555_v50 = vld [vmem:[%s7839_s3 + $0x30] sm:$0xff]   ;;  %v7566_v40 = vld [vmem:[%s7839_s3 + $0x38] sm:$0xff]  }
0x3283   :  { %3911 = vrot.lane.b32.xlu0 %v3910_v44, %s6493_s22  ;;  %v3960_v39 = vrot.slane %v3956_v57, %v6681_v62 }
0x3285   :  { %3961 = vrot.lane.b32.xlu1 %v3960_v39, %s6493_s22 }
0x32ed   :  { %v7513_v58 = vpop.permute.xlu0 %3845 }
0x32ee   :  { %6024 = vmatmul.mubr.msk.bf16.vlgmr.msra.gmra.mrb[88].mxu1 %vm125_vm1, %v7513_v58 }
0x32ef   :  { %6034 = vmatpush3.bf16.xpose.msra.mxu1 %v7180_v4  ;;  %6035 = vmatprep.mubr.msk.bf16.mxu1 %vm6489_vm0, %v6488_v1 }
0x32f0   :  { %6045 = vmatprep.subr.bf16.mxu1 %v6488_v1 }
0x32f5   :  { %v3912_v34 = vpop.permute.xlu0 %3911 }
0x32f6   :  { %6030 = vmatmul.mubr.msk.bf16.vlgmr.msra.gmra.mrb[92].mxu0 %vm125_vm1, %v3912_v34 }
0x32f7   :  { %6040 = vmatpush3.bf16.msra.mxu0 %v7193_v14  ;;  %v3962_v63 = vpop.permute.xlu1 %3961  ;;  %6041 = vmatprep.mubr.msk.bf16.mxu0 %vm6489_vm0, %v6488_v1 }
0x32f8   :  { %6036 = vmatmul.mubr.msk.bf16.vlgmr.msra.gmra.mrb[92].mxu1 %vm125_vm1, %v3962_v63  ;;  %6051 = vmatprep.subr.bf16.mxu0 %v6488_v1 }
0x32f9   :  { %6046 = vmatpush3.bf16.msra.mxu1 %v7200_v16  ;;  %6047 = vmatprep.mubr.msk.bf16.mxu1 %vm6489_vm0, %v6488_v1 }
0x32fa   :  { %6059 = vmatprep.subr.bf16.mxu1 %v6488_v1 }
0x33c1   :  { %v7531_v7 = vpop.f32.mrb[88].mxu1 }
0x33c2   :  { %v6025_v6 = vpop.f32.mrb[89].mxu1  ;;  %v4130_v57 = vrot.slane %v7531_v7, 1 }
0x33c3   :  { %v3887_v10 = vpop.f32.mrb[90].mxu1 }
0x33c4   :  { %v6026_v20 = vpop.f32.mrb[91].mxu1 }
0x33c9   :  { %v3950_v61 = vpop.f32.mrb[92].mxu0 }
0x33ca   :  { %v6031_v17 = vpop.f32.mrb[93].mxu0  ;;  %v4006_v3 = vadd.f32 %v7537_v29, %v3950_v61 }
0x33cb   :  { %v3953_v59 = vpop.f32.mrb[94].mxu0  ;;  %v4000_v60 = vpop.f32.mrb[92].mxu1 }
0x33cc   :  { %v4007_v18 = vadd.f32 %v4000_v60, %v7216_v27  ;;  %v6032_v11 = vpop.f32.mrb[95].mxu0  ;;  %v6037_v28 = vpop.f32.mrb[93].mxu1 }
0x33cd   :  { %v4003_v12 = vpop.f32.mrb[94].mxu1 }
0x33ce   :  { %v4010_v35 = vrot.slane %v4007_v18, 7  ;;  %v6038_v55 = vpop.f32.mrb[95].mxu1 }
0x33d0   :  { %v4011_v36 = vsel %vm2526_vm9, %v4010_v35, %v4006_v3 }
0x33d1   :  { %v4013_v24 = vsel %vm2529_vm10, %v4011_v36, -inf }
0x33d2   :  { %4014 = vmax.xlane.f32.xlu1 %v4013_v24 }
0x345f   :  { %v4015_v31 = vpop.xlane.xlu1 %4014 }
0x3460   :  { %v4017_v8 = vrot.slane %v4015_v31, 1  ;;  %v4020_v37 = vsub.f32 %v4006_v3, %v4015_v31  ;;  %v389_v31 = vcombine.high %v7495_v41, %v7495_v41 }
0x3462   :  { %v4021_v33 = vsub.f32 %v4007_v18, %v4017_v8  ;;  %v4022_v2 = vmul.f32 1.442695, %v4020_v37 }
0x3464   :  { %v4024_v9 = vmul.f32 1.442695, %v4021_v33 }
0x3466   :  { %6349 = vpow2.f32 %v4024_v9 }
0x3467   :  { %6351 = vpow2.f32 %v4022_v2 }
0x3470   :  { %v6350_v19 = vpop.eup %6349 }
0x3471   :  { %v4028_v42 = vrot.slane %v6350_v19, 7  ;;  %v6352_v43 = vpop.eup %6351 }
0x3473   :  { %v4029_v54 = vsel %vm2526_vm9, %v4028_v42, %v6352_v43 }
0x3474   :  { %v4031_v26 = vsel %vm2529_vm10, %v4029_v54, 0.0 }
0x3475   :  { %4032 = vadd.xlane.f32.xlu0 %v4031_v26 }
0x3502   :  { %v4033_v46 = vpop.xlane.xlu0 %4032 }
0x3503   :  { %6353 = vrcp.f32 %v4033_v46 }
0x350d   :  { %v6354_v45 = vpop.eup %6353 }
0x350e   :  { %v4036_v47 = vrot.slane %v6354_v45, 1  ;;  %v4039_v49 = vmul.f32 %v6354_v45, %v6352_v43 }
0x3510   :  { %v4040_v23 = vmul.f32 %v6350_v19, %v4036_v47  ;;  %v4041_v51 = vpack.c.bf16 %v4039_v49, %v4039_v49 }
0x3512   :  { %v5318_v53 = vrot.slane %v4040_v23, 7  ;;  %6042 = vmatmul.mubr.msk.bf16.vlgmr.msra.gmra.mrb[96].mxu0 %vm2560_vm11, %v4041_v51  ;;  %v4042_v5 = vpack.c.bf16 %v4040_v23, %v4040_v23 }
0x3513   :  { %6052 = vmatpush3.bf16.msra.mxu0 %v7456_v0  ;;  %6055 = vmatprep.mubr.msk.bf16.mxu0 %vm6489_vm0, %v6488_v1 }
0x3514   :  { %v5319_v30 = vsel %vm2526_vm9, %v5318_v53, %v4039_v49  ;;  %6048 = vmatmul.mubr.msk.bf16.vlgmr.msra.gmra.mrb[96].mxu1 %vm2560_vm11, %v4042_v5  ;;  %6053 = vmatprep.subr.bf16.mxu0 %v6488_v1 }
0x3515   :  { %5338 = vst.msk [vmem:[#allocation4 + $0x8] sm:$0x3] %vm2529_vm10, %v5319_v30  ;;  %6060 = vmatpush3.bf16.msra.mxu1 %v7555_v50  ;;  %6063 = vmatprep.mubr.msk.bf16.mxu1 %vm6489_vm0, %v6488_v1 }
0x3516   :  { %6061 = vmatprep.subr.bf16.mxu1 %v6488_v1 }
0x3517   :  { %6054 = vmatpush3.bf16.msra.mxu0 %v7472_v52 }
0x3518   :  { %6067 = vmatprep.subr.bf16.mxu0 %v6488_v1 }
0x3519   :  { %6062 = vmatpush3.bf16.msra.mxu1 %v7566_v40 }
0x351a   :  { %6056 = vmatmul.mubr.msk.bf16.vlgmr.msra.gmra.mrb[100].mxu0 %vm125_vm1, %v7513_v58  ;;  %6073 = vmatprep.subr.bf16.mxu1 %v6488_v1 }
0x351b   :  { %6069 = vmatprep.mubr.msk.bf16.mxu0 %vm6489_vm0, %v6488_v1 }
0x3520   :  { %6068 = vmatpush3.bf16.xpose.msra.mxu0 %v7116_v21 }
0x3521   :  { %6079 = vmatprep.subr.bf16.mxu0 %v6488_v1 }
0x35e5   :  { %v4080_v44 = vpop.f32.mrb[96].mxu0 }
0x35e6   :  { %v4133_v39 = vadd.f32 %v4080_v44, %v7531_v7  ;;  %v6043_v34 = vpop.f32.mrb[97].mxu0 }
0x35e7   :  { %v4083_v63 = vpop.f32.mrb[98].mxu0  ;;  %v4123_v6 = vpop.f32.mrb[96].mxu1 }
0x35e8   :  { %v4134_v10 = vadd.f32 %v4130_v57, %v4123_v6  ;;  %v6044_v20 = vpop.f32.mrb[99].mxu0  ;;  %v6049_v58 = vpop.f32.mrb[97].mxu1  ;;  %v4135_v17 = vadd.f32 %v4133_v39, %v7249_v15 }
0x35e9   :  { %v4126_v61 = vpop.f32.mrb[98].mxu1 }
0x35ea   :  { %v4136_v59 = vadd.f32 %v4134_v10, %v7249_v15  ;;  %v6050_v60 = vpop.f32.mrb[99].mxu1 }
0x35ec   :  { %6355 = vtanh.f32 %v4136_v59 }
0x35ed   :  { %v4173_v18 = vpop.f32.mrb[100].mxu0  ;;  %6357 = vtanh.f32 %v4135_v17 }
0x35ee   :  { %v4174_v11 = vadd.f32 %v4173_v18, %v7131_v32  ;;  %v6057_v28 = vpop.f32.mrb[101].mxu0 }
0x35ef   :  { %v4176_v12 = vpop.f32.mrb[102].mxu0 }
0x35f0   :  { %v4193_v7 = vrot.slane %v4174_v11, %v6675_v56  ;;  %v6058_v3 = vpop.f32.mrb[103].mxu0  ;;  %v4179_v8 = vadd.f32 %v4174_v11, %v389_v31 }
0x35f2   :  { %4194 = vrot.lane.b32.xlu0 %v4193_v7, %s6491_s19  ;;  %v5496_v37 = vmul.f32 -1.442695, %v4179_v8 }
0x35f4   :  { %6359 = vpow2.f32 %v5496_v37 }
0x35f6   :  { %v6356_v35 = vpop.eup %6355 }
0x35f7   :  { %v5270_v55 = vrot.slane %v6356_v35, 7  ;;  %v6358_v36 = vpop.eup %6357 }
0x35f9   :  { %v5271_v24 = vsel %vm2526_vm9, %v5270_v55, %v6358_v36 }
0x35fa   :  { %5290 = vst.msk [vmem:[#allocation2 + $0x8] sm:$0x3] %vm901_vm12, %v5271_v24 }
0x35fe   :  { %v6360_v33 = vpop.eup %6359 }
0x35ff   :  { %v4183_v2 = vadd.f32 1.0, %v6360_v33 }
0x3601   :  { %6361 = vrcp.f32 %v4183_v2 }
0x360b   :  { %v6362_v9 = vpop.eup %6361 }
0x360c   :  { %v4204_v46 = vsub.f32 1.0, %v6362_v9  ;;  %v4210_v41 = vmul.f32 %v6362_v9, %v7502_v38 }
0x3664   :  { %v4195_v19 = vpop.permute.xlu0 %4194 }
0x3665   :  { %v4197_v42 = vmul.f32 %v6362_v9, %v4195_v19 }
0x3667   :  { %4199 = vrot.lane.b32.xlu1 %v4197_v42, %s6491_s19 }
0x36d9   :  { %v4200_v43 = vpop.permute.xlu1 %4199 }
0x36da   :  { %v4202_v54 = vadd.f32 %v4200_v43, %v389_v31 }
0x36dc   :  { %6363 = vtanh.f32 %v4202_v54 }
0x36e6   :  { %v6364_v26 = vpop.eup %6363 }
0x36e7   :  { %4206 = vrot.lane.b32.xlu1 %v6364_v26, %s6493_s22 }
0x3759   :  { %v4207_v45 = vpop.permute.xlu1 %4206 }
0x375a   :  { %v4209_v47 = vmul.f32 %v4207_v45, %v4204_v46 }
0x375c   :  { %v7590_v49 = vadd.f32 %v4210_v41, %v4209_v47 }
0x375e   :  { %v4212_v23 = vpack.c.bf16 %v7590_v49, %v7590_v49 }
0x3760   :  { %v4265_v51 = vrot.slane %v4212_v23, %v7010_v25  ;;  %4214 = vrot.lane.b32.xlu0 %v4212_v23, %s6493_s22 }
0x3762   :  { %v4272_v53 = vrot.slane %v4265_v51, %v7010_v25 }
0x3764   :  { %v5498_v5 = vpack.i.b16 %v4272_v53, %v4272_v53  ;;  %v4274_v30 = vunpack.i.h.s16 %v4272_v53 }
0x3766   :  { %v4279_v44 = vrot.slane %v5498_v5, %v6681_v62  ;;  %v4325_v57 = vpack.i.b16 %v4274_v30, %v4274_v30 }
0x3768   :  { %4280 = vrot.lane.b32.xlu0 %v4279_v44, %s6493_s22  ;;  %v4329_v38 = vrot.slane %v4325_v57, %v6681_v62 }
0x376a   :  { %4330 = vrot.lane.b32.xlu1 %v4329_v38, %s6493_s22 }
0x37d2   :  { %v7601_v39 = vpop.permute.xlu0 %4214 }
0x37d3   :  { %6064 = vmatmul.mubr.msk.bf16.vlgmr.msra.gmra.mrb[100].mxu1 %vm125_vm1, %v7601_v39 }
0x37d4   :  { %6074 = vmatpush3.bf16.xpose.msra.mxu1 %v7180_v4  ;;  %6075 = vmatprep.mubr.msk.bf16.mxu1 %vm6489_vm0, %v6488_v1 }
0x37d5   :  { %6085 = vmatprep.subr.bf16.mxu1 %v6488_v1 }
0x37da   :  { %v4281_v34 = vpop.permute.xlu0 %4280 }
0x37db   :  { %6070 = vmatmul.mubr.msk.bf16.vlgmr.msra.gmra.mrb[104].mxu0 %vm125_vm1, %v4281_v34 }
0x37dc   :  { %6080 = vmatpush3.bf16.msra.mxu0 %v7193_v14  ;;  %v4331_v63 = vpop.permute.xlu1 %4330  ;;  %6081 = vmatprep.mubr.msk.bf16.mxu0 %vm6489_vm0, %v6488_v1 }
0x37dd   :  { %6076 = vmatmul.mubr.msk.bf16.vlgmr.msra.gmra.mrb[104].mxu1 %vm125_vm1, %v4331_v63  ;;  %6091 = vmatprep.subr.bf16.mxu0 %v6488_v1 }
0x37de   :  { %6086 = vmatpush3.bf16.msra.mxu1 %v7200_v16  ;;  %6087 = vmatprep.mubr.msk.bf16.mxu1 %vm6489_vm0, %v6488_v1 }
0x37df   :  { %6099 = vmatprep.subr.bf16.mxu1 %v6488_v1 }
0x38a6   :  { %v7619_v6 = vpop.f32.mrb[100].mxu1 }
0x38a7   :  { %v6065_v10 = vpop.f32.mrb[101].mxu1  ;;  %v4499_v44 = vrot.slane %v7619_v6, 1 }
0x38a8   :  { %v4256_v20 = vpop.f32.mrb[102].mxu1 }
0x38a9   :  { %v6066_v58 = vpop.f32.mrb[103].mxu1 }
0x38ae   :  { %v4319_v61 = vpop.f32.mrb[104].mxu0 }
0x38af   :  { %v6071_v17 = vpop.f32.mrb[105].mxu0  ;;  %v4375_v7 = vadd.f32 %v7537_v29, %v4319_v61 }
0x38b0   :  { %v4322_v59 = vpop.f32.mrb[106].mxu0  ;;  %v4369_v60 = vpop.f32.mrb[104].mxu1 }
0x38b1   :  { %v4376_v18 = vadd.f32 %v4369_v60, %v7216_v27  ;;  %v6072_v11 = vpop.f32.mrb[107].mxu0  ;;  %v6077_v28 = vpop.f32.mrb[105].mxu1 }
0x38b2   :  { %v4372_v12 = vpop.f32.mrb[106].mxu1 }
0x38b3   :  { %v4379_v3 = vrot.slane %v4376_v18, 7  ;;  %v6078_v35 = vpop.f32.mrb[107].mxu1 }
0x38b5   :  { %v4380_v55 = vsel %vm2526_vm9, %v4379_v3, %v4375_v7 }
0x38b6   :  { %v4382_v36 = vsel %vm2529_vm10, %v4380_v55, -inf }
0x38b7   :  { %4383 = vmax.xlane.f32.xlu1 %v4382_v36  ;;  %v374_v36 = vcombine.high %v6668_v48, %v6668_v48 }
0x3944   :  { %v4384_v24 = vpop.xlane.xlu1 %4383 }
0x3945   :  { %v4386_v31 = vrot.slane %v4384_v24, 1  ;;  %v4389_v8 = vsub.f32 %v4375_v7, %v4384_v24  ;;  %v7661_v24 = vrot.slane %v374_v36, %v6675_v56 }
0x3947   :  { %v4390_v37 = vsub.f32 %v4376_v18, %v4386_v31  ;;  %v4391_v33 = vmul.f32 1.442695, %v4389_v8 }
0x3949   :  { %v4393_v2 = vmul.f32 1.442695, %v4390_v37 }
0x394b   :  { %6365 = vpow2.f32 %v4393_v2 }
0x394c   :  { %6367 = vpow2.f32 %v4391_v33 }
0x3955   :  { %v6366_v9 = vpop.eup %6365 }
0x3956   :  { %v4397_v19 = vrot.slane %v6366_v9, 7  ;;  %v6368_v42 = vpop.eup %6367 }
0x3958   :  { %v4398_v43 = vsel %vm2526_vm9, %v4397_v19, %v6368_v42 }
0x3959   :  { %v4400_v54 = vsel %vm2529_vm10, %v4398_v43, 0.0 }
0x395a   :  { %4401 = vadd.xlane.f32.xlu0 %v4400_v54 }
0x39e7   :  { %v4402_v26 = vpop.xlane.xlu0 %4401 }
0x39e8   :  { %6369 = vrcp.f32 %v4402_v26 }
0x39f2   :  { %v6370_v46 = vpop.eup %6369 }
0x39f3   :  { %v4405_v45 = vrot.slane %v6370_v46, 1  ;;  %v4408_v41 = vmul.f32 %v6370_v46, %v6368_v42 }
0x39f5   :  { %v4409_v47 = vmul.f32 %v6366_v9, %v4405_v45  ;;  %v4410_v23 = vpack.c.bf16 %v4408_v41, %v4408_v41 }
0x39f7   :  { %v5320_v51 = vrot.slane %v4409_v47, 7  ;;  %6082 = vmatmul.mubr.msk.bf16.vlgmr.msra.gmra.mrb[108].mxu0 %vm2560_vm11, %v4410_v23  ;;  %v4411_v53 = vpack.c.bf16 %v4409_v47, %v4409_v47 }
0x39f8   :  { %6092 = vmatpush3.bf16.msra.mxu0 %v7456_v0  ;;  %6095 = vmatprep.mubr.msk.bf16.mxu0 %vm6489_vm0, %v6488_v1 }
0x39f9   :  { %v5321_v5 = vsel %vm2526_vm9, %v5320_v51, %v4408_v41  ;;  %6088 = vmatmul.mubr.msk.bf16.vlgmr.msra.gmra.mrb[108].mxu1 %vm2560_vm11, %v4411_v53  ;;  %6093 = vmatprep.subr.bf16.mxu0 %v6488_v1 }
0x39fa   :  { %5339 = vst.msk [vmem:[#allocation4 + $0xa] sm:$0x3] %vm2529_vm10, %v5321_v5  ;;  %6100 = vmatpush3.bf16.msra.mxu1 %v7555_v50  ;;  %6103 = vmatprep.mubr.msk.bf16.mxu1 %vm6489_vm0, %v6488_v1 }
0x39fb   :  { %6101 = vmatprep.subr.bf16.mxu1 %v6488_v1 }
0x39fc   :  { %6094 = vmatpush3.bf16.msra.mxu0 %v7472_v52 }
0x39fd   :  { %6107 = vmatprep.subr.bf16.mxu0 %v6488_v1 }
0x39fe   :  { %6102 = vmatpush3.bf16.msra.mxu1 %v7566_v40 }
0x39ff   :  { %6096 = vmatmul.mubr.msk.bf16.vlgmr.msra.gmra.mrb[112].mxu0 %vm125_vm1, %v7601_v39  ;;  %6113 = vmatprep.subr.bf16.mxu1 %v6488_v1 }
0x3a00   :  { %6109 = vmatprep.mubr.msk.bf16.mxu0 %vm6489_vm0, %v6488_v1 }
0x3a05   :  { %6108 = vmatpush3.bf16.xpose.msra.mxu0 %v7116_v21 }
0x3a06   :  { %6119 = vmatprep.subr.bf16.mxu0 %v6488_v1 }
0x3aca   :  { %v4449_v30 = vpop.f32.mrb[108].mxu0 }
0x3acb   :  { %v4502_v57 = vadd.f32 %v4449_v30, %v7619_v6  ;;  %v6083_v38 = vpop.f32.mrb[109].mxu0 }
0x3acc   :  { %v4452_v34 = vpop.f32.mrb[110].mxu0  ;;  %v4492_v63 = vpop.f32.mrb[108].mxu1 }
0x3acd   :  { %v4503_v10 = vadd.f32 %v4499_v44, %v4492_v63  ;;  %v6084_v20 = vpop.f32.mrb[111].mxu0  ;;  %v6089_v39 = vpop.f32.mrb[109].mxu1  ;;  %v4504_v61 = vadd.f32 %v4502_v57, %v7249_v15 }
0x3ace   :  { %v4495_v58 = vpop.f32.mrb[110].mxu1 }
0x3acf   :  { %v4505_v17 = vadd.f32 %v4503_v10, %v7249_v15  ;;  %v6090_v59 = vpop.f32.mrb[111].mxu1 }
0x3ad1   :  { %6371 = vtanh.f32 %v4505_v17 }
0x3ad2   :  { %v4542_v60 = vpop.f32.mrb[112].mxu0  ;;  %6373 = vtanh.f32 %v4504_v61 }
0x3ad3   :  { %v4543_v18 = vadd.f32 %v4542_v60, %v7131_v32  ;;  %v6097_v11 = vpop.f32.mrb[113].mxu0 }
0x3ad4   :  { %v4545_v28 = vpop.f32.mrb[114].mxu0 }
0x3ad5   :  { %v4562_v6 = vrot.slane %v4543_v18, %v6675_v56  ;;  %v6098_v12 = vpop.f32.mrb[115].mxu0  ;;  %v4548_v31 = vadd.f32 %v4543_v18, %v7661_v24 }
0x3ad7   :  { %4563 = vrot.lane.b32.xlu0 %v4562_v6, %s6491_s19  ;;  %v5504_v8 = vmul.f32 -1.442695, %v4548_v31 }
0x3ad9   :  { %6375 = vpow2.f32 %v5504_v8 }
0x3adb   :  { %v6372_v7 = vpop.eup %6371 }
0x3adc   :  { %v5272_v3 = vrot.slane %v6372_v7, 7  ;;  %v6374_v35 = vpop.eup %6373 }
0x3ade   :  { %v5273_v55 = vsel %vm2526_vm9, %v5272_v3, %v6374_v35 }
0x3adf   :  { %5291 = vst.msk [vmem:[#allocation2 + $0xa] sm:$0x3] %vm901_vm12, %v5273_v55 }
0x3ae3   :  { %v6376_v37 = vpop.eup %6375 }
0x3ae4   :  { %v4552_v33 = vadd.f32 1.0, %v6376_v37 }
0x3ae6   :  { %6377 = vrcp.f32 %v4552_v33 }
0x3af0   :  { %v6378_v2 = vpop.eup %6377 }
0x3af1   :  { %v4573_v54 = vsub.f32 1.0, %v6378_v2  ;;  %v4579_v46 = vmul.f32 %v6378_v2, %v7590_v49 }
0x3b49   :  { %v4564_v9 = vpop.permute.xlu0 %4563 }
0x3b4a   :  { %v4566_v19 = vmul.f32 %v6378_v2, %v4564_v9 }
0x3b4c   :  { %4568 = vrot.lane.b32.xlu1 %v4566_v19, %s6491_s19 }
0x3bbe   :  { %v4569_v42 = vpop.permute.xlu1 %4568 }
0x3bbf   :  { %v4571_v43 = vadd.f32 %v4569_v42, %v7661_v24 }
0x3bc1   :  { %6379 = vtanh.f32 %v4571_v43 }
0x3bcb   :  { %v6380_v48 = vpop.eup %6379 }
0x3bcc   :  { %4575 = vrot.lane.b32.xlu1 %v6380_v48, %s6493_s22 }
0x3c3e   :  { %v4576_v26 = vpop.permute.xlu1 %4575 }
0x3c3f   :  { %v4578_v45 = vmul.f32 %v4576_v26, %v4573_v54 }
0x3c41   :  { %v7668_v41 = vadd.f32 %v4579_v46, %v4578_v45 }
0x3c43   :  { %v4581_v47 = vpack.c.bf16 %v7668_v41, %v7668_v41 }
0x3c45   :  { %v4634_v23 = vrot.slane %v4581_v47, %v7010_v25  ;;  %4583 = vrot.lane.b32.xlu0 %v4581_v47, %s6493_s22 }
0x3c47   :  { %v4641_v51 = vrot.slane %v4634_v23, %v7010_v25 }
0x3c49   :  { %v5506_v53 = vpack.i.b16 %v4641_v51, %v4641_v51  ;;  %v4643_v5 = vunpack.i.h.s16 %v4641_v51 }
0x3c4b   :  { %v4648_v30 = vrot.slane %v5506_v53, %v6681_v62  ;;  %v4694_v44 = vpack.i.b16 %v4643_v5, %v4643_v5 }
0x3c4d   :  { %4649 = vrot.lane.b32.xlu0 %v4648_v30, %s6493_s22  ;;  %v4698_v49 = vrot.slane %v4694_v44, %v6681_v62 }
0x3c4f   :  { %4699 = vrot.lane.b32.xlu1 %v4698_v49, %s6493_s22 }
0x3cb7   :  { %v7679_v57 = vpop.permute.xlu0 %4583 }
0x3cb8   :  { %6104 = vmatmul.mubr.msk.bf16.vlgmr.msra.gmra.mrb[112].mxu1 %vm125_vm1, %v7679_v57 }
0x3cb9   :  { %6114 = vmatpush3.bf16.xpose.msra.mxu1 %v7180_v4  ;;  %6115 = vmatprep.mubr.msk.bf16.mxu1 %vm6489_vm0, %v6488_v1 }
0x3cba   :  { %6125 = vmatprep.subr.bf16.mxu1 %v6488_v1 }
0x3cbf   :  { %v4650_v38 = vpop.permute.xlu0 %4649 }
0x3cc0   :  { %6110 = vmatmul.mubr.msk.bf16.vlgmr.msra.gmra.mrb[116].mxu0 %vm125_vm1, %v4650_v38 }
0x3cc1   :  { %6120 = vmatpush3.bf16.msra.mxu0 %v7193_v14  ;;  %v4700_v34 = vpop.permute.xlu1 %4699  ;;  %6121 = vmatprep.mubr.msk.bf16.mxu0 %vm6489_vm0, %v6488_v1 }
0x3cc2   :  { %6116 = vmatmul.mubr.msk.bf16.vlgmr.msra.gmra.mrb[116].mxu1 %vm125_vm1, %v4700_v34  ;;  %6131 = vmatprep.subr.bf16.mxu0 %v6488_v1 }
0x3cc3   :  { %6126 = vmatpush3.bf16.msra.mxu1 %v7200_v16  ;;  %6127 = vmatprep.mubr.msk.bf16.mxu1 %vm6489_vm0, %v6488_v1 }
0x3cc4   :  { %6139 = vmatprep.subr.bf16.mxu1 %v6488_v1 }
0x3d8b   :  { %v7697_v63 = vpop.f32.mrb[112].mxu1 }
0x3d8c   :  { %v6105_v10 = vpop.f32.mrb[113].mxu1 }
0x3d8d   :  { %v4625_v20 = vpop.f32.mrb[114].mxu1 }
0x3d8e   :  { %v6106_v39 = vpop.f32.mrb[115].mxu1 }
0x3d93   :  { %v4688_v58 = vpop.f32.mrb[116].mxu0 }
0x3d94   :  { %v6111_v61 = vpop.f32.mrb[117].mxu0  ;;  %v4744_v6 = vadd.f32 %v7537_v29, %v4688_v58 }
0x3d95   :  { %v4691_v17 = vpop.f32.mrb[118].mxu0  ;;  %v4738_v59 = vpop.f32.mrb[116].mxu1 }
0x3d96   :  { %v4745_v60 = vadd.f32 %v4738_v59, %v7216_v27  ;;  %v6112_v18 = vpop.f32.mrb[119].mxu0  ;;  %v6117_v11 = vpop.f32.mrb[117].mxu1 }
0x3d97   :  { %v4741_v28 = vpop.f32.mrb[118].mxu1 }
0x3d98   :  { %v4748_v12 = vrot.slane %v4745_v60, 7  ;;  %v6118_v7 = vpop.f32.mrb[119].mxu1  ;;  %v390_v28 = vcombine.high %v7661_v24, %v7661_v24 }
0x3d9a   :  { %v4749_v3 = vsel %vm2526_vm9, %v4748_v12, %v4744_v6 }
0x3d9b   :  { %v4751_v35 = vsel %vm2529_vm10, %v4749_v3, -inf }
0x3d9c   :  { %4752 = vmax.xlane.f32.xlu1 %v4751_v35 }
0x3e29   :  { %v4753_v55 = vpop.xlane.xlu1 %4752 }
0x3e2a   :  { %v4755_v36 = vrot.slane %v4753_v55, 1  ;;  %v4758_v31 = vsub.f32 %v4744_v6, %v4753_v55 }
0x3e2c   :  { %v4759_v8 = vsub.f32 %v4745_v60, %v4755_v36  ;;  %v4760_v37 = vmul.f32 1.442695, %v4758_v31 }
0x3e2e   :  { %v4762_v33 = vmul.f32 1.442695, %v4759_v8 }
0x3e30   :  { %6381 = vpow2.f32 %v4762_v33 }
0x3e31   :  { %6383 = vpow2.f32 %v4760_v37 }
0x3e3a   :  { %v6382_v2 = vpop.eup %6381 }
0x3e3b   :  { %v4766_v9 = vrot.slane %v6382_v2, 7  ;;  %v6384_v19 = vpop.eup %6383 }
0x3e3d   :  { %v4767_v42 = vsel %vm2526_vm9, %v4766_v9, %v6384_v19 }
0x3e3e   :  { %v4769_v43 = vsel %vm2529_vm10, %v4767_v42, 0.0 }
0x3e3f   :  { %4770 = vadd.xlane.f32.xlu0 %v4769_v43 }
0x3ecc   :  { %v4771_v48 = vpop.xlane.xlu0 %4770 }
0x3ecd   :  { %6385 = vrcp.f32 %v4771_v48 }
0x3ed7   :  { %v6386_v54 = vpop.eup %6385 }
0x3ed8   :  { %v4774_v26 = vrot.slane %v6386_v54, 1  ;;  %v4777_v46 = vmul.f32 %v6386_v54, %v6384_v19 }
0x3eda   :  { %v4778_v45 = vmul.f32 %v6382_v2, %v4774_v26  ;;  %v4779_v47 = vpack.c.bf16 %v4777_v46, %v4777_v46 }
0x3edc   :  { %v5322_v23 = vrot.slane %v4778_v45, 7  ;;  %6122 = vmatmul.mubr.msk.bf16.vlgmr.msra.gmra.mrb[120].mxu0 %vm2560_vm11, %v4779_v47  ;;  %v4780_v51 = vpack.c.bf16 %v4778_v45, %v4778_v45 }
0x3edd   :  { %6132 = vmatpush3.bf16.msra.mxu0 %v7456_v0  ;;  %6135 = vmatprep.mubr.msk.bf16.mxu0 %vm6489_vm0, %v6488_v1 }
0x3ede   :  { %v5323_v53 = vsel %vm2526_vm9, %v5322_v23, %v4777_v46  ;;  %6128 = vmatmul.mubr.msk.bf16.vlgmr.msra.gmra.mrb[120].mxu1 %vm2560_vm11, %v4780_v51  ;;  %6133 = vmatprep.subr.bf16.mxu0 %v6488_v1 }
0x3edf   :  { %5340 = vst.msk [vmem:[#allocation4 + $0xc] sm:$0x3] %vm2529_vm10, %v5323_v53  ;;  %6140 = vmatpush3.bf16.msra.mxu1 %v7555_v50  ;;  %6143 = vmatprep.mubr.msk.bf16.mxu1 %vm6489_vm0, %v6488_v1  ;;  %v4868_v50 = vrot.slane %v7697_v63, 1 }
0x3ee0   :  { %6141 = vmatprep.subr.bf16.mxu1 %v6488_v1 }
0x3ee1   :  { %6134 = vmatpush3.bf16.msra.mxu0 %v7472_v52 }
0x3ee2   :  { %6147 = vmatprep.subr.bf16.mxu0 %v6488_v1 }
0x3ee3   :  { %6142 = vmatpush3.bf16.msra.mxu1 %v7566_v40 }
0x3ee4   :  { %6136 = vmatmul.mubr.msk.bf16.vlgmr.msra.gmra.mrb[124].mxu0 %vm125_vm1, %v7679_v57  ;;  %6153 = vmatprep.subr.bf16.mxu1 %v6488_v1 }
0x3ee5   :  { %6149 = vmatprep.mubr.msk.bf16.mxu0 %vm6489_vm0, %v6488_v1 }
0x3eea   :  { %6148 = vmatpush3.bf16.xpose.msra.mxu0 %v7116_v21 }
0x3eeb   :  { %6159 = vmatprep.subr.bf16.mxu0 %v6488_v1 }
0x3faf   :  { %v4818_v0 = vpop.f32.mrb[120].mxu0 }
0x3fb0   :  { %v4871_v52 = vadd.f32 %v4818_v0, %v7697_v63  ;;  %v6123_v5 = vpop.f32.mrb[121].mxu0 }
0x3fb1   :  { %v4821_v30 = vpop.f32.mrb[122].mxu0  ;;  %v4861_v40 = vpop.f32.mrb[120].mxu1 }
0x3fb2   :  { %v4872_v44 = vadd.f32 %v4868_v50, %v4861_v40  ;;  %v6124_v49 = vpop.f32.mrb[123].mxu0  ;;  %v6129_v57 = vpop.f32.mrb[121].mxu1  ;;  %v4873_v34 = vadd.f32 %v4871_v52, %v7249_v15 }
0x3fb3   :  { %v4864_v38 = vpop.f32.mrb[122].mxu1 }
0x3fb4   :  { %v4874_v10 = vadd.f32 %v4872_v44, %v7249_v15  ;;  %v6130_v20 = vpop.f32.mrb[123].mxu1 }
0x3fb6   :  { %6387 = vtanh.f32 %v4874_v10 }
0x3fb7   :  { %v4911_v21 = vpop.f32.mrb[124].mxu0  ;;  %6389 = vtanh.f32 %v4873_v34 }
0x3fb8   :  { %v4912_v39 = vadd.f32 %v4911_v21, %v7131_v32  ;;  %v6137_v58 = vpop.f32.mrb[125].mxu0 }
0x3fb9   :  { %v4914_v61 = vpop.f32.mrb[126].mxu0 }
0x3fba   :  { %v4931_v63 = vrot.slane %v4912_v39, %v6675_v56  ;;  %v6138_v17 = vpop.f32.mrb[127].mxu0  ;;  %v4917_v6 = vadd.f32 %v4912_v39, %v390_v28 }
0x3fbc   :  { %4932 = vrot.lane.b32.xlu0 %v4931_v63, %s6491_s19  ;;  %v5512_v12 = vmul.f32 -1.442695, %v4917_v6 }
0x3fbe   :  { %6391 = vpow2.f32 %v5512_v12 }
0x3fc0   :  { %v6388_v59 = vpop.eup %6387 }
0x3fc1   :  { %v5274_v60 = vrot.slane %v6388_v59, 7  ;;  %v6390_v18 = vpop.eup %6389 }
0x3fc3   :  { %v5275_v11 = vsel %vm2526_vm9, %v5274_v60, %v6390_v18 }
0x3fc4   :  { %5292 = vst.msk [vmem:[#allocation2 + $0xc] sm:$0x3] %vm901_vm12, %v5275_v11 }
0x3fc8   :  { %v6392_v32 = vpop.eup %6391 }
0x3fc9   :  { %v4921_v7 = vadd.f32 1.0, %v6392_v32 }
0x3fcb   :  { %6393 = vrcp.f32 %v4921_v7 }
0x3fd5   :  { %v6394_v3 = vpop.eup %6393 }
0x3fd6   :  { %v4942_v37 = vsub.f32 1.0, %v6394_v3  ;;  %v4948_v24 = vmul.f32 %v6394_v3, %v7668_v41 }
0x402e   :  { %v4933_v35 = vpop.permute.xlu0 %4932 }
0x402f   :  { %v4935_v55 = vmul.f32 %v6394_v3, %v4933_v35 }
0x4031   :  { %4937 = vrot.lane.b32.xlu1 %v4935_v55, %s6491_s19 }
0x40a3   :  { %v4938_v36 = vpop.permute.xlu1 %4937 }
0x40a4   :  { %v4940_v31 = vadd.f32 %v4938_v36, %v390_v28 }
0x40a6   :  { %6395 = vtanh.f32 %v4940_v31 }
0x40b0   :  { %v6396_v8 = vpop.eup %6395 }
0x40b1   :  { %4944 = vrot.lane.b32.xlu1 %v6396_v8, %s6493_s22 }
0x4123   :  { %v4945_v33 = vpop.permute.xlu1 %4944 }
0x4124   :  { %v4947_v2 = vmul.f32 %v4945_v33, %v4942_v37 }
0x4126   :  { %v4949_v9 = vadd.f32 %v4948_v24, %v4947_v2 }
0x4128   :  { %v4950_v19 = vpack.c.bf16 %v4949_v9, %v4949_v9  ;;  %v5349_v38 = vrot.slane %v4949_v9, %v6675_v56  ;;  %v6417_v56 = vld [vmem:[%s7840_s4] sm:$0xff] }
0x412a   :  { %v5003_v42 = vrot.slane %v4950_v19, %v7010_v25  ;;  %4952 = vrot.lane.b32.xlu0 %v4950_v19, %s6493_s22 }
0x412c   :  { %v5010_v43 = vrot.slane %v5003_v42, %v7010_v25 }
0x412e   :  { %v5514_v48 = vpack.i.b16 %v5010_v43, %v5010_v43  ;;  %v5012_v54 = vunpack.i.h.s16 %v5010_v43 }
0x4130   :  { %v5017_v26 = vrot.slane %v5514_v48, %v6681_v62  ;;  %v5063_v46 = vpack.i.b16 %v5012_v54, %v5012_v54 }
0x4132   :  { %5018 = vrot.lane.b32.xlu0 %v5017_v26, %s6493_s22  ;;  %v5067_v45 = vrot.slane %v5063_v46, %v6681_v62 }
0x4134   :  { %5068 = vrot.lane.b32.xlu1 %v5067_v45, %s6493_s22 }
0x419c   :  { %v4953_v41 = vpop.permute.xlu0 %4952 }
0x419d   :  { %6144 = vmatmul.mubr.msk.bf16.vlgmr.msra.gmra.mrb[124].mxu1 %vm125_vm1, %v4953_v41 }
0x419e   :  { %6154 = vmatpush3.bf16.xpose.msra.mxu1 %v7180_v4  ;;  %6155 = vmatprep.mubr.msk.bf16.mxu1 %vm6489_vm0, %v6488_v1 }
0x419f   :  { %6165 = vmatprep.subr.bf16.mxu1 %v6488_v1 }
0x41a4   :  { %v5019_v25 = vpop.permute.xlu0 %5018 }
0x41a5   :  { %6150 = vmatmul.mubr.msk.bf16.vlgmr.msra.gmra.mrb[128].mxu0 %vm125_vm1, %v5019_v25 }
0x41a6   :  { %6160 = vmatpush3.bf16.msra.mxu0 %v7193_v14  ;;  %v5069_v47 = vpop.permute.xlu1 %5068  ;;  %6161 = vmatprep.mubr.msk.bf16.mxu0 %vm6489_vm0, %v6488_v1 }
0x41a7   :  { %6156 = vmatmul.mubr.msk.bf16.vlgmr.msra.gmra.mrb[128].mxu1 %vm125_vm1, %v5069_v47 }
0x41a8   :  { %6166 = vmatpush3.bf16.msra.mxu1 %v7200_v16  ;;  %6167 = vmatprep.mubr.msk.bf16.mxu1 %vm6489_vm0, %v6488_v1 }
0x4270   :  { %v7761_v62 = vpop.f32.mrb[124].mxu1 }
0x4271   :  { %v6145_v4 = vpop.f32.mrb[125].mxu1 }
0x4272   :  { %v4994_v23 = vpop.f32.mrb[126].mxu1 }
0x4273   :  { %v6146_v51 = vpop.f32.mrb[127].mxu1 }
0x4278   :  { %v5057_v53 = vpop.f32.mrb[128].mxu0 }
0x4279   :  { %v6151_v0 = vpop.f32.mrb[129].mxu0  ;;  %v5113_v44 = vadd.f32 %v7537_v29, %v5057_v53  ;;  %v898_v29 = vsub.s32 7, %v6631_v22  ;;  %v108_v22 = vld [vmem:[%s7837_s1 + $0x18] sm:$0x3] }
0x427a   :  { %v5060_v50 = vpop.f32.mrb[130].mxu0  ;;  %v5107_v14 = vpop.f32.mrb[128].mxu1 }
0x427b   :  { %v5114_v52 = vadd.f32 %v5107_v14, %v7216_v27  ;;  %v6152_v5 = vpop.f32.mrb[131].mxu0  ;;  %v6157_v30 = vpop.f32.mrb[129].mxu1  ;;  %v899_v63 = vrot.slane %v6417_v56, %v898_v29 }
0x427c   :  { %v5110_v40 = vpop.f32.mrb[130].mxu1 }
0x427d   :  { %v5117_v16 = vrot.slane %v5114_v52, 7  ;;  %v6158_v49 = vpop.f32.mrb[131].mxu1  ;;  %v900_v11 = vmul.f32 %v899_v63, %v7090_v13 }
0x427f   :  { %v5118_v1 = vsel %vm2526_vm9, %v5117_v16, %v5113_v44  ;;  %v902_v28 = vsel %vm901_vm12, %v900_v11, 0.0 }
0x4280   :  { %v5120_v57 = vsel %vm2529_vm10, %v5118_v1, -inf }
0x4281   :  { %5121 = vmax.xlane.f32.xlu1 %v5120_v57 }
0x4292   :  { %5350 = vrot.lane.b32.xlu1 %v5349_v38, %s6493_s22 }
0x430e   :  { %v5122_v34 = vpop.xlane.xlu1 %5121 }
0x430f   :  { %v5124_v10 = vrot.slane %v5122_v34, 1  ;;  %v5127_v20 = vsub.f32 %v5113_v44, %v5122_v34 }
0x4311   :  { %v5128_v27 = vsub.f32 %v5114_v52, %v5124_v10  ;;  %v5129_v39 = vmul.f32 1.442695, %v5127_v20 }
0x4312   :  { %v5351_v21 = vpop.permute.xlu1 %5350 }
0x4313   :  { %v5131_v58 = vmul.f32 1.442695, %v5128_v27  ;;  %5353 = vst.msk [vmem:[#allocation6] sm:$0x3] %vm901_vm12, %v5351_v21 }
0x4315   :  { %6397 = vpow2.f32 %v5131_v58 }
0x4316   :  { %6399 = vpow2.f32 %v5129_v39 }
0x431f   :  { %v6398_v61 = vpop.eup %6397 }
0x4320   :  { %v5135_v17 = vrot.slane %v6398_v61, 7  ;;  %v6400_v59 = vpop.eup %6399 }
0x4322   :  { %v5136_v60 = vsel %vm2526_vm9, %v5135_v17, %v6400_v59 }
0x4323   :  { %v5138_v18 = vsel %vm2529_vm10, %v5136_v60, 0.0 }
0x4324   :  { %5139 = vadd.xlane.f32.xlu0 %v5138_v18 }
0x4328   :  { %903 = vadd.xlane.f32.xlu0 %v902_v28 }
0x43b1   :  { %v5140_v6 = vpop.xlane.xlu0 %5139 }
0x43b2   :  { %6401 = vrcp.f32 %v5140_v6 }
0x43b5   :  { %v904_v12 = vpop.xlane.xlu0 %903 }
0x43b6   :  { %v905_v32 = vadd.f32 %v904_v12, %v108_v22 }
0x43b8   :  { %v5425_v7 = vmul.f32 -1.442695, %v905_v32 }
0x43ba   :  { %6403 = vpow2.f32 %v5425_v7 }
0x43bc   :  { %v6402_v3 = vpop.eup %6401 }
0x43bd   :  { %v5143_v35 = vrot.slane %v6402_v3, 1  ;;  %v5146_v55 = vmul.f32 %v6402_v3, %v6400_v59 }
0x43bf   :  { %v5147_v36 = vmul.f32 %v6398_v61, %v5143_v35  ;;  %v5148_v31 = vpack.c.bf16 %v5146_v55, %v5146_v55 }
0x43c1   :  { %v5324_v13 = vrot.slane %v5147_v36, 7  ;;  %6162 = vmatmul.mubr.msk.bf16.vlgmr.msra.gmra.mrb[132].mxu0 %vm2560_vm11, %v5148_v31  ;;  %v5149_v8 = vpack.c.bf16 %v5147_v36, %v5147_v36 }
0x43c3   :  { %v5325_v37 = vsel %vm2526_vm9, %v5324_v13, %v5146_v55  ;;  %6168 = vmatmul.mubr.msk.bf16.vlgmr.msra.gmra.mrb[132].mxu1 %vm2560_vm11, %v5149_v8 }
0x43c4   :  { %v6404_v33 = vpop.eup %6403  ;;  %5341 = vst.msk [vmem:[#allocation4 + $0xe] sm:$0x3] %vm2529_vm10, %v5325_v37 }
0x43c5   :  { %v909_v24 = vadd.f32 1.0, %v6404_v33 }
0x43c7   :  { %6405 = vrcp.f32 %v909_v24 }
0x43d1   :  { %v6406_v2 = vpop.eup %6405 }
0x43d2   :  { %913 = vst.msk [vmem:[%s7841_s5] sm:$0x3] %vm912_vm13, %v6406_v2 }
0x43d3   :  { %6429 = shalt.err (!%p6426_p4)
}
0x43d4   :  { %s6430_s27 = scalar_lea.hbm %s7843_s7, 256 }
0x43d5   :  { %p6431_p5 = scmp.ne.s32.totalorder %s7843_s7, %s6430_s27  ;;  %p6434_p6 = scmp.lt.u32.totalorder %s6430_s27, %s7843_s7 }
0x43d7   :  { %p6436_p7 = pnand %p6434_p6, %p6431_p5 }
0x43d9   :  { %6439 = shalt.err (!%p6436_p7)
}
0x43da   :  { %s6497_s9 = smov 2   ;;  %s6498_s12 = smov [#allocation6]  }
0x43db   :  { %5379 = dma.vmem_to_hbm [thread:$0]  %s5374_s21, 256, %s7843_s7, [#allocation5], %s6494_s23, %s6494_s23, %s6497_s9  }
0x43dc   :  { %s5386_s13 = sshll.u32 %s6498_s12, 4  ;;  %s5387_s13 = int_to_ptr.vmem [resolvable:$true] %s5386_s13 }
0x43dd   :  { %s6440_s2 = scalar_lea.vmem %s5387_s13, 32  ;;  %p6445_p9 = scmp.lt.s32.totalorder %s5387_s13, %s5387_s13 }
0x43de   :  { %p6441_p8 = scmp.ne.s32.totalorder %s5387_s13, %s6440_s2  ;;  %p6446_p10 = scmp.lt.s32.totalorder %s6440_s2, %s6440_s2 }
0x43e0   :  { %p6447_p11 = por %p6446_p10, %p6445_p9 }
0x43e2   :  { %p6448_p12 = pnand %p6447_p11, %p6441_p8 }
0x43e4   :  { %6451 = shalt.err (!%p6448_p12)
}
0x43e5   :  { %s6452_s15 = scalar_lea.hbm %s7844_s8, 32 }
0x43e6   :  { %p6453_p13 = scmp.ne.s32.totalorder %s7844_s8, %s6452_s15  ;;  %p6456_p0 = scmp.lt.u32.totalorder %s6452_s15, %s7844_s8 }
0x43e8   :  { %p6458_p1 = pnand %p6456_p0, %p6453_p13 }
0x43ea   :  { %6461 = shalt.err (!%p6458_p1)
}
0x43eb   :  { %5389 = dma.vmem_to_hbm [thread:$0]  %s5387_s13, 32, %s7844_s8, [#allocation5]   ;;  %v5237_v19 = vrot.slane %v7761_v62, 1 }
0x43ec   :  { %s6499_s8 = smov [#allocation2]  }
0x43ed   :  { %s5361_s18 = sshll.u32 %s6499_s8, 4  ;;  %s5362_s18 = int_to_ptr.vmem [resolvable:$true] %s5361_s18 }
0x43ee   :  { %s6462_s1 = scalar_lea.vmem %s5362_s18, 256  ;;  %p6467_p3 = scmp.lt.s32.totalorder %s5362_s18, %s5362_s18 }
0x43ef   :  { %p6463_p2 = scmp.ne.s32.totalorder %s5362_s18, %s6462_s1  ;;  %p6468_p4 = scmp.lt.s32.totalorder %s6462_s1, %s6462_s1 }
0x43f1   :  { %p6469_p5 = por %p6468_p4, %p6467_p3 }
0x43f3   :  { %p6470_p6 = pnand %p6469_p5, %p6463_p2 }
0x4494   :  { %v5187_v9 = vpop.f32.mrb[132].mxu0 }
0x4495   :  { %v5240_v42 = vadd.f32 %v5187_v9, %v7761_v62  ;;  %v6163_v43 = vpop.f32.mrb[133].mxu0 }
0x4496   :  { %v5190_v48 = vpop.f32.mrb[134].mxu0  ;;  %v5230_v54 = vpop.f32.mrb[132].mxu1 }
0x4497   :  { %v5241_v26 = vadd.f32 %v5237_v19, %v5230_v54  ;;  %v6164_v46 = vpop.f32.mrb[135].mxu0  ;;  %v6169_v45 = vpop.f32.mrb[133].mxu1  ;;  %v5242_v25 = vadd.f32 %v5240_v42, %v7249_v15 }
0x4498   :  { %v5233_v41 = vpop.f32.mrb[134].mxu1 }
0x4499   :  { %v5243_v47 = vadd.f32 %v5241_v26, %v7249_v15  ;;  %v6170_v4 = vpop.f32.mrb[135].mxu1 }
0x449b   :  { %6407 = vtanh.f32 %v5243_v47 }
0x449c   :  { %6409 = vtanh.f32 %v5242_v25 }
0x44a5   :  { %v6408_v23 = vpop.eup %6407 }
0x44a6   :  { %v5276_v51 = vrot.slane %v6408_v23, 7  ;;  %v6410_v53 = vpop.eup %6409 }
0x44a8   :  { %v5277_v62 = vsel %vm2526_vm9, %v5276_v51, %v6410_v53 }
0x44a9   :  { %5293 = vst.msk [vmem:[#allocation2 + $0xe] sm:$0x3] %vm901_vm12, %v5277_v62 }
0x44aa   :  { %6473 = shalt.err (!%p6470_p6)
}
0x44ab   :  { %s6474_s21 = scalar_lea.hbm %s7842_s6, 256 }
0x44ac   :  { %p6475_p7 = scmp.ne.s32.totalorder %s7842_s6, %s6474_s21  ;;  %p6478_p8 = scmp.lt.u32.totalorder %s6474_s21, %s7842_s6 }
0x44ae   :  { %p6480_p9 = pnand %p6478_p8, %p6475_p7 }
0x44b0   :  { %6483 = shalt.err (!%p6480_p9)
}
0x44b1   :  { %5367 = dma.vmem_to_hbm [thread:$0]  %s5362_s18, 256, %s7842_s6, [#allocation3], %s6494_s23, %s6494_s23, %s6497_s9  }
0x44b2   :  { %6484 = dma.done.wait [#allocation3], 256  }
0x44b3   :  { %6485 = vsyncadd [#allocation3], 4294967040 }
0x44b4   :  { %6486 = dma.done.wait [#allocation5], 288  }
0x44b5   :  { %6487 = vsyncadd [#allocation5], 4294967008 }
0x44b6   :  { %5401 = vsyncpa [#allocation3], 1 }
0x44b7   :  { %5402 = vsyncpa [#allocation5], 1 }

</bundles_post_ra>
